<compile_context>
chip_gen: v7x
topology: tpu7x:2x2x1
jax: 0.10.0
libtpu: 0.0.40
codegen_flags: <defaults>
</compile_context>

<pallas_src>
import numpy as np
import jax
import jax.numpy as jnp
from jax import lax
from jax.experimental import pallas as pl
from jax.experimental.pallas import tpu as pltpu


_K = 5                    # conv kernel size
_H = 28                   # input spatial size
_OH1, _OW1 = 24, 24       # conv1 output spatial
_PH1, _PW1 = 12, 12       # pool1 output spatial
_OH2, _OW2 = 8, 8         # conv2 output spatial
_PH2, _PW2 = 4, 4         # pool2 output spatial
_C1, _C2 = 20, 40         # conv channel counts
_NF1, _NCLS = 50, 16      # fc sizes
_LB = 256                 # lane width of one ow-parity block (240 / 160 used, padded to 256)


# ----------------------------- fused Pallas kernel -----------------------------

def _fused_forward_kernel(x_ref, wb1_ref, b1t_ref, wb2_ref, b2t_ref,
                          fw1_ref, fb1_ref, fw2_ref, fb2_ref,
                          o_ref, wm1_scr, x1_scr, wm2_scr):
    f32 = jnp.float32
    BT = x_ref.shape[1]                      # batch tile (rows are spatial-major, batch-minor)

    # ---- conv1 (5x5, 1->20): 5 banded MXU matmuls, lanes = [even-ow | odd-ow] blocks ----
    acc1 = jnp.zeros((_OH1 * BT, 2 * _LB), f32)
    for ky in range(_K):
        xk = x_ref[ky:ky + _OH1, :, :].reshape(_OH1 * BT, _H)        # rows = (oh, b)
        acc1 = acc1 + jnp.dot(xk, wb1_ref[ky], preferred_element_type=f32)
    acc1 = acc1 + b1t_ref[...]

    # ---- 2x2 maxpool + relu #1: W-pairs = even vs odd lane block (pure VPU max) ----
    wm1 = jnp.maximum(acc1[:, :_LB], acc1[:, _LB:])                  # (24*BT, 256)
    wm1_scr[...] = wm1.reshape(_PH1, 2 * BT, _LB)                    # groups of (oh2, q*BT+b)
    #      H-pairs = first BT rows vs last BT rows of each oh2 group, then ReLU
    x1_scr[...] = jnp.maximum(
        jnp.maximum(wm1_scr[:, :BT, :], wm1_scr[:, BT:, :]), 0.0)    # (12, BT, 256)

    # ---- conv2 (5x5, 20->40): 5 banded MXU matmuls ----
    acc2 = jnp.zeros((_OH2 * BT, 2 * _LB), f32)
    for ky in range(_K):
        xk = x1_scr[ky:ky + _OH2, :, :].reshape(_OH2 * BT, _LB)      # rows = (oh3, b)
        acc2 = acc2 + jnp.dot(xk, wb2_ref[ky], preferred_element_type=f32)
    acc2 = acc2 + b2t_ref[...]
    # TODO(synk): nn.Dropout2d(p=0.5) after conv2 is stochastic; identity here (eval mode).

    # ---- 2x2 maxpool + relu #2 (W-pairs) ----
    wm2 = jnp.maximum(acc2[:, :_LB], acc2[:, _LB:])                  # (8*BT, 256)
    wm2_scr[...] = wm2.reshape(_PH2, 2 * BT, _LB)

    # ---- fc1 (640->50): pool2-H + relu fused into 4 accumulated (BT,256)@(256,50) matmuls ----
    h = jnp.zeros((BT, _NF1), f32)
    for h4 in range(_PH2):
        x2h = jnp.maximum(
            jnp.maximum(wm2_scr[h4, :BT, :], wm2_scr[h4, BT:, :]), 0.0)   # (BT, 256), rows = b
        h = h + jnp.dot(x2h, fw1_ref[h4], preferred_element_type=f32)
    h = jnp.maximum(h + fb1_ref[...], 0.0)
    # TODO(synk): F.dropout after fc1 is stochastic; identity here (eval mode).

    # ---- fc2 (50->16) + log_softmax ----
    y = jnp.dot(h, fw2_ref[...], preferred_element_type=f32) + fb2_ref[...]
    m = jnp.max(y, axis=-1, keepdims=True)
    lse = jnp.log(jnp.sum(jnp.exp(y - m), axis=-1, keepdims=True)) + m
    o_ref[...] = y - lse


# ------------------------------- weight packing ---------------------------------

def _band_indicator(n_half, n_in):
    # I[kx, p, j, w] = 1 iff w == 2*j + p + kx  (output column 2*j+p reads input column w at tap kx)
    kx = np.arange(_K).reshape(_K, 1, 1, 1)
    p = np.arange(2).reshape(1, 2, 1, 1)
    j = np.arange(n_half).reshape(1, 1, n_half, 1)
    w = np.arange(n_in).reshape(1, 1, 1, n_in)
    return (w == 2 * j + p + kx).astype(np.float32)


def _pack_params(params):
    f32 = jnp.float32

    # conv1 (20,1,5,5) -> banded (5, 28, 512); lane = 256*p + ow2*20 + cout
    w1t = jnp.transpose(params["conv1_w"][:, 0], (1, 2, 0)).astype(f32)       # (ky, kx, cout)
    i1 = jnp.asarray(_band_indicator(_PW1, _H))                               # (kx, p, ow2, w)
    t1 = jnp.einsum("ykc,kpow->ywpoc", w1t, i1)                               # (5, 28, 2, 12, 20)
    wb1 = jnp.pad(t1.reshape(_K, _H, 2, _PW1 * _C1),
                  ((0, 0), (0, 0), (0, 0), (0, _LB - _PW1 * _C1))).reshape(_K, _H, 2 * _LB)
    b1 = jnp.pad(jnp.tile(params["conv1_b"].astype(f32), _PW1), (0, _LB - _PW1 * _C1))
    b1t = jnp.concatenate([b1, b1]).reshape(1, 2 * _LB)

    # conv2 (40,20,5,5) -> banded (5, 256, 512); row = ow2*20+cin, lane = 256*p + ow4*40 + cout
    w2t = jnp.transpose(params["conv2_w"], (2, 3, 1, 0)).astype(f32)          # (ky, kx, cin, cout)
    i2 = jnp.asarray(_band_indicator(_PW2, _PW1))                             # (kx, p, ow4, ow2)
    t2 = jnp.einsum("ykio,kpqw->ywipqo", w2t, i2)                             # (5, 12, 20, 2, 4, 40)
    wb2 = jnp.pad(t2.reshape(_K, _PW1 * _C1, 2, _PW2 * _C2),
                  ((0, 0), (0, _LB - _PW1 * _C1), (0, 0), (0, _LB - _PW2 * _C2)))
    wb2 = wb2.reshape(_K, _LB, 2 * _LB)
    b2 = jnp.pad(jnp.tile(params["conv2_b"].astype(f32), _PW2), (0, _LB - _PW2 * _C2))
    b2t = jnp.concatenate([b2, b2]).reshape(1, 2 * _LB)

    # fc1 (50, 640) torch feature order (c, h, w) -> per-h4 (4, 256, 50), row = w4*40 + c
    f1 = params["fc1_w"].astype(f32).reshape(_NF1, _C2, _PH2, _PW2)
    f1 = jnp.transpose(f1, (2, 3, 1, 0)).reshape(_PH2, _PW2 * _C2, _NF1)
    fw1 = jnp.pad(f1, ((0, 0), (0, _LB - _PW2 * _C2), (0, 0)))
    fb1 = params["fc1_b"].astype(f32).reshape(1, _NF1)

    fw2 = params["fc2_w"].T.astype(f32)                                       # (50, 16)
    fb2 = params["fc2_b"].astype(f32).reshape(1, _NCLS)
    return wb1, b1t, wb2, b2t, fw1, fb1, fw2, fb2


# ------------------------------- wrapper ---------------------------------

def _pick_batch_tile(B):
    # biggest multiple-of-8 tile that still leaves >= 2 grid steps (pipelining / megacore)
    for bt in (128, 64, 32, 16, 8):
        if B % bt == 0 and B // bt >= 2:
            return bt
    return 8 if B % 8 == 0 else B


def init_params(key):
    k = jax.random.split(key, 8)
    s = 0.1
    return {
        "conv1_w": s * jax.random.normal(k[0], (20, 1, 5, 5), jnp.float32),
        "conv1_b": s * jax.random.normal(k[1], (20,), jnp.float32),
        "conv2_w": s * jax.random.normal(k[2], (40, 20, 5, 5), jnp.float32),
        "conv2_b": s * jax.random.normal(k[3], (40,), jnp.float32),
        "fc1_w":   s * jax.random.normal(k[4], (50, 40 * 4 * 4), jnp.float32),
        "fc1_b":   s * jax.random.normal(k[5], (50,), jnp.float32),
        "fc2_w":   s * jax.random.normal(k[6], (16, 50), jnp.float32),
        "fc2_b":   s * jax.random.normal(k[7], (16,), jnp.float32),
    }


@jax.jit
def forward(params, x_nchw):
    B = x_nchw.shape[0]
    BT = _pick_batch_tile(B)
    # squeeze Cin=1 and put H outermost: (28, B, 28), so the batch dim is blocked on the grid
    xh = jnp.transpose(x_nchw[:, 0].astype(jnp.float32), (1, 0, 2))
    wb1, b1t, wb2, b2t, fw1, fb1, fw2, fb2 = _pack_params(params)

    return pl.pallas_call(
        _fused_forward_kernel,
        out_shape=jax.ShapeDtypeStruct((B, _NCLS), jnp.float32),
        grid=(B // BT,),
        in_specs=[
            pl.BlockSpec((_H, BT, _H), lambda i: (0, i, 0)),            # image tile
            pl.BlockSpec((_K, _H, 2 * _LB), lambda i: (0, 0, 0)),       # conv1 band (resident)
            pl.BlockSpec((1, 2 * _LB), lambda i: (0, 0)),
            pl.BlockSpec((_K, _LB, 2 * _LB), lambda i: (0, 0, 0)),      # conv2 band (resident)
            pl.BlockSpec((1, 2 * _LB), lambda i: (0, 0)),
            pl.BlockSpec((_PH2, _LB, _NF1), lambda i: (0, 0, 0)),       # fc1 (resident)
            pl.BlockSpec((1, _NF1), lambda i: (0, 0)),
            pl.BlockSpec((_NF1, _NCLS), lambda i: (0, 0)),              # fc2 (resident)
            pl.BlockSpec((1, _NCLS), lambda i: (0, 0)),
        ],
        out_specs=pl.BlockSpec((BT, _NCLS), lambda i: (i, 0)),
        scratch_shapes=[
            pltpu.VMEM((_PH1, 2 * BT, _LB), jnp.float32),   # pool1 W-maxed rows
            pltpu.VMEM((_PH1, BT, _LB), jnp.float32),       # pool1 output (conv2 input)
            pltpu.VMEM((_PH2, 2 * BT, _LB), jnp.float32),   # pool2 W-maxed rows
        ],
        compiler_params=pltpu.CompilerParams(
            dimension_semantics=("parallel",),
            vmem_limit_bytes=32 * 1024 * 1024,
        ),
    )(xh, wb1, b1t, wb2, b2t, fw1, fb1, fw2, fb2)


def forward_ref(params, x_nchw):
    # pure-JAX reference for correctness checking
    x = x_nchw.astype(jnp.float32)
    B = x.shape[0]
    dn = ("NCHW", "OIHW", "NCHW")
    y1 = lax.conv_general_dilated(x, params["conv1_w"], (1, 1), "VALID",
                                  dimension_numbers=dn)
    y1 = y1 + params["conv1_b"][None, :, None, None]
    x1 = jax.nn.relu(jnp.max(y1.reshape(B, 20, 12, 2, 12, 2), axis=(3, 5)))
    y2 = lax.conv_general_dilated(x1, params["conv2_w"], (1, 1), "VALID",
                                  dimension_numbers=dn)
    y2 = y2 + params["conv2_b"][None, :, None, None]
    x2 = jax.nn.relu(jnp.max(y2.reshape(B, 40, 4, 2, 4, 2), axis=(3, 5)))
    flat = x2.reshape(B, 40 * 4 * 4)
    h = jax.nn.relu(flat @ params["fc1_w"].T + params["fc1_b"])
    y = h @ params["fc2_w"].T + params["fc2_b"]
    return jax.nn.log_softmax(y, axis=-1)


if __name__ == "__main__":
    key = jax.random.PRNGKey(0)
    pkey, xkey = jax.random.split(key)
    params = init_params(pkey)
    # input shape implied by the module (28x28 single-channel); batch 16 -> grid of 2 tiles
    x = jax.random.normal(xkey, (16, 1, 28, 28), jnp.float32)          # NCHW, like torch

    out = jax.block_until_ready(forward(params, x))
    assert out.shape == (16, 16), out.shape

    ref = forward_ref(params, x)
    assert bool(jnp.allclose(out, ref, atol=5e-4, rtol=5e-4)), \
        float(jnp.max(jnp.abs(out - ref)))

    print("KERNEL_OK")
</pallas_src>

<mosaic_0001>
module attributes {stable_mosaic.version = 11 : i64} {
  func.func @_fused_forward_kernel(%arg0: i32, %arg1: memref<28x8x28xf32, #tpu.memory_space<vmem>>, %arg2: memref<5x28x512xf32, #tpu.memory_space<vmem>>, %arg3: memref<1x512xf32, #tpu.memory_space<vmem>>, %arg4: memref<5x256x512xf32, #tpu.memory_space<vmem>>, %arg5: memref<1x512xf32, #tpu.memory_space<vmem>>, %arg6: memref<4x256x50xf32, #tpu.memory_space<vmem>>, %arg7: memref<1x50xf32, #tpu.memory_space<vmem>>, %arg8: memref<50x16xf32, #tpu.memory_space<vmem>>, %arg9: memref<1x16xf32, #tpu.memory_space<vmem>>, %arg10: memref<8x16xf32, #tpu.memory_space<vmem>>, %arg11: memref<12x16x256xf32, #tpu.memory_space<vmem>>, %arg12: memref<12x8x256xf32, #tpu.memory_space<vmem>>, %arg13: memref<4x16x256xf32, #tpu.memory_space<vmem>>) attributes {dimension_semantics = [#tpu.dimension_semantics<parallel>], iteration_bounds = array<i64: 2>, scalar_prefetch = 0 : i64, scratch_operands = 3 : i64, tpu.core_type = #tpu.core_type<tc>, window_params = [{transform_indices = @transform_0, window_bounds = array<i64: 28, 8, 28>}, {pipeline_mode = #tpu.pipeline_mode<synchronous>, transform_indices = @transform_1, window_bounds = array<i64: 5, 28, 512>}, {pipeline_mode = #tpu.pipeline_mode<synchronous>, transform_indices = @transform_2, window_bounds = array<i64: 1, 512>}, {pipeline_mode = #tpu.pipeline_mode<synchronous>, transform_indices = @transform_3, window_bounds = array<i64: 5, 256, 512>}, {pipeline_mode = #tpu.pipeline_mode<synchronous>, transform_indices = @transform_4, window_bounds = array<i64: 1, 512>}, {pipeline_mode = #tpu.pipeline_mode<synchronous>, transform_indices = @transform_5, window_bounds = array<i64: 4, 256, 50>}, {pipeline_mode = #tpu.pipeline_mode<synchronous>, transform_indices = @transform_6, window_bounds = array<i64: 1, 50>}, {pipeline_mode = #tpu.pipeline_mode<synchronous>, transform_indices = @transform_7, window_bounds = array<i64: 50, 16>}, {pipeline_mode = #tpu.pipeline_mode<synchronous>, transform_indices = @transform_8, window_bounds = array<i64: 1, 16>}, {transform_indices = @transform_9, window_bounds = array<i64: 8, 16>}]} {
    %cst = arith.constant 0.000000e+00 : f32
    %0 = vector.broadcast %cst : f32 to vector<192x512xf32>
    %c0 = arith.constant 0 : index
    %c0_0 = arith.constant 0 : index
    %c0_1 = arith.constant 0 : index
    %1 = vector.load %arg1[%c0, %c0_0, %c0_1] : memref<28x8x28xf32, #tpu.memory_space<vmem>>, vector<24x8x28xf32>
    %2 = vector.shape_cast %1 : vector<24x8x28xf32> to vector<192x28xf32>
    %c0_2 = arith.constant 0 : index
    %c0_3 = arith.constant 0 : index
    %c0_4 = arith.constant 0 : index
    %3 = vector.load %arg2[%c0_2, %c0_3, %c0_4] : memref<5x28x512xf32, #tpu.memory_space<vmem>>, vector<1x28x512xf32>
    %4 = vector.shape_cast %3 : vector<1x28x512xf32> to vector<28x512xf32>
    %cst_5 = arith.constant dense<0.000000e+00> : vector<192x512xf32>
    %5 = tpu.matmul %2, %4, %cst_5 {dimension_numbers = #tpu.dot_dimension_numbers<[1], [0], [0], [1], [0, 0, 1, 1], [], []>} : vector<192x28xf32>, vector<28x512xf32>, vector<192x512xf32> -> vector<192x512xf32>
    %6 = arith.addf %0, %5 : vector<192x512xf32>
    %c1 = arith.constant 1 : index
    %c0_6 = arith.constant 0 : index
    %c0_7 = arith.constant 0 : index
    %7 = vector.load %arg1[%c1, %c0_6, %c0_7] : memref<28x8x28xf32, #tpu.memory_space<vmem>>, vector<24x8x28xf32>
    %8 = vector.shape_cast %7 : vector<24x8x28xf32> to vector<192x28xf32>
    %c1_8 = arith.constant 1 : index
    %c0_9 = arith.constant 0 : index
    %c0_10 = arith.constant 0 : index
    %9 = vector.load %arg2[%c1_8, %c0_9, %c0_10] : memref<5x28x512xf32, #tpu.memory_space<vmem>>, vector<1x28x512xf32>
    %10 = vector.shape_cast %9 : vector<1x28x512xf32> to vector<28x512xf32>
    %cst_11 = arith.constant dense<0.000000e+00> : vector<192x512xf32>
    %11 = tpu.matmul %8, %10, %cst_11 {dimension_numbers = #tpu.dot_dimension_numbers<[1], [0], [0], [1], [0, 0, 1, 1], [], []>} : vector<192x28xf32>, vector<28x512xf32>, vector<192x512xf32> -> vector<192x512xf32>
    %12 = arith.addf %6, %11 : vector<192x512xf32>
    %c2 = arith.constant 2 : index
    %c0_12 = arith.constant 0 : index
    %c0_13 = arith.constant 0 : index
    %13 = vector.load %arg1[%c2, %c0_12, %c0_13] : memref<28x8x28xf32, #tpu.memory_space<vmem>>, vector<24x8x28xf32>
    %14 = vector.shape_cast %13 : vector<24x8x28xf32> to vector<192x28xf32>
    %c2_14 = arith.constant 2 : index
    %c0_15 = arith.constant 0 : index
    %c0_16 = arith.constant 0 : index
    %15 = vector.load %arg2[%c2_14, %c0_15, %c0_16] : memref<5x28x512xf32, #tpu.memory_space<vmem>>, vector<1x28x512xf32>
    %16 = vector.shape_cast %15 : vector<1x28x512xf32> to vector<28x512xf32>
    %cst_17 = arith.constant dense<0.000000e+00> : vector<192x512xf32>
    %17 = tpu.matmul %14, %16, %cst_17 {dimension_numbers = #tpu.dot_dimension_numbers<[1], [0], [0], [1], [0, 0, 1, 1], [], []>} : vector<192x28xf32>, vector<28x512xf32>, vector<192x512xf32> -> vector<192x512xf32>
    %18 = arith.addf %12, %17 : vector<192x512xf32>
    %c3 = arith.constant 3 : index
    %c0_18 = arith.constant 0 : index
    %c0_19 = arith.constant 0 : index
    %19 = vector.load %arg1[%c3, %c0_18, %c0_19] : memref<28x8x28xf32, #tpu.memory_space<vmem>>, vector<24x8x28xf32>
    %20 = vector.shape_cast %19 : vector<24x8x28xf32> to vector<192x28xf32>
    %c3_20 = arith.constant 3 : index
    %c0_21 = arith.constant 0 : index
    %c0_22 = arith.constant 0 : index
    %21 = vector.load %arg2[%c3_20, %c0_21, %c0_22] : memref<5x28x512xf32, #tpu.memory_space<vmem>>, vector<1x28x512xf32>
    %22 = vector.shape_cast %21 : vector<1x28x512xf32> to vector<28x512xf32>
    %cst_23 = arith.constant dense<0.000000e+00> : vector<192x512xf32>
    %23 = tpu.matmul %20, %22, %cst_23 {dimension_numbers = #tpu.dot_dimension_numbers<[1], [0], [0], [1], [0, 0, 1, 1], [], []>} : vector<192x28xf32>, vector<28x512xf32>, vector<192x512xf32> -> vector<192x512xf32>
    %24 = arith.addf %18, %23 : vector<192x512xf32>
    %c4 = arith.constant 4 : index
    %c0_24 = arith.constant 0 : index
    %c0_25 = arith.constant 0 : index
    %25 = vector.load %arg1[%c4, %c0_24, %c0_25] : memref<28x8x28xf32, #tpu.memory_space<vmem>>, vector<24x8x28xf32>
    %26 = vector.shape_cast %25 : vector<24x8x28xf32> to vector<192x28xf32>
    %c4_26 = arith.constant 4 : index
    %c0_27 = arith.constant 0 : index
    %c0_28 = arith.constant 0 : index
    %27 = vector.load %arg2[%c4_26, %c0_27, %c0_28] : memref<5x28x512xf32, #tpu.memory_space<vmem>>, vector<1x28x512xf32>
    %28 = vector.shape_cast %27 : vector<1x28x512xf32> to vector<28x512xf32>
    %cst_29 = arith.constant dense<0.000000e+00> : vector<192x512xf32>
    %29 = tpu.matmul %26, %28, %cst_29 {dimension_numbers = #tpu.dot_dimension_numbers<[1], [0], [0], [1], [0, 0, 1, 1], [], []>} : vector<192x28xf32>, vector<28x512xf32>, vector<192x512xf32> -> vector<192x512xf32>
    %30 = arith.addf %24, %29 : vector<192x512xf32>
    %c0_30 = arith.constant 0 : index
    %c0_31 = arith.constant 0 : index
    %31 = vector.load %arg3[%c0_30, %c0_31] : memref<1x512xf32, #tpu.memory_space<vmem>>, vector<1x512xf32>
    %32 = vector.broadcast %31 : vector<1x512xf32> to vector<192x512xf32>
    %33 = arith.addf %30, %32 : vector<192x512xf32>
    %34 = vector.extract_strided_slice %33 {offsets = [0, 0], sizes = [192, 256], strides = [1, 1]} : vector<192x512xf32> to vector<192x256xf32>
    %35 = vector.extract_strided_slice %33 {offsets = [0, 256], sizes = [192, 256], strides = [1, 1]} : vector<192x512xf32> to vector<192x256xf32>
    %36 = arith.maximumf %34, %35 : vector<192x256xf32>
    %37 = vector.shape_cast %36 : vector<192x256xf32> to vector<12x16x256xf32>
    %c0_32 = arith.constant 0 : index
    %c0_33 = arith.constant 0 : index
    %c0_34 = arith.constant 0 : index
    %38 = vector.load %arg11[%c0_32, %c0_33, %c0_34] : memref<12x16x256xf32, #tpu.memory_space<vmem>>, vector<12x16x256xf32>
    tpu.vector_store %arg11[%c0_32, %c0_33, %c0_34], %37 {strides = array<i32>} : memref<12x16x256xf32, #tpu.memory_space<vmem>>, vector<12x16x256xf32>,
    %c0_35 = arith.constant 0 : index
    %c0_36 = arith.constant 0 : index
    %c0_37 = arith.constant 0 : index
    %39 = vector.load %arg11[%c0_35, %c0_36, %c0_37] : memref<12x16x256xf32, #tpu.memory_space<vmem>>, vector<12x8x256xf32>
    %c0_38 = arith.constant 0 : index
    %c8 = arith.constant 8 : index
    %c0_39 = arith.constant 0 : index
    %40 = vector.load %arg11[%c0_38, %c8, %c0_39] : memref<12x16x256xf32, #tpu.memory_space<vmem>>, vector<12x8x256xf32>
    %41 = arith.maximumf %39, %40 : vector<12x8x256xf32>
    %cst_40 = arith.constant 0.000000e+00 : f32
    %42 = vector.broadcast %cst_40 : f32 to vector<12x8x256xf32>
    %43 = arith.maximumf %41, %42 : vector<12x8x256xf32>
    %c0_41 = arith.constant 0 : index
    %c0_42 = arith.constant 0 : index
    %c0_43 = arith.constant 0 : index
    %44 = vector.load %arg12[%c0_41, %c0_42, %c0_43] : memref<12x8x256xf32, #tpu.memory_space<vmem>>, vector<12x8x256xf32>
    tpu.vector_store %arg12[%c0_41, %c0_42, %c0_43], %43 {strides = array<i32>} : memref<12x8x256xf32, #tpu.memory_space<vmem>>, vector<12x8x256xf32>,
    %cst_44 = arith.constant 0.000000e+00 : f32
    %45 = vector.broadcast %cst_44 : f32 to vector<64x512xf32>
    %c0_45 = arith.constant 0 : index
    %c0_46 = arith.constant 0 : index
    %c0_47 = arith.constant 0 : index
    %46 = vector.load %arg12[%c0_45, %c0_46, %c0_47] : memref<12x8x256xf32, #tpu.memory_space<vmem>>, vector<8x8x256xf32>
    %47 = vector.shape_cast %46 : vector<8x8x256xf32> to vector<64x256xf32>
    %c0_48 = arith.constant 0 : index
    %c0_49 = arith.constant 0 : index
    %c0_50 = arith.constant 0 : index
    %48 = vector.load %arg4[%c0_48, %c0_49, %c0_50] : memref<5x256x512xf32, #tpu.memory_space<vmem>>, vector<1x256x512xf32>
    %49 = vector.shape_cast %48 : vector<1x256x512xf32> to vector<256x512xf32>
    %cst_51 = arith.constant dense<0.000000e+00> : vector<64x512xf32>
    %50 = tpu.matmul %47, %49, %cst_51 {dimension_numbers = #tpu.dot_dimension_numbers<[1], [0], [0], [1], [0, 0, 1, 1], [], []>} : vector<64x256xf32>, vector<256x512xf32>, vector<64x512xf32> -> vector<64x512xf32>
    %51 = arith.addf %45, %50 : vector<64x512xf32>
    %c1_52 = arith.constant 1 : index
    %c0_53 = arith.constant 0 : index
    %c0_54 = arith.constant 0 : index
    %52 = vector.load %arg12[%c1_52, %c0_53, %c0_54] : memref<12x8x256xf32, #tpu.memory_space<vmem>>, vector<8x8x256xf32>
    %53 = vector.shape_cast %52 : vector<8x8x256xf32> to vector<64x256xf32>
    %c1_55 = arith.constant 1 : index
    %c0_56 = arith.constant 0 : index
    %c0_57 = arith.constant 0 : index
    %54 = vector.load %arg4[%c1_55, %c0_56, %c0_57] : memref<5x256x512xf32, #tpu.memory_space<vmem>>, vector<1x256x512xf32>
    %55 = vector.shape_cast %54 : vector<1x256x512xf32> to vector<256x512xf32>
    %cst_58 = arith.constant dense<0.000000e+00> : vector<64x512xf32>
    %56 = tpu.matmul %53, %55, %cst_58 {dimension_numbers = #tpu.dot_dimension_numbers<[1], [0], [0], [1], [0, 0, 1, 1], [], []>} : vector<64x256xf32>, vector<256x512xf32>, vector<64x512xf32> -> vector<64x512xf32>
    %57 = arith.addf %51, %56 : vector<64x512xf32>
    %c2_59 = arith.constant 2 : index
    %c0_60 = arith.constant 0 : index
    %c0_61 = arith.constant 0 : index
    %58 = vector.load %arg12[%c2_59, %c0_60, %c0_61] : memref<12x8x256xf32, #tpu.memory_space<vmem>>, vector<8x8x256xf32>
    %59 = vector.shape_cast %58 : vector<8x8x256xf32> to vector<64x256xf32>
    %c2_62 = arith.constant 2 : index
    %c0_63 = arith.constant 0 : index
    %c0_64 = arith.constant 0 : index
    %60 = vector.load %arg4[%c2_62, %c0_63, %c0_64] : memref<5x256x512xf32, #tpu.memory_space<vmem>>, vector<1x256x512xf32>
    %61 = vector.shape_cast %60 : vector<1x256x512xf32> to vector<256x512xf32>
    %cst_65 = arith.constant dense<0.000000e+00> : vector<64x512xf32>
    %62 = tpu.matmul %59, %61, %cst_65 {dimension_numbers = #tpu.dot_dimension_numbers<[1], [0], [0], [1], [0, 0, 1, 1], [], []>} : vector<64x256xf32>, vector<256x512xf32>, vector<64x512xf32> -> vector<64x512xf32>
    %63 = arith.addf %57, %62 : vector<64x512xf32>
    %c3_66 = arith.constant 3 : index
    %c0_67 = arith.constant 0 : index
    %c0_68 = arith.constant 0 : index
    %64 = vector.load %arg12[%c3_66, %c0_67, %c0_68] : memref<12x8x256xf32, #tpu.memory_space<vmem>>, vector<8x8x256xf32>
    %65 = vector.shape_cast %64 : vector<8x8x256xf32> to vector<64x256xf32>
    %c3_69 = arith.constant 3 : index
    %c0_70 = arith.constant 0 : index
    %c0_71 = arith.constant 0 : index
    %66 = vector.load %arg4[%c3_69, %c0_70, %c0_71] : memref<5x256x512xf32, #tpu.memory_space<vmem>>, vector<1x256x512xf32>
    %67 = vector.shape_cast %66 : vector<1x256x512xf32> to vector<256x512xf32>
    %cst_72 = arith.constant dense<0.000000e+00> : vector<64x512xf32>
    %68 = tpu.matmul %65, %67, %cst_72 {dimension_numbers = #tpu.dot_dimension_numbers<[1], [0], [0], [1], [0, 0, 1, 1], [], []>} : vector<64x256xf32>, vector<256x512xf32>, vector<64x512xf32> -> vector<64x512xf32>
    %69 = arith.addf %63, %68 : vector<64x512xf32>
    %c4_73 = arith.constant 4 : index
    %c0_74 = arith.constant 0 : index
    %c0_75 = arith.constant 0 : index
    %70 = vector.load %arg12[%c4_73, %c0_74, %c0_75] : memref<12x8x256xf32, #tpu.memory_space<vmem>>, vector<8x8x256xf32>
    %71 = vector.shape_cast %70 : vector<8x8x256xf32> to vector<64x256xf32>
    %c4_76 = arith.constant 4 : index
    %c0_77 = arith.constant 0 : index
    %c0_78 = arith.constant 0 : index
    %72 = vector.load %arg4[%c4_76, %c0_77, %c0_78] : memref<5x256x512xf32, #tpu.memory_space<vmem>>, vector<1x256x512xf32>
    %73 = vector.shape_cast %72 : vector<1x256x512xf32> to vector<256x512xf32>
    %cst_79 = arith.constant dense<0.000000e+00> : vector<64x512xf32>
    %74 = tpu.matmul %71, %73, %cst_79 {dimension_numbers = #tpu.dot_dimension_numbers<[1], [0], [0], [1], [0, 0, 1, 1], [], []>} : vector<64x256xf32>, vector<256x512xf32>, vector<64x512xf32> -> vector<64x512xf32>
    %75 = arith.addf %69, %74 : vector<64x512xf32>
    %c0_80 = arith.constant 0 : index
    %c0_81 = arith.constant 0 : index
    %76 = vector.load %arg5[%c0_80, %c0_81] : memref<1x512xf32, #tpu.memory_space<vmem>>, vector<1x512xf32>
    %77 = vector.broadcast %76 : vector<1x512xf32> to vector<64x512xf32>
    %78 = arith.addf %75, %77 : vector<64x512xf32>
    %79 = vector.extract_strided_slice %78 {offsets = [0, 0], sizes = [64, 256], strides = [1, 1]} : vector<64x512xf32> to vector<64x256xf32>
    %80 = vector.extract_strided_slice %78 {offsets = [0, 256], sizes = [64, 256], strides = [1, 1]} : vector<64x512xf32> to vector<64x256xf32>
    %81 = arith.maximumf %79, %80 : vector<64x256xf32>
    %82 = vector.shape_cast %81 : vector<64x256xf32> to vector<4x16x256xf32>
    %c0_82 = arith.constant 0 : index
    %c0_83 = arith.constant 0 : index
    %c0_84 = arith.constant 0 : index
    %83 = vector.load %arg13[%c0_82, %c0_83, %c0_84] : memref<4x16x256xf32, #tpu.memory_space<vmem>>, vector<4x16x256xf32>
    tpu.vector_store %arg13[%c0_82, %c0_83, %c0_84], %82 {strides = array<i32>} : memref<4x16x256xf32, #tpu.memory_space<vmem>>, vector<4x16x256xf32>,
    %cst_85 = arith.constant 0.000000e+00 : f32
    %84 = vector.broadcast %cst_85 : f32 to vector<8x50xf32>
    %c0_86 = arith.constant 0 : index
    %c0_87 = arith.constant 0 : index
    %c0_88 = arith.constant 0 : index
    %85 = vector.load %arg13[%c0_86, %c0_87, %c0_88] : memref<4x16x256xf32, #tpu.memory_space<vmem>>, vector<1x8x256xf32>
    %86 = vector.shape_cast %85 : vector<1x8x256xf32> to vector<8x256xf32>
    %c0_89 = arith.constant 0 : index
    %c8_90 = arith.constant 8 : index
    %c0_91 = arith.constant 0 : index
    %87 = vector.load %arg13[%c0_89, %c8_90, %c0_91] : memref<4x16x256xf32, #tpu.memory_space<vmem>>, vector<1x8x256xf32>
    %88 = vector.shape_cast %87 : vector<1x8x256xf32> to vector<8x256xf32>
    %89 = arith.maximumf %86, %88 : vector<8x256xf32>
    %cst_92 = arith.constant 0.000000e+00 : f32
    %90 = vector.broadcast %cst_92 : f32 to vector<8x256xf32>
    %91 = arith.maximumf %89, %90 : vector<8x256xf32>
    %c0_93 = arith.constant 0 : index
    %c0_94 = arith.constant 0 : index
    %c0_95 = arith.constant 0 : index
    %92 = vector.load %arg6[%c0_93, %c0_94, %c0_95] : memref<4x256x50xf32, #tpu.memory_space<vmem>>, vector<1x256x50xf32>
    %93 = vector.shape_cast %92 : vector<1x256x50xf32> to vector<256x50xf32>
    %cst_96 = arith.constant dense<0.000000e+00> : vector<8x50xf32>
    %94 = tpu.matmul %91, %93, %cst_96 {dimension_numbers = #tpu.dot_dimension_numbers<[1], [0], [0], [1], [0, 0, 1, 1], [], []>} : vector<8x256xf32>, vector<256x50xf32>, vector<8x50xf32> -> vector<8x50xf32>
    %95 = arith.addf %84, %94 : vector<8x50xf32>
    %c1_97 = arith.constant 1 : index
    %c0_98 = arith.constant 0 : index
    %c0_99 = arith.constant 0 : index
    %96 = vector.load %arg13[%c1_97, %c0_98, %c0_99] : memref<4x16x256xf32, #tpu.memory_space<vmem>>, vector<1x8x256xf32>
    %97 = vector.shape_cast %96 : vector<1x8x256xf32> to vector<8x256xf32>
    %c1_100 = arith.constant 1 : index
    %c8_101 = arith.constant 8 : index
    %c0_102 = arith.constant 0 : index
    %98 = vector.load %arg13[%c1_100, %c8_101, %c0_102] : memref<4x16x256xf32, #tpu.memory_space<vmem>>, vector<1x8x256xf32>
    %99 = vector.shape_cast %98 : vector<1x8x256xf32> to vector<8x256xf32>
    %100 = arith.maximumf %97, %99 : vector<8x256xf32>
    %cst_103 = arith.constant 0.000000e+00 : f32
    %101 = vector.broadcast %cst_103 : f32 to vector<8x256xf32>
    %102 = arith.maximumf %100, %101 : vector<8x256xf32>
    %c1_104 = arith.constant 1 : index
    %c0_105 = arith.constant 0 : index
    %c0_106 = arith.constant 0 : index
    %103 = vector.load %arg6[%c1_104, %c0_105, %c0_106] : memref<4x256x50xf32, #tpu.memory_space<vmem>>, vector<1x256x50xf32>
    %104 = vector.shape_cast %103 : vector<1x256x50xf32> to vector<256x50xf32>
    %cst_107 = arith.constant dense<0.000000e+00> : vector<8x50xf32>
    %105 = tpu.matmul %102, %104, %cst_107 {dimension_numbers = #tpu.dot_dimension_numbers<[1], [0], [0], [1], [0, 0, 1, 1], [], []>} : vector<8x256xf32>, vector<256x50xf32>, vector<8x50xf32> -> vector<8x50xf32>
    %106 = arith.addf %95, %105 : vector<8x50xf32>
    %c2_108 = arith.constant 2 : index
    %c0_109 = arith.constant 0 : index
    %c0_110 = arith.constant 0 : index
    %107 = vector.load %arg13[%c2_108, %c0_109, %c0_110] : memref<4x16x256xf32, #tpu.memory_space<vmem>>, vector<1x8x256xf32>
    %108 = vector.shape_cast %107 : vector<1x8x256xf32> to vector<8x256xf32>
    %c2_111 = arith.constant 2 : index
    %c8_112 = arith.constant 8 : index
    %c0_113 = arith.constant 0 : index
    %109 = vector.load %arg13[%c2_111, %c8_112, %c0_113] : memref<4x16x256xf32, #tpu.memory_space<vmem>>, vector<1x8x256xf32>
    %110 = vector.shape_cast %109 : vector<1x8x256xf32> to vector<8x256xf32>
    %111 = arith.maximumf %108, %110 : vector<8x256xf32>
    %cst_114 = arith.constant 0.000000e+00 : f32
    %112 = vector.broadcast %cst_114 : f32 to vector<8x256xf32>
    %113 = arith.maximumf %111, %112 : vector<8x256xf32>
    %c2_115 = arith.constant 2 : index
    %c0_116 = arith.constant 0 : index
    %c0_117 = arith.constant 0 : index
    %114 = vector.load %arg6[%c2_115, %c0_116, %c0_117] : memref<4x256x50xf32, #tpu.memory_space<vmem>>, vector<1x256x50xf32>
    %115 = vector.shape_cast %114 : vector<1x256x50xf32> to vector<256x50xf32>
    %cst_118 = arith.constant dense<0.000000e+00> : vector<8x50xf32>
    %116 = tpu.matmul %113, %115, %cst_118 {dimension_numbers = #tpu.dot_dimension_numbers<[1], [0], [0], [1], [0, 0, 1, 1], [], []>} : vector<8x256xf32>, vector<256x50xf32>, vector<8x50xf32> -> vector<8x50xf32>
    %117 = arith.addf %106, %116 : vector<8x50xf32>
    %c3_119 = arith.constant 3 : index
    %c0_120 = arith.constant 0 : index
    %c0_121 = arith.constant 0 : index
    %118 = vector.load %arg13[%c3_119, %c0_120, %c0_121] : memref<4x16x256xf32, #tpu.memory_space<vmem>>, vector<1x8x256xf32>
    %119 = vector.shape_cast %118 : vector<1x8x256xf32> to vector<8x256xf32>
    %c3_122 = arith.constant 3 : index
    %c8_123 = arith.constant 8 : index
    %c0_124 = arith.constant 0 : index
    %120 = vector.load %arg13[%c3_122, %c8_123, %c0_124] : memref<4x16x256xf32, #tpu.memory_space<vmem>>, vector<1x8x256xf32>
    %121 = vector.shape_cast %120 : vector<1x8x256xf32> to vector<8x256xf32>
    %122 = arith.maximumf %119, %121 : vector<8x256xf32>
    %cst_125 = arith.constant 0.000000e+00 : f32
    %123 = vector.broadcast %cst_125 : f32 to vector<8x256xf32>
    %124 = arith.maximumf %122, %123 : vector<8x256xf32>
    %c3_126 = arith.constant 3 : index
    %c0_127 = arith.constant 0 : index
    %c0_128 = arith.constant 0 : index
    %125 = vector.load %arg6[%c3_126, %c0_127, %c0_128] : memref<4x256x50xf32, #tpu.memory_space<vmem>>, vector<1x256x50xf32>
    %126 = vector.shape_cast %125 : vector<1x256x50xf32> to vector<256x50xf32>
    %cst_129 = arith.constant dense<0.000000e+00> : vector<8x50xf32>
    %127 = tpu.matmul %124, %126, %cst_129 {dimension_numbers = #tpu.dot_dimension_numbers<[1], [0], [0], [1], [0, 0, 1, 1], [], []>} : vector<8x256xf32>, vector<256x50xf32>, vector<8x50xf32> -> vector<8x50xf32>
    %128 = arith.addf %117, %127 : vector<8x50xf32>
    %c0_130 = arith.constant 0 : index
    %c0_131 = arith.constant 0 : index
    %129 = vector.load %arg7[%c0_130, %c0_131] : memref<1x50xf32, #tpu.memory_space<vmem>>, vector<1x50xf32>
    %130 = vector.broadcast %129 : vector<1x50xf32> to vector<8x50xf32>
    %131 = arith.addf %128, %130 : vector<8x50xf32>
    %cst_132 = arith.constant 0.000000e+00 : f32
    %132 = vector.broadcast %cst_132 : f32 to vector<8x50xf32>
    %133 = arith.maximumf %131, %132 : vector<8x50xf32>
    %c0_133 = arith.constant 0 : index
    %c0_134 = arith.constant 0 : index
    %134 = vector.load %arg8[%c0_133, %c0_134] : memref<50x16xf32, #tpu.memory_space<vmem>>, vector<50x16xf32>
    %cst_135 = arith.constant dense<0.000000e+00> : vector<8x16xf32>
    %135 = tpu.matmul %133, %134, %cst_135 {dimension_numbers = #tpu.dot_dimension_numbers<[1], [0], [0], [1], [0, 0, 1, 1], [], []>} : vector<8x50xf32>, vector<50x16xf32>, vector<8x16xf32> -> vector<8x16xf32>
    %c0_136 = arith.constant 0 : index
    %c0_137 = arith.constant 0 : index
    %136 = vector.load %arg9[%c0_136, %c0_137] : memref<1x16xf32, #tpu.memory_space<vmem>>, vector<1x16xf32>
    %137 = vector.broadcast %136 : vector<1x16xf32> to vector<8x16xf32>
    %138 = arith.addf %135, %137 : vector<8x16xf32>
    %cst_138 = arith.constant dense<0xFF800000> : vector<8xf32>
    %139 = vector.multi_reduction <maximumf>, %138, %cst_138 [1] : vector<8x16xf32> to vector<8xf32>
    %140 = vector.shape_cast %139 : vector<8xf32> to vector<8x1xf32>
    %141 = vector.broadcast %140 : vector<8x1xf32> to vector<8x16xf32>
    %142 = arith.subf %138, %141 : vector<8x16xf32>
    %143 = math.exp %142 : vector<8x16xf32>
    %cst_139 = arith.constant dense<0.000000e+00> : vector<8xf32>
    %144 = vector.multi_reduction <add>, %143, %cst_139 [1] : vector<8x16xf32> to vector<8xf32>
    %145 = vector.shape_cast %144 : vector<8xf32> to vector<8x1xf32>
    %146 = math.log %145 : vector<8x1xf32>
    %147 = arith.addf %146, %140 : vector<8x1xf32>
    %148 = vector.broadcast %147 : vector<8x1xf32> to vector<8x16xf32>
    %149 = arith.subf %138, %148 : vector<8x16xf32>
    %c0_140 = arith.constant 0 : index
    %c0_141 = arith.constant 0 : index
    %150 = vector.load %arg10[%c0_140, %c0_141] : memref<8x16xf32, #tpu.memory_space<vmem>>, vector<8x16xf32>
    tpu.vector_store %arg10[%c0_140, %c0_141], %149 {strides = array<i32>} : memref<8x16xf32, #tpu.memory_space<vmem>>, vector<8x16xf32>,
    return
  }
  func.func @transform_0(%arg0: i32) -> (i32, i32, i32) {
    %c0_i32 = arith.constant 0 : i32
    %c0_i32_0 = arith.constant 0 : i32
    %c0_i32_1 = arith.constant 0 : i32
    return %c0_i32, %arg0, %c0_i32_0 : i32, i32, i32
  }
  func.func @transform_1(%arg0: i32) -> (i32, i32, i32) {
    %c0_i32 = arith.constant 0 : i32
    %c0_i32_0 = arith.constant 0 : i32
    %c0_i32_1 = arith.constant 0 : i32
    %c0_i32_2 = arith.constant 0 : i32
    return %c0_i32, %c0_i32_0, %c0_i32_1 : i32, i32, i32
  }
  func.func @transform_2(%arg0: i32) -> (i32, i32) {
    %c0_i32 = arith.constant 0 : i32
    %c0_i32_0 = arith.constant 0 : i32
    %c0_i32_1 = arith.constant 0 : i32
    return %c0_i32, %c0_i32_0 : i32, i32
  }
  func.func @transform_3(%arg0: i32) -> (i32, i32, i32) {
    %c0_i32 = arith.constant 0 : i32
    %c0_i32_0 = arith.constant 0 : i32
    %c0_i32_1 = arith.constant 0 : i32
    %c0_i32_2 = arith.constant 0 : i32
    return %c0_i32, %c0_i32_0, %c0_i32_1 : i32, i32, i32
  }
  func.func @transform_4(%arg0: i32) -> (i32, i32) {
    %c0_i32 = arith.constant 0 : i32
    %c0_i32_0 = arith.constant 0 : i32
    %c0_i32_1 = arith.constant 0 : i32
    return %c0_i32, %c0_i32_0 : i32, i32
  }
  func.func @transform_5(%arg0: i32) -> (i32, i32, i32) {
    %c0_i32 = arith.constant 0 : i32
    %c0_i32_0 = arith.constant 0 : i32
    %c0_i32_1 = arith.constant 0 : i32
    %c0_i32_2 = arith.constant 0 : i32
    return %c0_i32, %c0_i32_0, %c0_i32_1 : i32, i32, i32
  }
  func.func @transform_6(%arg0: i32) -> (i32, i32) {
    %c0_i32 = arith.constant 0 : i32
    %c0_i32_0 = arith.constant 0 : i32
    %c0_i32_1 = arith.constant 0 : i32
    return %c0_i32, %c0_i32_0 : i32, i32
  }
  func.func @transform_7(%arg0: i32) -> (i32, i32) {
    %c0_i32 = arith.constant 0 : i32
    %c0_i32_0 = arith.constant 0 : i32
    %c0_i32_1 = arith.constant 0 : i32
    return %c0_i32, %c0_i32_0 : i32, i32
  }
  func.func @transform_8(%arg0: i32) -> (i32, i32) {
    %c0_i32 = arith.constant 0 : i32
    %c0_i32_0 = arith.constant 0 : i32
    %c0_i32_1 = arith.constant 0 : i32
    return %c0_i32, %c0_i32_0 : i32, i32
  }
  func.func @transform_9(%arg0: i32) -> (i32, i32) {
    %c0_i32 = arith.constant 0 : i32
    %c0_i32_0 = arith.constant 0 : i32
    return %arg0, %c0_i32 : i32, i32
  }
}

</mosaic_0001>

<bundles_post_ra>
// kernel: tile.13
= control target key start
LH: loop header
LB: loop body
LE: loop exit
PB: predicated region body
PF: predicated region fallthrough
CT: control target
= control target key end

     0   :  { %s28_s0 = inlined_call_operand.vmem [shape: f32[20], index: 0, kind: input, shape index: {}]   ;;  %s29_s1 = inlined_call_operand.vmem [shape: f32[12,20], index: 1, kind: output, shape index: {}]  }
   0x1   :  { %v4_v0 = vld [vmem:[%s28_s0] ss:$0 sm:$0xff] }
   0x2   :  { %5 = vst [vmem:[%s29_s1] sm:$0xff] %v4_v0  ;;  %8 = vst [vmem:[%s29_s1 + $0x8] sm:$0xff] %v4_v0 }

// kernel: tile.14
= control target key start
LH: loop header
LB: loop body
LE: loop exit
PB: predicated region body
PF: predicated region fallthrough
CT: control target
= control target key end

     0   :  { %vm9_vm0 = vcmask 64512   ;;  %s112_s12 = smov 120   ;;  %s113_s13 = smov 92   ;;  %vm3_vm1 = vcmask 162816   ;;  %vm13_vm2 = vcmask 97280   ;;  %vm16_vm3 = vcmask 1048512   ;;  %s175_s0 = inlined_call_operand.vmem [shape: f32[12,20], index: 0, kind: input, shape index: {}]   ;;  %s176_s1 = inlined_call_operand.vmem [shape: f32[240], index: 1, kind: output, shape index: {}]  }
   0x1   :  { %v89_v0 = vld [vmem:[%s175_s0 + $0x6] sm:$0x1]   ;;  %v92_v3 = vld [vmem:[%s175_s0 + $0xb] sm:$0x1]   ;;  %v91_v4 = vld [vmem:[%s175_s0 + $0x5] sm:$0x1]  }
   0x2   :  { %v90_v1 = vld [vmem:[%s175_s0 + $0x6] sm:$0x1]   ;;  %26 = vrot.lane.b32.xlu1 %v92_v3, %s113_s13  ;;  %v93_v5 = vld [vmem:[%s175_s0 + $0x4] sm:$0x1]   ;;  %s114_s18 = smov 100   ;;  %s115_s19 = smov 80  }
   0x3   :  { %v10_v2 = vsel %vm9_vm0, %v90_v1, %v89_v0  ;;  %v2_v6 = vld [vmem:[%s175_s0] sm:$0x1]   ;;  %v94_v7 = vld [vmem:[%s175_s0 + $0xa] sm:$0x1]   ;;  %v95_v8 = vld [vmem:[%s175_s0 + $0x3] sm:$0x1]  }
   0x4   :  { %11 = vrot.lane.b32.xlu0 %v10_v2, %s112_s12  ;;  %4 = vst.msk [vmem:[#allocation0] sm:$0x1] %vm3_vm1, %v2_v6   ;;  %s116_s26 = smov 72   ;;  %s117_s27 = smov 60   ;;  %v96_v9 = vld [vmem:[%s175_s0 + $0x9] sm:$0x1]  }
   0x5   :  { %v97_v10 = vld [vmem:[%s175_s0 + $0x2] sm:$0x1]   ;;  %s118_s3 = smov 52   ;;  %s119_s4 = smov 40   ;;  %v98_v11 = vld [vmem:[%s175_s0 + $0x8] sm:$0x1]  }
   0x6   :  { %33 = vrot.lane.b32.xlu1 %v93_v5, %s115_s19  ;;  %v99_v12 = vld [vmem:[%s175_s0 + $0x1] sm:$0x1]   ;;  %s120_s9 = smov 32   ;;  %s121_s10 = smov 20   ;;  %v100_v13 = vld [vmem:[%s175_s0 + $0x7] sm:$0x1]  }
   0x7   :  { %s122_s0 = smov 12   ;;  %vm28_vm4 = vcmask 917216   ;;  %vm22_vm5 = vcmask 982816   ;;  %vm35_vm6 = vcmask 818816   ;;  %vm41_vm7 = vcmask 753216  }
   0x8   :  { %20 = vrot.lane.b32.xlu0 %v91_v4, %s114_s18  ;;  %vm48_vm8 = vcmask 654816   ;;  %vm54_vm9 = vcmask 589216   ;;  %vm61_vm10 = vcmask 490816   ;;  %vm67_vm11 = vcmask 425216  }
   0x9   :  { %vm74_vm12 = vcmask 326816   ;;  %vm80_vm13 = vcmask 261216  }
   0xa   :  { %46 = vrot.lane.b32.xlu1 %v95_v8, %s117_s27 }
   0xc   :  { %39 = vrot.lane.b32.xlu0 %v94_v7, %s116_s26 }
   0xe   :  { %59 = vrot.lane.b32.xlu1 %v97_v10, %s119_s4 }
  0x10   :  { %52 = vrot.lane.b32.xlu0 %v96_v9, %s118_s3 }
  0x12   :  { %72 = vrot.lane.b32.xlu1 %v99_v12, %s121_s10 }
  0x14   :  { %65 = vrot.lane.b32.xlu0 %v98_v11, %s120_s9 }
  0x18   :  { %78 = vrot.lane.b32.xlu0 %v100_v13, %s122_s0 }
  0x74   :  { %v27_v15 = vpop.permute.xlu1 %26  }
  0x76   :  { %v12_v14 = vpop.permute.xlu0 %11  }
  0x77   :  { %15 = vst.msk [vmem:[#allocation0 + $0x1] sm:$0x1] %vm13_vm2, %v12_v14  }
  0x78   :  { %17 = vst.msk [vmem:[#allocation0] sm:$0x1] %vm16_vm3, %v12_v14   ;;  %v34_v17 = vpop.permute.xlu1 %33  }
  0x79   :  { %30 = vst.msk [vmem:[#allocation0 + $0x1] sm:$0x1] %vm28_vm4, %v27_v15  }
  0x7a   :  { %v21_v16 = vpop.permute.xlu0 %20  }
  0x7b   :  { %23 = vst.msk [vmem:[#allocation0] sm:$0x1] %vm22_vm5, %v21_v16  }
  0x7c   :  { %36 = vst.msk [vmem:[#allocation0] sm:$0x1] %vm35_vm6, %v34_v17   ;;  %v47_v19 = vpop.permute.xlu1 %46  }
  0x7d   :  { %49 = vst.msk [vmem:[#allocation0] sm:$0x1] %vm48_vm8, %v47_v19  }
  0x7e   :  { %v40_v18 = vpop.permute.xlu0 %39  }
  0x7f   :  { %43 = vst.msk [vmem:[#allocation0 + $0x1] sm:$0x1] %vm41_vm7, %v40_v18  }
  0x80   :  { %v60_v21 = vpop.permute.xlu1 %59  }
  0x81   :  { %62 = vst.msk [vmem:[#allocation0] sm:$0x1] %vm61_vm10, %v60_v21  }
  0x82   :  { %v53_v20 = vpop.permute.xlu0 %52  }
  0x83   :  { %56 = vst.msk [vmem:[#allocation0 + $0x1] sm:$0x1] %vm54_vm9, %v53_v20  }
  0x84   :  { %v73_v23 = vpop.permute.xlu1 %72  }
  0x85   :  { %75 = vst.msk [vmem:[#allocation0] sm:$0x1] %vm74_vm12, %v73_v23  }
  0x86   :  { %v66_v22 = vpop.permute.xlu0 %65  }
  0x87   :  { %69 = vst.msk [vmem:[#allocation0 + $0x1] sm:$0x1] %vm67_vm11, %v66_v22  }
  0x8a   :  { %v79_v24 = vpop.permute.xlu0 %78  }
  0x8b   :  { %82 = vst.msk [vmem:[#allocation0 + $0x1] sm:$0x1] %vm80_vm13, %v79_v24  }
  0x92   :  { %v86_v25 = vld [vmem:[#allocation0] sm:$0x3] }
  0x93   :  { %88 = vst [vmem:[%s176_s1] sm:$0x3] %v86_v25 }

// kernel: tile.18
= control target key start
LH: loop header
LB: loop body
LE: loop exit
PB: predicated region body
PF: predicated region fallthrough
CT: control target
= control target key end

     0   :  { %s22_s0 = inlined_call_operand.vmem [shape: f32[40], index: 0, kind: input, shape index: {}]   ;;  %s23_s1 = inlined_call_operand.vmem [shape: f32[4,40], index: 1, kind: output, shape index: {}]  }
   0x1   :  { %v4_v0 = vld [vmem:[%s22_s0] ss:$0 sm:$0xff] }
   0x2   :  { %5 = vst [vmem:[%s23_s1] sm:$0xf] %v4_v0 }

// kernel: tile.19
= control target key start
LH: loop header
LB: loop body
LE: loop exit
PB: predicated region body
PF: predicated region fallthrough
CT: control target
= control target key end

     0   :  { %vm13_vm0 = vcmask 64512   ;;  %vm7_vm1 = vcmask 326656   ;;  %s44_s8 = smov 40   ;;  %s45_s9 = smov 80   ;;  %vm17_vm2 = vcmask 261120   ;;  %vm20_vm3 = vcmask 1048512   ;;  %s62_s0 = inlined_call_operand.vmem [shape: f32[4,40], index: 0, kind: input, shape index: {}]   ;;  %s63_s1 = inlined_call_operand.vmem [shape: f32[160], index: 1, kind: output, shape index: {}]  }
   0x1   :  { %v4_v0 = vld [vmem:[%s62_s0] sm:$0xf]  ;;  %s43_s0 = smov 120   ;;  %vm26_vm4 = vcmask 982656   ;;  %vm32_vm5 = vcmask 654656  }
   0x2   :  { %5 = vst [vmem:[#allocation1] sm:$0xf] %v4_v0 }
   0x9   :  { %v10_v1 = vld [vmem:[#allocation1 + $0x3] sm:$0x1]   ;;  %v29_v4 = vld [vmem:[#allocation1 + $0x1] sm:$0x1]   ;;  %v6_v5 = vld [vmem:[#allocation1] sm:$0x1]  }
   0xa   :  { %v12_v2 = vld [vmem:[#allocation1 + $0x3] sm:$0x1]   ;;  %30 = vrot.lane.b32.xlu1 %v29_v4, %s44_s8  ;;  %8 = vst.msk [vmem:[#allocation0] sm:$0x1] %vm7_vm1, %v6_v5   ;;  %v23_v6 = vld [vmem:[#allocation1 + $0x2] sm:$0x1]  }
   0xb   :  { %v14_v3 = vsel %vm13_vm0, %v12_v2, %v10_v1 }
   0xc   :  { %15 = vrot.lane.b32.xlu0 %v14_v3, %s43_s0 }
  0x10   :  { %24 = vrot.lane.b32.xlu0 %v23_v6, %s45_s9 }
  0x7c   :  { %v31_v8 = vpop.permute.xlu1 %30  }
  0x7e   :  { %v16_v7 = vpop.permute.xlu0 %15  }
  0x7f   :  { %19 = vst.msk [vmem:[#allocation0 + $0x1] sm:$0x1] %vm17_vm2, %v16_v7  }
  0x80   :  { %21 = vst.msk [vmem:[#allocation0] sm:$0x1] %vm20_vm3, %v16_v7  }
  0x82   :  { %v25_v9 = vpop.permute.xlu0 %24  }
  0x83   :  { %27 = vst.msk [vmem:[#allocation0] sm:$0x1] %vm26_vm4, %v25_v9  }
  0x84   :  { %33 = vst.msk [vmem:[#allocation0] sm:$0x1] %vm32_vm5, %v31_v8  }
  0x8b   :  { %v37_v10 = vld [vmem:[#allocation0] sm:$0x3] }
  0x8c   :  { %39 = vst [vmem:[%s63_s1] sm:$0x3] %v37_v10 }

// kernel: forward.1
= control target key start
LH: loop header
LB: loop body
LE: loop exit
PB: predicated region body
PF: predicated region fallthrough
CT: control target
= control target key end

     0   :  { %14 = vsyncpa [#allocation7], 0  ;;  %s13389_s0 = inlined_call_operand.vmem [shape: f32[28,16,28], index: 0, kind: input, shape index: {}]   ;;  %s13390_s1 = inlined_call_operand.vmem [shape: f32[5,28,512], index: 1, kind: input, shape index: {}]   ;;  %s13391_s2 = inlined_call_operand.vmem [shape: f32[1,512], index: 2, kind: input, shape index: {}]   ;;  %s13392_s3 = inlined_call_operand.vmem [shape: f32[5,256,512], index: 3, kind: input, shape index: {}]   ;;  %s13393_s4 = inlined_call_operand.vmem [shape: f32[1,512], index: 4, kind: input, shape index: {}]   ;;  %s13394_s5 = inlined_call_operand.vmem [shape: f32[4,256,50], index: 5, kind: input, shape index: {}]   ;;  %s13395_s6 = inlined_call_operand.vmem [shape: f32[1,50], index: 6, kind: input, shape index: {}]   ;;  %s13396_s7 = inlined_call_operand.vmem [shape: f32[50,16], index: 7, kind: input, shape index: {}]   ;;  %s13397_s8 = inlined_call_operand.vmem [shape: f32[1,16], index: 8, kind: input, shape index: {}]   ;;  %s13398_s9 = inlined_call_operand.hbm [shape: f32[16,16], index: 9, kind: output, shape index: {}]  }
   0x1   :  { %16 = vsyncpa [#allocation7 + $0x1], 0  ;;  %s9262_s30 = smov 0   ;;  %s9264_s10 = smov 0  }
   0x2   :  { %s9266_s11 = smov 0   ;;  %s9268_s12 = smov 0  }
   0x3 LB: > { %s13399_s13 = sadd.s32 4294967295, %s9205_s12   ;;  %s6498_s14 = sadd.s32 4294967294, %s9205_s12   ;;  %s9205_s12 = sphi %s9268_s12, %s13408_s12   ;;  %s9201_s11 = sphi %s9266_s11, %s13407_s11   ;;  %s9197_s10 = sphi %s9264_s10, %s13406_s10   ;;  %s9193_s30 = sphi %s9262_s30, %s13405_s30  }
   0x4   : > { %s9285_s15 = sadd.s32 1, %s9205_s12   ;;  %s29_s16 = sadd.s32 1, %s9201_s11 }
   0x5   : > { %s26_s17 = ssub.s32 %s9205_s12, %s9285_s15  ;;  %p36_p0 = scmp.ne.s32.totalorder %s9201_s11, %s9197_s10 }
   0x6   : > { %p27_p1 = scmp.eq.s32.totalorder %s26_s17, 0  ;;  %p37_p2 = scmp.eq.s32.totalorder %s9205_s12, 0 }
   0x7   : > { %p234_p3 = scmp.eq.s32.totalorder %s13399_s13, 1  ;;  %p239_p4 = scmp.ne.s32.totalorder %s9197_s10, %s9193_s30 }
   0x8   : > { %s9298_s18 = scalar_select %p27_p1, %s9201_s11, %s29_s16  }
   0x9   : > { %p38_p5 = por %p37_p2, %p36_p0  ;;  %p9300_p6 = por %p234_p3, %p36_p0 }
   0xa   : > { %p240_p7 = scmp.eq.s32.totalorder %s6498_s14, 1  ;;  %p6500_p9 = scmp.ge.s32.totalorder %s9205_s12, 2 }
   0xc   : > { %p9304_p8 = por %p240_p7, %p239_p4  ;;  %280 = sbr.rel (%p6500_p9) target bundleno = 37 (0x25), region = 48 }
  0x13   : > { %283 = sbr.rel (!%p38_p5) target bundleno = 37 (0x25), region = 52  ;;  %s285_s21 = sand.u32 (%p38_p5), 1, %s9201_s11  }
  0x14   : > { %s6501_s22 = sshll.u32 (%p38_p5), %s9205_s12, 3  ;;  %s9094_s23 = smul.u32 (%p38_p5), 224, %s285_s21 }
  0x15   : > { %s9316_s26 = scalar_lea.vmem (%p38_p5), %s13389_s0, %s6501_s22 }
  0x16   : > { %v371_v0 = vld [vmem:[%s9316_s26] sm:$0xff] (%p38_p5)  ;;  %v373_v1 = vld [vmem:[%s9316_s26 + $0x10] sm:$0xff] (%p38_p5)  ;;  %s9324_s27 = scalar_lea.vmem (%p38_p5), [#allocation5], %s9094_s23 }
  0x17   : > { %v375_v2 = vld [vmem:[%s9316_s26 + $0x20] sm:$0xff] (%p38_p5)  ;;  %v377_v3 = vld [vmem:[%s9316_s26 + $0x30] sm:$0xff] (%p38_p5)  ;;  %372 = vst [vmem:[%s9324_s27] sm:$0xff] (%p38_p5), %v371_v0  ;;  %374 = vst [vmem:[%s9324_s27 + $0x8] sm:$0xff] (%p38_p5), %v373_v1 }
  0x18   : > { %v379_v4 = vld [vmem:[%s9316_s26 + $0x40] sm:$0xff] (%p38_p5)  ;;  %v381_v5 = vld [vmem:[%s9316_s26 + $0x50] sm:$0xff] (%p38_p5)  ;;  %376 = vst [vmem:[%s9324_s27 + $0x10] sm:$0xff] (%p38_p5), %v375_v2  ;;  %378 = vst [vmem:[%s9324_s27 + $0x18] sm:$0xff] (%p38_p5), %v377_v3 }
  0x19   : > { %380 = vst [vmem:[%s9324_s27 + $0x20] sm:$0xff] (%p38_p5), %v379_v4  ;;  %382 = vst [vmem:[%s9324_s27 + $0x28] sm:$0xff] (%p38_p5), %v381_v5  ;;  %v383_v6 = vld [vmem:[%s9316_s26 + $0x60] sm:$0xff] (%p38_p5)  ;;  %v385_v7 = vld [vmem:[%s9316_s26 + $0x70] sm:$0xff] (%p38_p5) }
  0x1a   : > { %v387_v8 = vld [vmem:[%s9316_s26 + $0x80] sm:$0xff]  ;;  %384 = vst [vmem:[%s9324_s27 + $0x30] sm:$0xff] %v383_v6  ;;  %386 = vst [vmem:[%s9324_s27 + $0x38] sm:$0xff] %v385_v7  ;;  %v389_v9 = vld [vmem:[%s9316_s26 + $0x90] sm:$0xff] }
  0x1b   : > { %388 = vst [vmem:[%s9324_s27 + $0x40] sm:$0xff] %v387_v8  ;;  %v391_v10 = vld [vmem:[%s9316_s26 + $0xa0] sm:$0xff]  ;;  %v393_v11 = vld [vmem:[%s9316_s26 + $0xb0] sm:$0xff]  ;;  %390 = vst [vmem:[%s9324_s27 + $0x48] sm:$0xff] %v389_v9 }
  0x1c   : > { %392 = vst [vmem:[%s9324_s27 + $0x50] sm:$0xff] %v391_v10  ;;  %394 = vst [vmem:[%s9324_s27 + $0x58] sm:$0xff] %v393_v11  ;;  %v395_v12 = vld [vmem:[%s9316_s26 + $0xc0] sm:$0xff]  ;;  %v397_v13 = vld [vmem:[%s9316_s26 + $0xd0] sm:$0xff] }
  0x1d   : > { %v399_v14 = vld [vmem:[%s9316_s26 + $0xe0] sm:$0xff]  ;;  %396 = vst [vmem:[%s9324_s27 + $0x60] sm:$0xff] %v395_v12  ;;  %398 = vst [vmem:[%s9324_s27 + $0x68] sm:$0xff] %v397_v13  ;;  %v401_v15 = vld [vmem:[%s9316_s26 + $0xf0] sm:$0xff] }
  0x1e   : > { %400 = vst [vmem:[%s9324_s27 + $0x70] sm:$0xff] %v399_v14  ;;  %v403_v16 = vld [vmem:[%s9316_s26 + $0x100] sm:$0xff]  ;;  %v405_v17 = vld [vmem:[%s9316_s26 + $0x110] sm:$0xff]  ;;  %402 = vst [vmem:[%s9324_s27 + $0x78] sm:$0xff] %v401_v15 }
  0x1f   : > { %404 = vst [vmem:[%s9324_s27 + $0x80] sm:$0xff] %v403_v16  ;;  %406 = vst [vmem:[%s9324_s27 + $0x88] sm:$0xff] %v405_v17  ;;  %v407_v18 = vld [vmem:[%s9316_s26 + $0x120] sm:$0xff]  ;;  %v409_v19 = vld [vmem:[%s9316_s26 + $0x130] sm:$0xff] }
  0x20   : > { %v411_v20 = vld [vmem:[%s9316_s26 + $0x140] sm:$0xff]  ;;  %408 = vst [vmem:[%s9324_s27 + $0x90] sm:$0xff] %v407_v18  ;;  %410 = vst [vmem:[%s9324_s27 + $0x98] sm:$0xff] %v409_v19  ;;  %v413_v21 = vld [vmem:[%s9316_s26 + $0x150] sm:$0xff] }
  0x21   : > { %412 = vst [vmem:[%s9324_s27 + $0xa0] sm:$0xff] %v411_v20  ;;  %v415_v22 = vld [vmem:[%s9316_s26 + $0x160] sm:$0xff]  ;;  %v417_v23 = vld [vmem:[%s9316_s26 + $0x170] sm:$0xff]  ;;  %414 = vst [vmem:[%s9324_s27 + $0xa8] sm:$0xff] %v413_v21 }
  0x22   : > { %416 = vst [vmem:[%s9324_s27 + $0xb0] sm:$0xff] %v415_v22  ;;  %418 = vst [vmem:[%s9324_s27 + $0xb8] sm:$0xff] %v417_v23  ;;  %v419_v24 = vld [vmem:[%s9316_s26 + $0x180] sm:$0xff]  ;;  %v421_v25 = vld [vmem:[%s9316_s26 + $0x190] sm:$0xff] }
  0x23   : > { %v423_v26 = vld [vmem:[%s9316_s26 + $0x1a0] sm:$0xff]  ;;  %420 = vst [vmem:[%s9324_s27 + $0xc0] sm:$0xff] %v419_v24  ;;  %422 = vst [vmem:[%s9324_s27 + $0xc8] sm:$0xff] %v421_v25  ;;  %v425_v27 = vld [vmem:[%s9316_s26 + $0x1b0] sm:$0xff] }
  0x24   : > { %424 = vst [vmem:[%s9324_s27 + $0xd0] sm:$0xff] %v423_v26  ;;  %426 = vst [vmem:[%s9324_s27 + $0xd8] sm:$0xff] %v425_v27 }
  0x25 PF: > { %p6502_p10 = scmp.ge.s32.totalorder %s9205_s12, 1  ;;  %p431_p11 = scmp.lt.s32.totalorder %s9205_s12, 3 }
  0x27   : > { %p432_p12 = pnand %p6502_p10, %p431_p11 }
  0x28   : > { %v6529_v28 = vld [vmem:[%s13390_s1 + $0x88] sm:$0xff] (!%p432_p12)  ;;  %v6531_v30 = vld [vmem:[%s13390_s1 + $0x98] sm:$0xff] (!%p432_p12)  ;;  %vm628_vm0 = vcmask (!%p432_p12), 1043456   ;;  %v6528_v33 = vld [vmem:[%s13390_s1 + $0x80] sm:$0xff] (!%p432_p12)  ;;  %v9207_v35 = vmov (!%p432_p12), 0.0   ;;  %s9399_s28 = sand.u32 (!%p432_p12), 1, %s9197_s10  }
  0x29   : > { %435 = sbr.rel (%p432_p12) target bundleno = 1965 (0x7ad), region = 90  ;;  %v6533_v29 = vld [vmem:[%s13390_s1 + $0xa8] sm:$0xff] (!%p432_p12)  ;;  %v6535_v32 = vld [vmem:[%s13390_s1 + $0xb8] sm:$0xff] (!%p432_p12)  ;;  %v6532_v34 = vld [vmem:[%s13390_s1 + $0xa0] sm:$0xff] (!%p432_p12)  ;;  %705 = vmatprep.mubr.f32.mxu0 (!%p432_p12), %v9207_v35  ;;  %914 = vmatprep.mubr.f32.mxu1 (!%p432_p12), %v9207_v35  ;;  %vm9208_vm1 = vmmov (!%p432_p12), 1   ;;  %vm555_vm3 = vcmask (!%p432_p12), 228352  }
  0x2a   : > { %v7705_v31 = vpack.c.bf16 (!%p432_p12), %v6533_v29, %v6529_v28  ;;  %v7715_v36 = vpack.c.bf16 (!%p432_p12), %v6535_v32, %v6531_v30  ;;  %v7707_v37 = vpack.c.bf16 (!%p432_p12), %v6532_v34, %v6528_v33  ;;  %v6530_v38 = vld [vmem:[%s13390_s1 + $0x90] sm:$0xff] (!%p432_p12)  ;;  %v6537_v40 = vld [vmem:[%s13390_s1 + $0xc8] sm:$0xff] (!%p432_p12)  ;;  %s9095_s23 = smul.u32 (!%p432_p12), 224, %s9399_s28  ;;  %vm9415_vm2 = vmpackc.low (!%p432_p12), %vm628_vm0, %vm9208_vm1  ;;  %vm6330_vm4 = vcmask (!%p432_p12), 1041408   ;;  %s13404_s25 = sadd.s32 (!%p432_p12), 4294967295, %s9205_s12  }
  0x2b   : > { %v6534_v39 = vld [vmem:[%s13390_s1 + $0xb0] sm:$0xff] (!%p432_p12)  ;;  %v6541_v42 = vld [vmem:[%s13390_s1 + $0xe8] sm:$0xf] (!%p432_p12)  ;;  %v6539_v44 = vld [vmem:[%s13390_s1 + $0xd8] sm:$0xff] (!%p432_p12)  ;;  %vm9210_vm5 = vmmov (!%p432_p12), 0   ;;  %vm6326_vm6 = vcmask (!%p432_p12), 408576  }
  0x2c   : > { %7706 = vmatprep.subr.bf16.mxu0 (!%p432_p12), %v7705_v31  ;;  %v7717_v41 = vpack.c.bf16 (!%p432_p12), %v6534_v39, %v6530_v38  ;;  %7716 = vmatprep.subr.bf16.mxu1 (!%p432_p12), %v7715_v36  ;;  %v7709_v45 = vpack.c.bf16 (!%p432_p12), %v6541_v42, %v6537_v40  ;;  %v6543_v46 = vld [vmem:[%s13390_s1 + $0xf8] sm:$0xf] (!%p432_p12)  ;;  %v6536_v47 = vld [vmem:[%s13390_s1 + $0xc0] sm:$0xff] (!%p432_p12)  ;;  %v6538_v51 = vld [vmem:[%s13390_s1 + $0xd0] sm:$0xff] (!%p432_p12)  ;;  %s9461_s16 = scalar_lea.vmem (!%p432_p12), [#allocation5], %s9095_s23  ;;  %vm6404_vm7 = vcmask (!%p432_p12), 130048  }
  0x2d   : > { %7708 = vmatpush1.bf16.msra.mxu0 (!%p432_p12), %v7707_v37  ;;  %v6540_v48 = vld [vmem:[%s13390_s1 + $0xe0] sm:$0xf] (!%p432_p12)  ;;  %v7719_v49 = vpack.c.bf16 (!%p432_p12), %v6543_v46, %v6539_v44  ;;  %v6542_v52 = vld [vmem:[%s13390_s1 + $0xf0] sm:$0xf] (!%p432_p12)  ;;  %v498_v54 = vld [vmem:[%s13390_s1 + $0x8] sm:$0xff] (!%p432_p12)  ;;  %s6503_s23 = sshll.u32 (!%p432_p12), %s9399_s28, 3 }
  0x2e   : > { %7718 = vmatpush1.bf16.msra.mxu1 (!%p432_p12), %v7717_v41  ;;  %v7712_v50 = vpack.c.bf16 (!%p432_p12), %v6540_v48, %v6536_v47  ;;  %7711 = vmatprep.subr.msk.bf16.mxu0 (!%p432_p12), %vm9415_vm2, %v7709_v45  ;;  %v7722_v53 = vpack.c.bf16 (!%p432_p12), %v6542_v52, %v6538_v51  ;;  %v502_v55 = vld [vmem:[%s13390_s1 + $0x28] sm:$0xff] (!%p432_p12)  ;;  %v500_v56 = vld [vmem:[%s13390_s1 + $0x18] sm:$0xff] (!%p432_p12)  ;;  %v497_v59 = vld [vmem:[%s13390_s1] sm:$0xff] (!%p432_p12)  ;;  %s7537_s26 = sshll.u32 (!%p432_p12), %s13404_s25, 7  ;;  %s472_s27 = scalar_lea.vmem (!%p432_p12), [#allocation6], %s6503_s23 }
  0x2f   : > { %7721 = vmatprep.subr.msk.bf16.mxu1 (!%p432_p12), %vm9415_vm2, %v7719_v49  ;;  %v7725_v57 = vpack.c.bf16 (!%p432_p12), %v502_v55, %v498_v54  ;;  %v504_v58 = vld [vmem:[%s13390_s1 + $0x38] sm:$0xff] (!%p432_p12)  ;;  %v501_v60 = vld [vmem:[%s13390_s1 + $0x20] sm:$0xff] (!%p432_p12)  ;;  %v9464_v61 = vld [vmem:[%s9461_s16 + $0x8] sm:$0xff] (!%p432_p12)  ;;  %s6433_s29 = sshll.u32 (!%p432_p12), %s472_s27, 4  ;;  %s6420_s17 = scalar_lea.sflag (!%p432_p12), [#allocation7], %s9399_s28  ;;  %s13346_s29 = int_to_ptr.vmem [resolvable:$true] %s6433_s29 }
  0x30   : > { %v7735_v62 = vpack.c.bf16 %v504_v58, %v500_v56  ;;  %v7727_v63 = vpack.c.bf16 %v501_v60, %v497_v59  ;;  %v499_v0 = vld [vmem:[%s13390_s1 + $0x10] sm:$0xff]  ;;  %v506_v4 = vld [vmem:[%s13390_s1 + $0x48] sm:$0xff]  ;;  %v508_v6 = vld [vmem:[%s13390_s1 + $0x58] sm:$0xff]  ;;  %s9143_s21 = scalar_lea.vmem %s13346_s29, 128  ;;  %s9211_s22 = smov [#allocation6]  }
  0x31   : > { %7714 = vmatpush1.bf16.msk.msra.mxu0 %vm9415_vm2, %v7712_v50  ;;  %v503_v1 = vld [vmem:[%s13390_s1 + $0x30] sm:$0xff]  ;;  %v510_v5 = vld [vmem:[%s13390_s1 + $0x68] sm:$0xf]  ;;  %v512_v7 = vld [vmem:[%s13390_s1 + $0x78] sm:$0xf]  ;;  %p9144_p13 = scmp.ne.s32.totalorder %s13346_s29, %s9143_s21  ;;  %s9147_s24 = sshll.u32 %s9211_s22, 4  ;;  %s9148_s24 = int_to_ptr.vmem [resolvable:$false] %s9147_s24 }
  0x32   : > { %7724 = vmatpush1.bf16.msk.msra.mxu1 %vm9415_vm2, %v7722_v53  ;;  %7726 = vmatprep.subr.bf16.mxu0 %v7725_v57  ;;  %v7737_v2 = vpack.c.bf16 %v503_v1, %v499_v0  ;;  %v9479_v3 = vld [vmem:[%s9461_s16 + $0x10] sm:$0xff]  ;;  %v7729_v8 = vpack.c.bf16 %v510_v5, %v506_v4  ;;  %v7739_v9 = vpack.c.bf16 %v512_v7, %v508_v6  ;;  %v505_v10 = vld [vmem:[%s13390_s1 + $0x40] sm:$0xff]  ;;  %v9513_v15 = vld [vmem:[%s9461_s16 + $0x18] sm:$0xff]  ;;  %s9149_s23 = scalar_lea.vmem %s9148_s24, 256  ;;  %p9150_p2 = scmp.lt.s32.totalorder %s13346_s29, %s9148_s24 }
  0x33   : > { %7736 = vmatprep.subr.bf16.mxu1 %v7735_v62  ;;  %v509_v11 = vld [vmem:[%s13390_s1 + $0x60] sm:$0xf]  ;;  %v507_v12 = vld [vmem:[%s13390_s1 + $0x50] sm:$0xff]  ;;  %v6673_v17 = vld [vmem:[%s13390_s1 + $0x108] sm:$0xff]  ;;  %p9145_p0 = pnand %p9144_p13, %p9300_p6  ;;  %p9151_p3 = scmp.lt.s32.totalorder %s9149_s23, %s9143_s21 }
  0x34   : > { %6546 = vmatmul.mubr.msk.f32.vlgmr.msra.gmra.mrb[0].mxu0 %vm555_vm3, %v9464_v61  ;;  %v7732_v13 = vpack.c.bf16 %v509_v11, %v505_v10  ;;  %v511_v14 = vld [vmem:[%s13390_s1 + $0x70] sm:$0xf]  ;;  %v6677_v18 = vld [vmem:[%s13390_s1 + $0x128] sm:$0xff]  ;;  %v9536_v19 = vld [vmem:[%s9461_s16 + $0x20] sm:$0xff] }
  0x35   : > { %6572 = vmatmul.mubr.msk.f32.vlgmr.msra.gmra.mrb[0].mxu1 %vm555_vm3, %v9464_v61  ;;  %7728 = vmatpush1.bf16.msra.mxu0 %v7727_v63  ;;  %v7742_v16 = vpack.c.bf16 %v511_v14, %v507_v12  ;;  %v7745_v20 = vpack.c.bf16 %v6677_v18, %v6673_v17  ;;  %v6675_v21 = vld [vmem:[%s13390_s1 + $0x118] sm:$0xff]  ;;  %v9551_v24 = vld [vmem:[%s9461_s16 + $0x28] sm:$0xff]  ;;  %v9560_v25 = vld [vmem:[%s9461_s16 + $0x30] sm:$0xff]  ;;  %p9146_p1 = pneg %p9145_p0  ;;  %p9152_p4 = por %p9151_p3, %p9150_p2 }
  0x36   : > { %7738 = vmatpush1.bf16.msra.mxu1 %v7737_v2  ;;  %711 = vmatprep.mubr.f32.mxu0 %v9207_v35  ;;  %v6679_v22 = vld [vmem:[%s13390_s1 + $0x138] sm:$0xff]  ;;  %v9578_v27 = vld [vmem:[%s9461_s16 + $0x40] sm:$0xff]  ;;  %v9587_v28 = vld [vmem:[%s9461_s16 + $0x48] sm:$0xff] }
  0x37   : > { %920 = vmatprep.mubr.f32.mxu1 %v9207_v35  ;;  %7731 = vmatprep.subr.msk.bf16.mxu0 %vm9415_vm2, %v7729_v8  ;;  %v7755_v23 = vpack.c.bf16 %v6679_v22, %v6675_v21  ;;  %v9569_v26 = vld [vmem:[%s9461_s16 + $0x38] sm:$0xff]  ;;  %v9596_v29 = vld [vmem:[%s9461_s16 + $0x50] sm:$0xff]  ;;  %v9614_v31 = vld [vmem:[%s9461_s16 + $0x60] sm:$0xff]  ;;  %p9153_p5 = pnand %p9152_p4, %p9146_p1 }
  0x38   : > { %6547 = vmatmul.mubr.msk.f32.gmra.mrb[2].mxu0 %vm555_vm3, %v9479_v3  ;;  %7741 = vmatprep.subr.msk.bf16.mxu1 %vm9415_vm2, %v7739_v9  ;;  %v9605_v30 = vld [vmem:[%s9461_s16 + $0x58] sm:$0xff]  ;;  %v9623_v32 = vld [vmem:[%s9461_s16 + $0x68] sm:$0xff]  ;;  %v9632_v33 = vld [vmem:[%s9461_s16 + $0x70] sm:$0xff] }
  0x39   : > { %6573 = vmatmul.mubr.msk.f32.gmra.mrb[2].mxu1 %vm555_vm3, %v9479_v3  ;;  %717 = vmatprep.mubr.f32.mxu0 %v9207_v35  ;;  %v9641_v34 = vld [vmem:[%s9461_s16 + $0x78] sm:$0xff]  ;;  %v9650_v36 = vld [vmem:[%s9461_s16 + $0x80] sm:$0xff]  ;;  %v9659_v37 = vld [vmem:[%s9461_s16 + $0x88] sm:$0xff] }
  0x3a   : > { %926 = vmatprep.mubr.f32.mxu1 %v9207_v35  ;;  %7734 = vmatpush1.bf16.msk.msra.mxu0 %vm9415_vm2, %v7732_v13  ;;  %v9668_v38 = vld [vmem:[%s9461_s16 + $0x90] sm:$0xff]  ;;  %v9677_v39 = vld [vmem:[%s9461_s16 + $0x98] sm:$0xff]  ;;  %v9686_v40 = vld [vmem:[%s9461_s16 + $0xa0] sm:$0xff] }
  0x3b   : > { %7744 = vmatpush1.bf16.msk.msra.mxu1 %vm9415_vm2, %v7742_v16  ;;  %7746 = vmatprep.subr.bf16.mxu0 %v7745_v20  ;;  %v9695_v41 = vld [vmem:[%s9461_s16 + $0xa8] sm:$0xff]  ;;  %v9704_v42 = vld [vmem:[%s9461_s16 + $0xb0] sm:$0xff]  ;;  %v9713_v44 = vld [vmem:[%s9461_s16 + $0xb8] sm:$0xff] }
  0x3c   : > { %6548 = vmatmul.mubr.msk.f32.gmra.mrb[4].mxu0 %vm555_vm3, %v9513_v15  ;;  %7756 = vmatprep.subr.bf16.mxu1 %v7755_v23  ;;  %v9722_v45 = vld [vmem:[%s9461_s16 + $0xc0] sm:$0xff]  ;;  %v6674_v48 = vld [vmem:[%s13390_s1 + $0x110] sm:$0xff]  ;;  %v6681_v50 = vld [vmem:[%s13390_s1 + $0x148] sm:$0xff] }
  0x3d   : > { %6574 = vmatmul.mubr.msk.f32.gmra.mrb[4].mxu1 %vm555_vm3, %v9513_v15  ;;  %723 = vmatprep.mubr.f32.mxu0 %v9207_v35  ;;  %v6672_v46 = vld [vmem:[%s13390_s1 + $0x100] sm:$0xff]  ;;  %v6678_v49 = vld [vmem:[%s13390_s1 + $0x130] sm:$0xff]  ;;  %v6685_v51 = vld [vmem:[%s13390_s1 + $0x168] sm:$0xf] }
  0x3e   : > { %932 = vmatprep.mubr.f32.mxu1 %v9207_v35  ;;  %v6676_v47 = vld [vmem:[%s13390_s1 + $0x120] sm:$0xff]  ;;  %v6683_v54 = vld [vmem:[%s13390_s1 + $0x158] sm:$0xff]  ;;  %v7757_v56 = vpack.c.bf16 %v6678_v49, %v6674_v48  ;;  %v7749_v57 = vpack.c.bf16 %v6685_v51, %v6681_v50  ;;  %v6682_v60 = vld [vmem:[%s13390_s1 + $0x150] sm:$0xff] }
  0x3f   : > { %v473_v52 = vld [vmem:[%s9461_s16] sm:$0xff]  ;;  %v7747_v53 = vpack.c.bf16 %v6676_v47, %v6672_v46  ;;  %v6687_v55 = vld [vmem:[%s13390_s1 + $0x178] sm:$0xf]  ;;  %v6686_v63 = vld [vmem:[%s13390_s1 + $0x170] sm:$0xf] }
  0x40   : > { %6549 = vmatmul.mubr.msk.f32.gmra.mrb[6].mxu0 %vm555_vm3, %v9536_v19  ;;  %v6680_v58 = vld [vmem:[%s13390_s1 + $0x140] sm:$0xff]  ;;  %v7759_v62 = vpack.c.bf16 %v6687_v55, %v6683_v54  ;;  %v6765_v0 = vld [vmem:[%s13390_s1 + $0x188] sm:$0xff]  ;;  %v6767_v2 = vld [vmem:[%s13390_s1 + $0x198] sm:$0xff]  ;;  %v7762_v6 = vpack.c.bf16 %v6686_v63, %v6682_v60 }
  0x41   : > { %6575 = vmatmul.mubr.msk.f32.gmra.mrb[6].mxu1 %vm555_vm3, %v9536_v19  ;;  %729 = vmatprep.mubr.f32.mxu0 %v9207_v35  ;;  %v6684_v59 = vld [vmem:[%s13390_s1 + $0x160] sm:$0xf]  ;;  %v6769_v1 = vld [vmem:[%s13390_s1 + $0x1a8] sm:$0xff]  ;;  %v6771_v4 = vld [vmem:[%s13390_s1 + $0x1b8] sm:$0xff] }
  0x42   : > { %938 = vmatprep.mubr.f32.mxu1 %v9207_v35  ;;  %v7752_v5 = vpack.c.bf16 %v6684_v59, %v6680_v58  ;;  %v7765_v7 = vpack.c.bf16 %v6769_v1, %v6765_v0  ;;  %v7775_v8 = vpack.c.bf16 %v6771_v4, %v6767_v2  ;;  %v6768_v9 = vld [vmem:[%s13390_s1 + $0x1a0] sm:$0xff]  ;;  %v6766_v10 = vld [vmem:[%s13390_s1 + $0x190] sm:$0xff]  ;;  %v6773_v12 = vld [vmem:[%s13390_s1 + $0x1c8] sm:$0xff] }
  0x43   : > { %v6770_v11 = vld [vmem:[%s13390_s1 + $0x1b0] sm:$0xff]  ;;  %v6777_v13 = vld [vmem:[%s13390_s1 + $0x1e8] sm:$0xf]  ;;  %v6775_v16 = vld [vmem:[%s13390_s1 + $0x1d8] sm:$0xff] }
  0x44   : > { %6550 = vmatmul.mubr.msk.f32.gmra.mrb[8].mxu0 %vm555_vm3, %v9551_v24  ;;  %v6779_v17 = vld [vmem:[%s13390_s1 + $0x1f8] sm:$0xf]  ;;  %v7777_v18 = vpack.c.bf16 %v6770_v11, %v6766_v10  ;;  %v7769_v20 = vpack.c.bf16 %v6777_v13, %v6773_v12  ;;  %v6772_v21 = vld [vmem:[%s13390_s1 + $0x1c0] sm:$0xff]  ;;  %v6774_v23 = vld [vmem:[%s13390_s1 + $0x1d0] sm:$0xff] }
  0x45   : > { %6576 = vmatmul.mubr.msk.f32.gmra.mrb[8].mxu1 %vm555_vm3, %v9551_v24  ;;  %735 = vmatprep.mubr.f32.mxu0 %v9207_v35  ;;  %v6776_v22 = vld [vmem:[%s13390_s1 + $0x1e0] sm:$0xf]  ;;  %v7779_v46 = vpack.c.bf16 %v6779_v17, %v6775_v16  ;;  %v6778_v47 = vld [vmem:[%s13390_s1 + $0x1f0] sm:$0xf]  ;;  %v6857_v48 = vld [vmem:[%s13390_s1 + $0x208] sm:$0xff] }
  0x46   : > { %944 = vmatprep.mubr.f32.mxu1 %v9207_v35  ;;  %v6861_v49 = vld [vmem:[%s13390_s1 + $0x228] sm:$0xff]  ;;  %v6859_v50 = vld [vmem:[%s13390_s1 + $0x218] sm:$0xff]  ;;  %v6858_v58 = vld [vmem:[%s13390_s1 + $0x210] sm:$0xff] }
  0x47   : > { %v6863_v51 = vld [vmem:[%s13390_s1 + $0x238] sm:$0xff]  ;;  %v10124_v55 = vld [vmem:[%s9461_s16 + $0xc8] sm:$0xff]  ;;  %v6862_v59 = vld [vmem:[%s13390_s1 + $0x230] sm:$0xff] }
  0x48   : > { %6551 = vmatmul.mubr.msk.f32.gmra.mrb[10].mxu0 %vm555_vm3, %v9560_v25  ;;  %v7795_v54 = vpack.c.bf16 %v6863_v51, %v6859_v50  ;;  %v6865_v60 = vld [vmem:[%s13390_s1 + $0x248] sm:$0xff]  ;;  %v6867_v0 = vld [vmem:[%s13390_s1 + $0x258] sm:$0xff]  ;;  %v7797_v2 = vpack.c.bf16 %v6862_v59, %v6858_v58  ;;  %v6938_v11 = vld [vmem:[%s13392_s3 + $0x470] sm:$0xff] }
  0x49   : > { %6577 = vmatmul.mubr.msk.f32.gmra.mrb[10].mxu1 %vm555_vm3, %v9560_v25  ;;  %741 = vmatprep.mubr.f32.mxu0 %v9207_v35  ;;  %v6871_v1 = vld [vmem:[%s13390_s1 + $0x278] sm:$0xf]  ;;  %v6925_v43 = vld [vmem:[%s13392_s3 + $0x408] sm:$0xff]  ;;  %v6834_v51 = vld [vmem:[%s9461_s16 + $0x30] sm:$0xff] }
  0x4a   : > { %950 = vmatprep.mubr.f32.mxu1 %v9207_v35  ;;  %v6941_v12 = vld [vmem:[%s13392_s3 + $0x488] sm:$0xff]  ;;  %v6943_v16 = vld [vmem:[%s13392_s3 + $0x498] sm:$0xff]  ;;  %v6952_v58 = vld [vmem:[%s13392_s3 + $0x4e0] sm:$0xff] }
  0x4b   : > { %v6945_v13 = vld [vmem:[%s13392_s3 + $0x4a8] sm:$0xff]  ;;  %v6947_v17 = vld [vmem:[%s13392_s3 + $0x4b8] sm:$0xff]  ;;  %v6950_v59 = vld [vmem:[%s13392_s3 + $0x4d0] sm:$0xff] }
  0x4c   : > { %6552 = vmatmul.mubr.msk.f32.gmra.mrb[12].mxu0 %vm555_vm3, %v9569_v26  ;;  %v6953_v50 = vld [vmem:[%s13392_s3 + $0x4e8] sm:$0xff] }
  0x4d   : > { %6578 = vmatmul.mubr.msk.f32.gmra.mrb[12].mxu1 %vm555_vm3, %v9569_v26  ;;  %747 = vmatprep.mubr.f32.mxu0 %v9207_v35 }
  0x4e   : > { %956 = vmatprep.mubr.f32.mxu1 %v9207_v35 }
  0x50   : > { %6553 = vmatmul.mubr.msk.f32.gmra.mrb[14].mxu0 %vm555_vm3, %v9578_v27 }
  0x51   : > { %6579 = vmatmul.mubr.msk.f32.gmra.mrb[14].mxu1 %vm555_vm3, %v9578_v27  ;;  %753 = vmatprep.mubr.f32.mxu0 %v9207_v35 }
  0x52   : > { %962 = vmatprep.mubr.f32.mxu1 %v9207_v35 }
  0x54   : > { %6554 = vmatmul.mubr.msk.f32.gmra.mrb[16].mxu0 %vm555_vm3, %v9587_v28 }
  0x55   : > { %6580 = vmatmul.mubr.msk.f32.gmra.mrb[16].mxu1 %vm555_vm3, %v9587_v28  ;;  %759 = vmatprep.mubr.f32.mxu0 %v9207_v35 }
  0x56   : > { %968 = vmatprep.mubr.f32.mxu1 %v9207_v35 }
  0x58   : > { %6555 = vmatmul.mubr.msk.f32.gmra.mrb[18].mxu0 %vm555_vm3, %v9596_v29 }
  0x59   : > { %6581 = vmatmul.mubr.msk.f32.gmra.mrb[18].mxu1 %vm555_vm3, %v9596_v29  ;;  %765 = vmatprep.mubr.f32.mxu0 %v9207_v35 }
  0x5a   : > { %974 = vmatprep.mubr.f32.mxu1 %v9207_v35 }
  0x5c   : > { %6556 = vmatmul.mubr.msk.f32.gmra.mrb[20].mxu0 %vm555_vm3, %v9605_v30 }
  0x5d   : > { %6582 = vmatmul.mubr.msk.f32.gmra.mrb[20].mxu1 %vm555_vm3, %v9605_v30  ;;  %771 = vmatprep.mubr.f32.mxu0 %v9207_v35 }
  0x5e   : > { %980 = vmatprep.mubr.f32.mxu1 %v9207_v35 }
  0x60   : > { %6557 = vmatmul.mubr.msk.f32.gmra.mrb[22].mxu0 %vm555_vm3, %v9614_v31 }
  0x61   : > { %6583 = vmatmul.mubr.msk.f32.gmra.mrb[22].mxu1 %vm555_vm3, %v9614_v31  ;;  %777 = vmatprep.mubr.f32.mxu0 %v9207_v35 }
  0x62   : > { %986 = vmatprep.mubr.f32.mxu1 %v9207_v35 }
  0x64   : > { %6558 = vmatmul.mubr.msk.f32.gmra.mrb[24].mxu0 %vm555_vm3, %v9623_v32 }
  0x65   : > { %6584 = vmatmul.mubr.msk.f32.gmra.mrb[24].mxu1 %vm555_vm3, %v9623_v32  ;;  %783 = vmatprep.mubr.f32.mxu0 %v9207_v35 }
  0x66   : > { %992 = vmatprep.mubr.f32.mxu1 %v9207_v35 }
  0x68   : > { %6559 = vmatmul.mubr.msk.f32.gmra.mrb[26].mxu0 %vm555_vm3, %v9632_v33 }
  0x69   : > { %6585 = vmatmul.mubr.msk.f32.gmra.mrb[26].mxu1 %vm555_vm3, %v9632_v33  ;;  %789 = vmatprep.mubr.f32.mxu0 %v9207_v35 }
  0x6a   : > { %998 = vmatprep.mubr.f32.mxu1 %v9207_v35 }
  0x6c   : > { %6560 = vmatmul.mubr.msk.f32.gmra.mrb[28].mxu0 %vm555_vm3, %v9641_v34 }
  0x6d   : > { %6586 = vmatmul.mubr.msk.f32.gmra.mrb[28].mxu1 %vm555_vm3, %v9641_v34  ;;  %795 = vmatprep.mubr.f32.mxu0 %v9207_v35 }
  0x6e   : > { %1004 = vmatprep.mubr.f32.mxu1 %v9207_v35 }
  0x70   : > { %6561 = vmatmul.mubr.msk.f32.gmra.mrb[30].mxu0 %vm555_vm3, %v9650_v36 }
  0x71   : > { %6587 = vmatmul.mubr.msk.f32.gmra.mrb[30].mxu1 %vm555_vm3, %v9650_v36  ;;  %801 = vmatprep.mubr.f32.mxu0 %v9207_v35 }
  0x72   : > { %1010 = vmatprep.mubr.f32.mxu1 %v9207_v35 }
  0x74   : > { %6562 = vmatmul.mubr.msk.f32.gmra.mrb[32].mxu0 %vm555_vm3, %v9659_v37 }
  0x75   : > { %6588 = vmatmul.mubr.msk.f32.gmra.mrb[32].mxu1 %vm555_vm3, %v9659_v37  ;;  %807 = vmatprep.mubr.f32.mxu0 %v9207_v35 }
  0x76   : > { %1016 = vmatprep.mubr.f32.mxu1 %v9207_v35 }
  0x78   : > { %6563 = vmatmul.mubr.msk.f32.gmra.mrb[34].mxu0 %vm555_vm3, %v9668_v38 }
  0x79   : > { %6589 = vmatmul.mubr.msk.f32.gmra.mrb[34].mxu1 %vm555_vm3, %v9668_v38  ;;  %813 = vmatprep.mubr.f32.mxu0 %v9207_v35 }
  0x7a   : > { %1022 = vmatprep.mubr.f32.mxu1 %v9207_v35 }
  0x7c   : > { %6564 = vmatmul.mubr.msk.f32.gmra.mrb[36].mxu0 %vm555_vm3, %v9677_v39 }
  0x7d   : > { %6590 = vmatmul.mubr.msk.f32.gmra.mrb[36].mxu1 %vm555_vm3, %v9677_v39  ;;  %819 = vmatprep.mubr.f32.mxu0 %v9207_v35 }
  0x7e   : > { %1028 = vmatprep.mubr.f32.mxu1 %v9207_v35 }
  0x80   : > { %6565 = vmatmul.mubr.msk.f32.gmra.mrb[38].mxu0 %vm555_vm3, %v9686_v40 }
  0x81   : > { %6591 = vmatmul.mubr.msk.f32.gmra.mrb[38].mxu1 %vm555_vm3, %v9686_v40  ;;  %825 = vmatprep.mubr.f32.mxu0 %v9207_v35 }
  0x82   : > { %1034 = vmatprep.mubr.f32.mxu1 %v9207_v35 }
  0x84   : > { %6566 = vmatmul.mubr.msk.f32.gmra.mrb[40].mxu0 %vm555_vm3, %v9695_v41 }
  0x85   : > { %6592 = vmatmul.mubr.msk.f32.gmra.mrb[40].mxu1 %vm555_vm3, %v9695_v41  ;;  %831 = vmatprep.mubr.f32.mxu0 %v9207_v35 }
  0x86   : > { %1040 = vmatprep.mubr.f32.mxu1 %v9207_v35 }
  0x88   : > { %6567 = vmatmul.mubr.msk.f32.gmra.mrb[42].mxu0 %vm555_vm3, %v9704_v42 }
  0x89   : > { %6593 = vmatmul.mubr.msk.f32.gmra.mrb[42].mxu1 %vm555_vm3, %v9704_v42  ;;  %837 = vmatprep.mubr.f32.mxu0 %v9207_v35 }
  0x8a   : > { %1046 = vmatprep.mubr.f32.mxu1 %v9207_v35 }
  0x8c   : > { %6568 = vmatmul.mubr.msk.f32.gmra.mrb[44].mxu0 %vm555_vm3, %v9713_v44 }
  0x8d   : > { %6594 = vmatmul.mubr.msk.f32.gmra.mrb[44].mxu1 %vm555_vm3, %v9713_v44  ;;  %843 = vmatprep.mubr.f32.mxu0 %v9207_v35 }
  0x8e   : > { %1052 = vmatprep.mubr.f32.mxu1 %v9207_v35 }
  0x90   : > { %6569 = vmatmul.mubr.msk.f32.gmra.mrb[46].mxu0 %vm555_vm3, %v9722_v45 }
  0x91   : > { %6595 = vmatmul.mubr.msk.f32.gmra.mrb[46].mxu1 %vm555_vm3, %v9722_v45  ;;  %1207 = vmatprep.mubr.f32.mxu0 %v9207_v35 }
  0x92   : > { %1416 = vmatprep.mubr.f32.mxu1 %v9207_v35 }
  0x94   : > { %6598 = vmatmul.mubr.msk.f32.vlgmr.msra.gmra.mrb[0].mxu0 %vm555_vm3, %v473_v52 }
  0x95   : > { %6624 = vmatmul.mubr.msk.f32.vlgmr.msra.gmra.mrb[0].mxu1 %vm555_vm3, %v473_v52  ;;  %7748 = vmatpush1.bf16.msra.mxu0 %v7747_v53  ;;  %v7772_v52 = vpack.c.bf16 %v6776_v22, %v6772_v21  ;;  %v7782_v53 = vpack.c.bf16 %v6778_v47, %v6774_v23  ;;  %v7813_v21 = vpack.c.bf16 %v6945_v13, %v6941_v12  ;;  %v6940_v22 = vld [vmem:[%s13392_s3 + $0x480] sm:$0xff]  ;;  %v6974_v13 = vld [vmem:[%s13392_s3 + $0x590] sm:$0xff] }
  0x96   : > { %7758 = vmatpush1.bf16.msra.mxu1 %v7757_v56  ;;  %1213 = vmatprep.mubr.f32.mxu0 %v9207_v35  ;;  %v6856_v56 = vld [vmem:[%s13390_s1 + $0x200] sm:$0xff]  ;;  %v7877_v47 = vpack.c.bf16 %v6947_v17, %v6943_v16  ;;  %v6978_v16 = vld [vmem:[%s13392_s3 + $0x5b0] sm:$0xff]  ;;  %v6981_v17 = vld [vmem:[%s13392_s3 + $0x5c8] sm:$0xff] }
  0x97   : > { %1422 = vmatprep.mubr.f32.mxu1 %v9207_v35  ;;  %7751 = vmatprep.subr.msk.bf16.mxu0 %vm9415_vm2, %v7749_v57  ;;  %v6860_v57 = vld [vmem:[%s13390_s1 + $0x220] sm:$0xff] }
  0x98   : > { %6599 = vmatmul.mubr.msk.f32.gmra.mrb[2].mxu0 %vm555_vm3, %v9464_v61  ;;  %7761 = vmatprep.subr.msk.bf16.mxu1 %vm9415_vm2, %v7759_v62  ;;  %v6869_v62 = vld [vmem:[%s13390_s1 + $0x268] sm:$0xf]  ;;  %v7787_v63 = vpack.c.bf16 %v6860_v57, %v6856_v56  ;;  %v6944_v23 = vld [vmem:[%s13392_s3 + $0x4a0] sm:$0xff] }
  0x99   : > { %6625 = vmatmul.mubr.msk.f32.gmra.mrb[2].mxu1 %vm555_vm3, %v9464_v61  ;;  %1219 = vmatprep.mubr.f32.mxu0 %v9207_v35  ;;  %v6764_v61 = vld [vmem:[%s13390_s1 + $0x180] sm:$0xff]  ;;  %v7789_v4 = vpack.c.bf16 %v6869_v62, %v6865_v60  ;;  %v6954_v62 = vld [vmem:[%s13392_s3 + $0x4f0] sm:$0xff] }
  0x9a   : > { %1428 = vmatprep.mubr.f32.mxu1 %v9207_v35  ;;  %7754 = vmatpush1.bf16.msk.msra.mxu0 %vm9415_vm2, %v7752_v5  ;;  %v7767_v14 = vpack.c.bf16 %v6768_v9, %v6764_v61  ;;  %v6864_v5 = vld [vmem:[%s13390_s1 + $0x240] sm:$0xff]  ;;  %v6870_v61 = vld [vmem:[%s13390_s1 + $0x270] sm:$0xf] }
  0x9b   : > { %7764 = vmatpush1.bf16.msk.msra.mxu1 %vm9415_vm2, %v7762_v6  ;;  %7766 = vmatprep.subr.bf16.mxu0 %v7765_v7  ;;  %v6868_v6 = vld [vmem:[%s13390_s1 + $0x260] sm:$0xf]  ;;  %v7799_v7 = vpack.c.bf16 %v6871_v1, %v6867_v0  ;;  %v6961_v0 = vld [vmem:[%s13392_s3 + $0x528] sm:$0xff]  ;;  %v6835_v1 = vld [vmem:[%s9461_s16 + $0x38] sm:$0xff] }
  0x9c   : > { %6600 = vmatmul.mubr.msk.f32.gmra.mrb[4].mxu0 %vm555_vm3, %v9479_v3  ;;  %7776 = vmatprep.subr.bf16.mxu1 %v7775_v8  ;;  %v6866_v8 = vld [vmem:[%s13390_s1 + $0x250] sm:$0xff]  ;;  %v7792_v9 = vpack.c.bf16 %v6868_v6, %v6864_v5  ;;  %v6948_v57 = vld [vmem:[%s13392_s3 + $0x4c0] sm:$0xff]  ;;  %v7883_v6 = vpack.c.bf16 %v6954_v62, %v6950_v59 }
  0x9d   : > { %6626 = vmatmul.mubr.msk.f32.gmra.mrb[4].mxu1 %vm555_vm3, %v9479_v3  ;;  %1225 = vmatprep.mubr.f32.mxu0 %v9207_v35  ;;  %v7802_v10 = vpack.c.bf16 %v6870_v61, %v6866_v8  ;;  %v7819_v5 = vpack.c.bf16 %v6952_v58, %v6948_v57  ;;  %v6956_v8 = vld [vmem:[%s13392_s3 + $0x500] sm:$0xff]  ;;  %v6995_v57 = vld [vmem:[%s13392_s3 + $0x638] sm:$0xff] }
  0x9e   : > { %1434 = vmatprep.mubr.f32.mxu1 %v9207_v35  ;;  %v6960_v61 = vld [vmem:[%s13392_s3 + $0x520] sm:$0xff] }
  0x9f   : > { %v6976_v12 = vld [vmem:[%s13392_s3 + $0x5a0] sm:$0xff] }
  0xa0   : > { %6601 = vmatmul.mubr.msk.f32.gmra.mrb[6].mxu0 %vm555_vm3, %v9513_v15  ;;  %v6988_v62 = vld [vmem:[%s13392_s3 + $0x600] sm:$0xff] }
  0xa1   : > { %6627 = vmatmul.mubr.msk.f32.gmra.mrb[6].mxu1 %vm555_vm3, %v9513_v15  ;;  %1231 = vmatprep.mubr.f32.mxu0 %v9207_v35 }
  0xa2   : > { %1440 = vmatprep.mubr.f32.mxu1 %v9207_v35 }
  0xa4   : > { %6602 = vmatmul.mubr.msk.f32.gmra.mrb[8].mxu0 %vm555_vm3, %v9536_v19 }
  0xa5   : > { %6628 = vmatmul.mubr.msk.f32.gmra.mrb[8].mxu1 %vm555_vm3, %v9536_v19  ;;  %1237 = vmatprep.mubr.f32.mxu0 %v9207_v35 }
  0xa6   : > { %1446 = vmatprep.mubr.f32.mxu1 %v9207_v35 }
  0xa8   : > { %6603 = vmatmul.mubr.msk.f32.gmra.mrb[10].mxu0 %vm555_vm3, %v9551_v24 }
  0xa9   : > { %6629 = vmatmul.mubr.msk.f32.gmra.mrb[10].mxu1 %vm555_vm3, %v9551_v24  ;;  %1243 = vmatprep.mubr.f32.mxu0 %v9207_v35 }
  0xaa   : > { %1452 = vmatprep.mubr.f32.mxu1 %v9207_v35 }
  0xac   : > { %6604 = vmatmul.mubr.msk.f32.gmra.mrb[12].mxu0 %vm555_vm3, %v9560_v25 }
  0xad   : > { %6630 = vmatmul.mubr.msk.f32.gmra.mrb[12].mxu1 %vm555_vm3, %v9560_v25  ;;  %1249 = vmatprep.mubr.f32.mxu0 %v9207_v35 }
  0xae   : > { %1458 = vmatprep.mubr.f32.mxu1 %v9207_v35 }
  0xb0   : > { %6605 = vmatmul.mubr.msk.f32.gmra.mrb[14].mxu0 %vm555_vm3, %v9569_v26 }
  0xb1   : > { %6631 = vmatmul.mubr.msk.f32.gmra.mrb[14].mxu1 %vm555_vm3, %v9569_v26  ;;  %1255 = vmatprep.mubr.f32.mxu0 %v9207_v35 }
  0xb2   : > { %1464 = vmatprep.mubr.f32.mxu1 %v9207_v35 }
  0xb4   : > { %6606 = vmatmul.mubr.msk.f32.gmra.mrb[16].mxu0 %vm555_vm3, %v9578_v27 }
  0xb5   : > { %6632 = vmatmul.mubr.msk.f32.gmra.mrb[16].mxu1 %vm555_vm3, %v9578_v27  ;;  %1261 = vmatprep.mubr.f32.mxu0 %v9207_v35 }
  0xb6   : > { %1470 = vmatprep.mubr.f32.mxu1 %v9207_v35 }
  0xb8   : > { %6607 = vmatmul.mubr.msk.f32.gmra.mrb[18].mxu0 %vm555_vm3, %v9587_v28 }
  0xb9   : > { %6633 = vmatmul.mubr.msk.f32.gmra.mrb[18].mxu1 %vm555_vm3, %v9587_v28  ;;  %1267 = vmatprep.mubr.f32.mxu0 %v9207_v35 }
  0xba   : > { %1476 = vmatprep.mubr.f32.mxu1 %v9207_v35 }
  0xbc   : > { %6608 = vmatmul.mubr.msk.f32.gmra.mrb[20].mxu0 %vm555_vm3, %v9596_v29 }
  0xbd   : > { %6634 = vmatmul.mubr.msk.f32.gmra.mrb[20].mxu1 %vm555_vm3, %v9596_v29  ;;  %1273 = vmatprep.mubr.f32.mxu0 %v9207_v35 }
  0xbe   : > { %1482 = vmatprep.mubr.f32.mxu1 %v9207_v35 }
  0xc0   : > { %6609 = vmatmul.mubr.msk.f32.gmra.mrb[22].mxu0 %vm555_vm3, %v9605_v30 }
  0xc1   : > { %6635 = vmatmul.mubr.msk.f32.gmra.mrb[22].mxu1 %vm555_vm3, %v9605_v30  ;;  %1279 = vmatprep.mubr.f32.mxu0 %v9207_v35 }
  0xc2   : > { %1488 = vmatprep.mubr.f32.mxu1 %v9207_v35 }
  0xc4   : > { %6610 = vmatmul.mubr.msk.f32.gmra.mrb[24].mxu0 %vm555_vm3, %v9614_v31 }
  0xc5   : > { %6636 = vmatmul.mubr.msk.f32.gmra.mrb[24].mxu1 %vm555_vm3, %v9614_v31  ;;  %1285 = vmatprep.mubr.f32.mxu0 %v9207_v35 }
  0xc6   : > { %1494 = vmatprep.mubr.f32.mxu1 %v9207_v35 }
  0xc8   : > { %6611 = vmatmul.mubr.msk.f32.gmra.mrb[26].mxu0 %vm555_vm3, %v9623_v32 }
  0xc9   : > { %6637 = vmatmul.mubr.msk.f32.gmra.mrb[26].mxu1 %vm555_vm3, %v9623_v32  ;;  %1291 = vmatprep.mubr.f32.mxu0 %v9207_v35 }
  0xca   : > { %1500 = vmatprep.mubr.f32.mxu1 %v9207_v35 }
  0xcc   : > { %6612 = vmatmul.mubr.msk.f32.gmra.mrb[28].mxu0 %vm555_vm3, %v9632_v33 }
  0xcd   : > { %6638 = vmatmul.mubr.msk.f32.gmra.mrb[28].mxu1 %vm555_vm3, %v9632_v33  ;;  %1297 = vmatprep.mubr.f32.mxu0 %v9207_v35 }
  0xce   : > { %1506 = vmatprep.mubr.f32.mxu1 %v9207_v35 }
  0xd0   : > { %6613 = vmatmul.mubr.msk.f32.gmra.mrb[30].mxu0 %vm555_vm3, %v9641_v34 }
  0xd1   : > { %6639 = vmatmul.mubr.msk.f32.gmra.mrb[30].mxu1 %vm555_vm3, %v9641_v34  ;;  %1303 = vmatprep.mubr.f32.mxu0 %v9207_v35 }
  0xd2   : > { %1512 = vmatprep.mubr.f32.mxu1 %v9207_v35 }
  0xd4   : > { %6614 = vmatmul.mubr.msk.f32.gmra.mrb[32].mxu0 %vm555_vm3, %v9650_v36 }
  0xd5   : > { %6640 = vmatmul.mubr.msk.f32.gmra.mrb[32].mxu1 %vm555_vm3, %v9650_v36  ;;  %1309 = vmatprep.mubr.f32.mxu0 %v9207_v35 }
  0xd6   : > { %1518 = vmatprep.mubr.f32.mxu1 %v9207_v35 }
  0xd8   : > { %6615 = vmatmul.mubr.msk.f32.gmra.mrb[34].mxu0 %vm555_vm3, %v9659_v37 }
  0xd9   : > { %6641 = vmatmul.mubr.msk.f32.gmra.mrb[34].mxu1 %vm555_vm3, %v9659_v37  ;;  %1315 = vmatprep.mubr.f32.mxu0 %v9207_v35 }
  0xda   : > { %1524 = vmatprep.mubr.f32.mxu1 %v9207_v35 }
  0xdc   : > { %6616 = vmatmul.mubr.msk.f32.gmra.mrb[36].mxu0 %vm555_vm3, %v9668_v38 }
  0xdd   : > { %6642 = vmatmul.mubr.msk.f32.gmra.mrb[36].mxu1 %vm555_vm3, %v9668_v38  ;;  %1321 = vmatprep.mubr.f32.mxu0 %v9207_v35 }
  0xde   : > { %1530 = vmatprep.mubr.f32.mxu1 %v9207_v35 }
  0xe0   : > { %6617 = vmatmul.mubr.msk.f32.gmra.mrb[38].mxu0 %vm555_vm3, %v9677_v39 }
  0xe1   : > { %6643 = vmatmul.mubr.msk.f32.gmra.mrb[38].mxu1 %vm555_vm3, %v9677_v39  ;;  %1327 = vmatprep.mubr.f32.mxu0 %v9207_v35 }
  0xe2   : > { %1536 = vmatprep.mubr.f32.mxu1 %v9207_v35 }
  0xe4   : > { %6618 = vmatmul.mubr.msk.f32.gmra.mrb[40].mxu0 %vm555_vm3, %v9686_v40 }
  0xe5   : > { %6644 = vmatmul.mubr.msk.f32.gmra.mrb[40].mxu1 %vm555_vm3, %v9686_v40  ;;  %1333 = vmatprep.mubr.f32.mxu0 %v9207_v35 }
  0xe6   : > { %1542 = vmatprep.mubr.f32.mxu1 %v9207_v35 }
  0xe8   : > { %6619 = vmatmul.mubr.msk.f32.gmra.mrb[42].mxu0 %vm555_vm3, %v9695_v41 }
  0xe9   : > { %6645 = vmatmul.mubr.msk.f32.gmra.mrb[42].mxu1 %vm555_vm3, %v9695_v41  ;;  %1339 = vmatprep.mubr.f32.mxu0 %v9207_v35 }
  0xea   : > { %1548 = vmatprep.mubr.f32.mxu1 %v9207_v35 }
  0xec   : > { %6620 = vmatmul.mubr.msk.f32.gmra.mrb[44].mxu0 %vm555_vm3, %v9704_v42 }
  0xed   : > { %6646 = vmatmul.mubr.msk.f32.gmra.mrb[44].mxu1 %vm555_vm3, %v9704_v42  ;;  %1345 = vmatprep.mubr.f32.mxu0 %v9207_v35 }
  0xee   : > { %1554 = vmatprep.mubr.f32.mxu1 %v9207_v35 }
  0xf0   : > { %6621 = vmatmul.mubr.msk.f32.gmra.mrb[46].mxu0 %vm555_vm3, %v9713_v44 }
  0xf1   : > { %6647 = vmatmul.mubr.msk.f32.gmra.mrb[46].mxu1 %vm555_vm3, %v9713_v44  ;;  %1751 = vmatprep.mubr.f32.mxu0 %v9207_v35 }
  0xf2   : > { %1960 = vmatprep.mubr.f32.mxu1 %v9207_v35 }
  0xf4   : > { %6690 = vmatmul.mubr.msk.f32.vlgmr.msra.gmra.mrb[0].mxu0 %vm555_vm3, %v9479_v3 }
  0xf5   : > { %6716 = vmatmul.mubr.msk.f32.vlgmr.msra.gmra.mrb[0].mxu1 %vm555_vm3, %v9479_v3  ;;  %7768 = vmatpush1.bf16.msra.mxu0 %v7767_v14  ;;  %v7785_v3 = vpack.c.bf16 %v6861_v49, %v6857_v48  ;;  %v6833_v14 = vld [vmem:[%s9461_s16 + $0x28] sm:$0xff]  ;;  %v6946_v48 = vld [vmem:[%s13392_s3 + $0x4b0] sm:$0xff] }
  0xf6   : > { %7778 = vmatpush1.bf16.msra.mxu1 %v7777_v18  ;;  %1757 = vmatprep.mubr.f32.mxu0 %v9207_v35  ;;  %v6949_v49 = vld [vmem:[%s13392_s3 + $0x4c8] sm:$0xff] }
  0xf7   : > { %1966 = vmatprep.mubr.f32.mxu1 %v9207_v35  ;;  %7771 = vmatprep.subr.msk.bf16.mxu0 %vm9415_vm2, %v7769_v20  ;;  %v7817_v56 = vpack.c.bf16 %v6953_v50, %v6949_v49  ;;  %v6984_v49 = vld [vmem:[%s13392_s3 + $0x5e0] sm:$0xff]  ;;  %v6982_v50 = vld [vmem:[%s13392_s3 + $0x5d0] sm:$0xff] }
  0xf8   : > { %6691 = vmatmul.mubr.msk.f32.gmra.mrb[2].mxu0 %vm555_vm3, %v9513_v15  ;;  %7781 = vmatprep.subr.msk.bf16.mxu1 %vm9415_vm2, %v7779_v46  ;;  %v6942_v46 = vld [vmem:[%s13392_s3 + $0x490] sm:$0xff] }
  0xf9   : > { %6717 = vmatmul.mubr.msk.f32.gmra.mrb[2].mxu1 %vm555_vm3, %v9513_v15  ;;  %1763 = vmatprep.mubr.f32.mxu0 %v9207_v35 }
  0xfa   : > { %1972 = vmatprep.mubr.f32.mxu1 %v9207_v35  ;;  %7774 = vmatpush1.bf16.msk.msra.mxu0 %vm9415_vm2, %v7772_v52  ;;  %v6951_v52 = vld [vmem:[%s13392_s3 + $0x4d8] sm:$0xff] }
  0xfb   : > { %7784 = vmatpush1.bf16.msk.msra.mxu1 %vm9415_vm2, %v7782_v53  ;;  %7786 = vmatprep.subr.bf16.mxu0 %v7785_v3  ;;  %v6955_v53 = vld [vmem:[%s13392_s3 + $0x4f8] sm:$0xff]  ;;  %v7815_v3 = vpack.c.bf16 %v6944_v23, %v6940_v22 }
  0xfc   : > { %6692 = vmatmul.mubr.msk.f32.gmra.mrb[4].mxu0 %vm555_vm3, %v9536_v19  ;;  %7796 = vmatprep.subr.bf16.mxu1 %v7795_v54  ;;  %v7879_v54 = vpack.c.bf16 %v6946_v48, %v6942_v46  ;;  %v7881_v60 = vpack.c.bf16 %v6955_v53, %v6951_v52  ;;  %v6987_v22 = vld [vmem:[%s13392_s3 + $0x5f8] sm:$0xff]  ;;  %v7895_v46 = vpack.c.bf16 %v6978_v16, %v6974_v13  ;;  %v6980_v48 = vld [vmem:[%s13392_s3 + $0x5c0] sm:$0xff]  ;;  %v6986_v52 = vld [vmem:[%s13392_s3 + $0x5f0] sm:$0xff] }
  0xfd   : > { %6718 = vmatmul.mubr.msk.f32.gmra.mrb[4].mxu1 %vm555_vm3, %v9536_v19  ;;  %1769 = vmatprep.mubr.f32.mxu0 %v9207_v35  ;;  %v6989_v53 = vld [vmem:[%s13392_s3 + $0x608] sm:$0xff]  ;;  %v7835_v58 = vpack.c.bf16 %v6984_v49, %v6980_v48  ;;  %v7899_v59 = vpack.c.bf16 %v6986_v52, %v6982_v50  ;;  %v7012_v16 = vld [vmem:[%s13392_s3 + $0x6c0] sm:$0xff]  ;;  %v7027_v48 = vld [vmem:[%s13392_s3 + $0x738] sm:$0xff] }
  0xfe   : > { %1978 = vmatprep.mubr.f32.mxu1 %v9207_v35 }
 0x100   : > { %6693 = vmatmul.mubr.msk.f32.gmra.mrb[6].mxu0 %vm555_vm3, %v9551_v24 }
 0x101   : > { %6719 = vmatmul.mubr.msk.f32.gmra.mrb[6].mxu1 %vm555_vm3, %v9551_v24  ;;  %1775 = vmatprep.mubr.f32.mxu0 %v9207_v35 }
 0x102   : > { %1984 = vmatprep.mubr.f32.mxu1 %v9207_v35 }
 0x104   : > { %6694 = vmatmul.mubr.msk.f32.gmra.mrb[8].mxu0 %vm555_vm3, %v9560_v25 }
 0x105   : > { %6720 = vmatmul.mubr.msk.f32.gmra.mrb[8].mxu1 %vm555_vm3, %v9560_v25  ;;  %1781 = vmatprep.mubr.f32.mxu0 %v9207_v35 }
 0x106   : > { %1990 = vmatprep.mubr.f32.mxu1 %v9207_v35 }
 0x108   : > { %6695 = vmatmul.mubr.msk.f32.gmra.mrb[10].mxu0 %vm555_vm3, %v9569_v26 }
 0x109   : > { %6721 = vmatmul.mubr.msk.f32.gmra.mrb[10].mxu1 %vm555_vm3, %v9569_v26  ;;  %1787 = vmatprep.mubr.f32.mxu0 %v9207_v35 }
 0x10a   : > { %1996 = vmatprep.mubr.f32.mxu1 %v9207_v35 }
 0x10c   : > { %6696 = vmatmul.mubr.msk.f32.gmra.mrb[12].mxu0 %vm555_vm3, %v9578_v27 }
 0x10d   : > { %6722 = vmatmul.mubr.msk.f32.gmra.mrb[12].mxu1 %vm555_vm3, %v9578_v27  ;;  %1793 = vmatprep.mubr.f32.mxu0 %v9207_v35 }
 0x10e   : > { %2002 = vmatprep.mubr.f32.mxu1 %v9207_v35 }
 0x110   : > { %6697 = vmatmul.mubr.msk.f32.gmra.mrb[14].mxu0 %vm555_vm3, %v9587_v28 }
 0x111   : > { %6723 = vmatmul.mubr.msk.f32.gmra.mrb[14].mxu1 %vm555_vm3, %v9587_v28  ;;  %1799 = vmatprep.mubr.f32.mxu0 %v9207_v35 }
 0x112   : > { %2008 = vmatprep.mubr.f32.mxu1 %v9207_v35 }
 0x114   : > { %6698 = vmatmul.mubr.msk.f32.gmra.mrb[16].mxu0 %vm555_vm3, %v9596_v29 }
 0x115   : > { %6724 = vmatmul.mubr.msk.f32.gmra.mrb[16].mxu1 %vm555_vm3, %v9596_v29  ;;  %1805 = vmatprep.mubr.f32.mxu0 %v9207_v35 }
 0x116   : > { %2014 = vmatprep.mubr.f32.mxu1 %v9207_v35 }
 0x118   : > { %6699 = vmatmul.mubr.msk.f32.gmra.mrb[18].mxu0 %vm555_vm3, %v9605_v30 }
 0x119   : > { %6725 = vmatmul.mubr.msk.f32.gmra.mrb[18].mxu1 %vm555_vm3, %v9605_v30  ;;  %1811 = vmatprep.mubr.f32.mxu0 %v9207_v35 }
 0x11a   : > { %2020 = vmatprep.mubr.f32.mxu1 %v9207_v35 }
 0x11c   : > { %6700 = vmatmul.mubr.msk.f32.gmra.mrb[20].mxu0 %vm555_vm3, %v9614_v31 }
 0x11d   : > { %6726 = vmatmul.mubr.msk.f32.gmra.mrb[20].mxu1 %vm555_vm3, %v9614_v31  ;;  %1817 = vmatprep.mubr.f32.mxu0 %v9207_v35 }
 0x11e   : > { %2026 = vmatprep.mubr.f32.mxu1 %v9207_v35 }
 0x120   : > { %6701 = vmatmul.mubr.msk.f32.gmra.mrb[22].mxu0 %vm555_vm3, %v9623_v32 }
 0x121   : > { %6727 = vmatmul.mubr.msk.f32.gmra.mrb[22].mxu1 %vm555_vm3, %v9623_v32  ;;  %1823 = vmatprep.mubr.f32.mxu0 %v9207_v35 }
 0x122   : > { %2032 = vmatprep.mubr.f32.mxu1 %v9207_v35 }
 0x124   : > { %6702 = vmatmul.mubr.msk.f32.gmra.mrb[24].mxu0 %vm555_vm3, %v9632_v33 }
 0x125   : > { %6728 = vmatmul.mubr.msk.f32.gmra.mrb[24].mxu1 %vm555_vm3, %v9632_v33  ;;  %1829 = vmatprep.mubr.f32.mxu0 %v9207_v35 }
 0x126   : > { %2038 = vmatprep.mubr.f32.mxu1 %v9207_v35 }
 0x128   : > { %6703 = vmatmul.mubr.msk.f32.gmra.mrb[26].mxu0 %vm555_vm3, %v9641_v34 }
 0x129   : > { %6729 = vmatmul.mubr.msk.f32.gmra.mrb[26].mxu1 %vm555_vm3, %v9641_v34  ;;  %1835 = vmatprep.mubr.f32.mxu0 %v9207_v35 }
 0x12a   : > { %2044 = vmatprep.mubr.f32.mxu1 %v9207_v35 }
 0x12c   : > { %6704 = vmatmul.mubr.msk.f32.gmra.mrb[28].mxu0 %vm555_vm3, %v9650_v36 }
 0x12d   : > { %6730 = vmatmul.mubr.msk.f32.gmra.mrb[28].mxu1 %vm555_vm3, %v9650_v36  ;;  %1841 = vmatprep.mubr.f32.mxu0 %v9207_v35 }
 0x12e   : > { %2050 = vmatprep.mubr.f32.mxu1 %v9207_v35 }
 0x130   : > { %6705 = vmatmul.mubr.msk.f32.gmra.mrb[30].mxu0 %vm555_vm3, %v9659_v37 }
 0x131   : > { %6731 = vmatmul.mubr.msk.f32.gmra.mrb[30].mxu1 %vm555_vm3, %v9659_v37  ;;  %1847 = vmatprep.mubr.f32.mxu0 %v9207_v35 }
 0x132   : > { %2056 = vmatprep.mubr.f32.mxu1 %v9207_v35 }
 0x134   : > { %6706 = vmatmul.mubr.msk.f32.gmra.mrb[32].mxu0 %vm555_vm3, %v9668_v38 }
 0x135   : > { %6732 = vmatmul.mubr.msk.f32.gmra.mrb[32].mxu1 %vm555_vm3, %v9668_v38  ;;  %1853 = vmatprep.mubr.f32.mxu0 %v9207_v35 }
 0x136   : > { %2062 = vmatprep.mubr.f32.mxu1 %v9207_v35 }
 0x138   : > { %6707 = vmatmul.mubr.msk.f32.gmra.mrb[34].mxu0 %vm555_vm3, %v9677_v39 }
 0x139   : > { %6733 = vmatmul.mubr.msk.f32.gmra.mrb[34].mxu1 %vm555_vm3, %v9677_v39  ;;  %1859 = vmatprep.mubr.f32.mxu0 %v9207_v35 }
 0x13a   : > { %2068 = vmatprep.mubr.f32.mxu1 %v9207_v35 }
 0x13c   : > { %6708 = vmatmul.mubr.msk.f32.gmra.mrb[36].mxu0 %vm555_vm3, %v9686_v40 }
 0x13d   : > { %6734 = vmatmul.mubr.msk.f32.gmra.mrb[36].mxu1 %vm555_vm3, %v9686_v40  ;;  %1865 = vmatprep.mubr.f32.mxu0 %v9207_v35 }
 0x13e   : > { %2074 = vmatprep.mubr.f32.mxu1 %v9207_v35 }
 0x140   : > { %6709 = vmatmul.mubr.msk.f32.gmra.mrb[38].mxu0 %vm555_vm3, %v9695_v41 }
 0x141   : > { %6735 = vmatmul.mubr.msk.f32.gmra.mrb[38].mxu1 %vm555_vm3, %v9695_v41  ;;  %1871 = vmatprep.mubr.f32.mxu0 %v9207_v35 }
 0x142   : > { %2080 = vmatprep.mubr.f32.mxu1 %v9207_v35 }
 0x144   : > { %6710 = vmatmul.mubr.msk.f32.gmra.mrb[40].mxu0 %vm555_vm3, %v9704_v42 }
 0x145   : > { %6736 = vmatmul.mubr.msk.f32.gmra.mrb[40].mxu1 %vm555_vm3, %v9704_v42  ;;  %1877 = vmatprep.mubr.f32.mxu0 %v9207_v35 }
 0x146   : > { %2086 = vmatprep.mubr.f32.mxu1 %v9207_v35 }
 0x148   : > { %6711 = vmatmul.mubr.msk.f32.gmra.mrb[42].mxu0 %vm555_vm3, %v9713_v44 }
 0x149   : > { %6737 = vmatmul.mubr.msk.f32.gmra.mrb[42].mxu1 %vm555_vm3, %v9713_v44  ;;  %1883 = vmatprep.mubr.f32.mxu0 %v9207_v35 }
 0x14a   : > { %2092 = vmatprep.mubr.f32.mxu1 %v9207_v35 }
 0x14c   : > { %6712 = vmatmul.mubr.msk.f32.gmra.mrb[44].mxu0 %vm555_vm3, %v9722_v45 }
 0x14d   : > { %6738 = vmatmul.mubr.msk.f32.gmra.mrb[44].mxu1 %vm555_vm3, %v9722_v45  ;;  %1889 = vmatprep.mubr.f32.mxu0 %v9207_v35 }
 0x14e   : > { %2098 = vmatprep.mubr.f32.mxu1 %v9207_v35 }
 0x150   : > { %6713 = vmatmul.mubr.msk.f32.gmra.mrb[46].mxu0 %vm555_vm3, %v10124_v55 }
 0x151   : > { %6739 = vmatmul.mubr.msk.f32.gmra.mrb[46].mxu1 %vm555_vm3, %v10124_v55  ;;  %2391 = vmatprep.mubr.f32.mxu0 %v9207_v35 }
 0x152   : > { %2600 = vmatprep.mubr.f32.mxu1 %v9207_v35 }
 0x154   : > { %6782 = vmatmul.mubr.msk.f32.vlgmr.msra.gmra.mrb[0].mxu0 %vm555_vm3, %v9513_v15 }
 0x155   : > { %6808 = vmatmul.mubr.msk.f32.vlgmr.msra.gmra.mrb[0].mxu1 %vm555_vm3, %v9513_v15  ;;  %7788 = vmatpush1.bf16.msra.mxu0 %v7787_v63  ;;  %v6929_v15 = vld [vmem:[%s13392_s3 + $0x428] sm:$0xff] }
 0x156   : > { %7798 = vmatpush1.bf16.msra.mxu1 %v7797_v2  ;;  %2397 = vmatprep.mubr.f32.mxu0 %v9207_v35  ;;  %v6957_v63 = vld [vmem:[%s13392_s3 + $0x508] sm:$0xff]  ;;  %v6959_v2 = vld [vmem:[%s13392_s3 + $0x518] sm:$0xff] }
 0x157   : > { %2606 = vmatprep.mubr.f32.mxu1 %v9207_v35  ;;  %7791 = vmatprep.subr.msk.bf16.mxu0 %vm9415_vm2, %v7789_v4  ;;  %v6963_v4 = vld [vmem:[%s13392_s3 + $0x538] sm:$0xff] }
 0x158   : > { %6783 = vmatmul.mubr.msk.f32.gmra.mrb[2].mxu0 %vm555_vm3, %v9536_v19  ;;  %7801 = vmatprep.subr.msk.bf16.mxu1 %vm9415_vm2, %v7799_v7  ;;  %v7821_v7 = vpack.c.bf16 %v6961_v0, %v6957_v63  ;;  %v6992_v63 = vld [vmem:[%s13392_s3 + $0x620] sm:$0xff]  ;;  %v6990_v0 = vld [vmem:[%s13392_s3 + $0x610] sm:$0xff] }
 0x159   : > { %6809 = vmatmul.mubr.msk.f32.gmra.mrb[2].mxu1 %vm555_vm3, %v9536_v19  ;;  %2403 = vmatprep.mubr.f32.mxu0 %v9207_v35  ;;  %v6927_v19 = vld [vmem:[%s13392_s3 + $0x418] sm:$0xff] }
 0x15a   : > { %2612 = vmatprep.mubr.f32.mxu1 %v9207_v35  ;;  %7794 = vmatpush1.bf16.msk.msra.mxu0 %vm9415_vm2, %v7792_v9  ;;  %v6958_v9 = vld [vmem:[%s13392_s3 + $0x510] sm:$0xff] }
 0x15b   : > { %7804 = vmatpush1.bf16.msk.msra.mxu1 %vm9415_vm2, %v7802_v10  ;;  %v7885_v10 = vpack.c.bf16 %v6963_v4, %v6959_v2  ;;  %v6994_v2 = vld [vmem:[%s13392_s3 + $0x630] sm:$0xff]  ;;  %v6997_v4 = vld [vmem:[%s13392_s3 + $0x648] sm:$0xff] }
 0x15c   : > { %6784 = vmatmul.mubr.msk.f32.gmra.mrb[4].mxu0 %vm555_vm3, %v9551_v24 }
 0x15d   : > { %6810 = vmatmul.mubr.msk.f32.gmra.mrb[4].mxu1 %vm555_vm3, %v9551_v24  ;;  %2409 = vmatprep.mubr.f32.mxu0 %v9207_v35  ;;  %v7805_v24 = vpack.c.bf16 %v6929_v15, %v6925_v43  ;;  %v6962_v43 = vld [vmem:[%s13392_s3 + $0x530] sm:$0xff]  ;;  %v6965_v15 = vld [vmem:[%s13392_s3 + $0x548] sm:$0xff] }
 0x15e   : > { %2618 = vmatprep.mubr.f32.mxu1 %v9207_v35 }
 0x15f   : > { %7806 = vmatprep.subr.bf16.mxu0 %v7805_v24  ;;  %v6836_v24 = vld [vmem:[%s9461_s16 + $0x40] sm:$0xff] }
 0x160   : > { %6785 = vmatmul.mubr.msk.f32.gmra.mrb[6].mxu0 %vm555_vm3, %v9560_v25 }
 0x161   : > { %6811 = vmatmul.mubr.msk.f32.gmra.mrb[6].mxu1 %vm555_vm3, %v9560_v25  ;;  %2415 = vmatprep.mubr.f32.mxu0 %v9207_v35  ;;  %v6931_v25 = vld [vmem:[%s13392_s3 + $0x438] sm:$0xff] }
 0x162   : > { %2624 = vmatprep.mubr.f32.mxu1 %v9207_v35 }
 0x164   : > { %6786 = vmatmul.mubr.msk.f32.gmra.mrb[8].mxu0 %vm555_vm3, %v9569_v26 }
 0x165   : > { %6812 = vmatmul.mubr.msk.f32.gmra.mrb[8].mxu1 %vm555_vm3, %v9569_v26  ;;  %2421 = vmatprep.mubr.f32.mxu0 %v9207_v35  ;;  %v7869_v26 = vpack.c.bf16 %v6931_v25, %v6927_v19  ;;  %v6969_v19 = vld [vmem:[%s13392_s3 + $0x568] sm:$0xff]  ;;  %v6967_v25 = vld [vmem:[%s13392_s3 + $0x558] sm:$0xff] }
 0x166   : > { %2630 = vmatprep.mubr.f32.mxu1 %v9207_v35 }
 0x167   : > { %7870 = vmatprep.subr.bf16.mxu1 %v7869_v26  ;;  %v6971_v26 = vld [vmem:[%s13392_s3 + $0x578] sm:$0xff] }
 0x168   : > { %6787 = vmatmul.mubr.msk.f32.gmra.mrb[10].mxu0 %vm555_vm3, %v9578_v27 }
 0x169   : > { %6813 = vmatmul.mubr.msk.f32.gmra.mrb[10].mxu1 %vm555_vm3, %v9578_v27  ;;  %2427 = vmatprep.mubr.f32.mxu0 %v9207_v35  ;;  %v10327_v27 = vld [vmem:[%s9461_s16 + $0xd0] sm:$0xff] }
 0x16a   : > { %2636 = vmatprep.mubr.f32.mxu1 %v9207_v35 }
 0x16c   : > { %6788 = vmatmul.mubr.msk.f32.gmra.mrb[12].mxu0 %vm555_vm3, %v9587_v28 }
 0x16d   : > { %6814 = vmatmul.mubr.msk.f32.gmra.mrb[12].mxu1 %vm555_vm3, %v9587_v28  ;;  %2433 = vmatprep.mubr.f32.mxu0 %v9207_v35  ;;  %v6924_v28 = vld [vmem:[%s13392_s3 + $0x400] sm:$0xff] }
 0x16e   : > { %2642 = vmatprep.mubr.f32.mxu1 %v9207_v35 }
 0x170   : > { %6789 = vmatmul.mubr.msk.f32.gmra.mrb[14].mxu0 %vm555_vm3, %v9596_v29 }
 0x171   : > { %6815 = vmatmul.mubr.msk.f32.gmra.mrb[14].mxu1 %vm555_vm3, %v9596_v29  ;;  %2439 = vmatprep.mubr.f32.mxu0 %v9207_v35  ;;  %v6928_v29 = vld [vmem:[%s13392_s3 + $0x420] sm:$0xff] }
 0x172   : > { %2648 = vmatprep.mubr.f32.mxu1 %v9207_v35 }
 0x174   : > { %6790 = vmatmul.mubr.msk.f32.gmra.mrb[16].mxu0 %vm555_vm3, %v9605_v30 }
 0x175   : > { %6816 = vmatmul.mubr.msk.f32.gmra.mrb[16].mxu1 %vm555_vm3, %v9605_v30  ;;  %2445 = vmatprep.mubr.f32.mxu0 %v9207_v35  ;;  %v6926_v30 = vld [vmem:[%s13392_s3 + $0x410] sm:$0xff] }
 0x176   : > { %2654 = vmatprep.mubr.f32.mxu1 %v9207_v35 }
 0x178   : > { %6791 = vmatmul.mubr.msk.f32.gmra.mrb[18].mxu0 %vm555_vm3, %v9614_v31 }
 0x179   : > { %6817 = vmatmul.mubr.msk.f32.gmra.mrb[18].mxu1 %vm555_vm3, %v9614_v31  ;;  %2451 = vmatprep.mubr.f32.mxu0 %v9207_v35  ;;  %v6930_v31 = vld [vmem:[%s13392_s3 + $0x430] sm:$0xff] }
 0x17a   : > { %2660 = vmatprep.mubr.f32.mxu1 %v9207_v35 }
 0x17c   : > { %6792 = vmatmul.mubr.msk.f32.gmra.mrb[20].mxu0 %vm555_vm3, %v9623_v32 }
 0x17d   : > { %6818 = vmatmul.mubr.msk.f32.gmra.mrb[20].mxu1 %vm555_vm3, %v9623_v32  ;;  %2457 = vmatprep.mubr.f32.mxu0 %v9207_v35  ;;  %v6933_v32 = vld [vmem:[%s13392_s3 + $0x448] sm:$0xff] }
 0x17e   : > { %2666 = vmatprep.mubr.f32.mxu1 %v9207_v35 }
 0x180   : > { %6793 = vmatmul.mubr.msk.f32.gmra.mrb[22].mxu0 %vm555_vm3, %v9632_v33 }
 0x181   : > { %6819 = vmatmul.mubr.msk.f32.gmra.mrb[22].mxu1 %vm555_vm3, %v9632_v33  ;;  %2463 = vmatprep.mubr.f32.mxu0 %v9207_v35  ;;  %v6937_v33 = vld [vmem:[%s13392_s3 + $0x468] sm:$0xff] }
 0x182   : > { %2672 = vmatprep.mubr.f32.mxu1 %v9207_v35 }
 0x184   : > { %6794 = vmatmul.mubr.msk.f32.gmra.mrb[24].mxu0 %vm555_vm3, %v9641_v34 }
 0x185   : > { %6820 = vmatmul.mubr.msk.f32.gmra.mrb[24].mxu1 %vm555_vm3, %v9641_v34  ;;  %2469 = vmatprep.mubr.f32.mxu0 %v9207_v35  ;;  %v6832_v34 = vld [vmem:[%s9461_s16 + $0x20] sm:$0xff] }
 0x186   : > { %2678 = vmatprep.mubr.f32.mxu1 %v9207_v35 }
 0x188   : > { %6795 = vmatmul.mubr.msk.f32.gmra.mrb[26].mxu0 %vm555_vm3, %v9650_v36 }
 0x189   : > { %6821 = vmatmul.mubr.msk.f32.gmra.mrb[26].mxu1 %vm555_vm3, %v9650_v36  ;;  %2475 = vmatprep.mubr.f32.mxu0 %v9207_v35  ;;  %v6935_v36 = vld [vmem:[%s13392_s3 + $0x458] sm:$0xff] }
 0x18a   : > { %2684 = vmatprep.mubr.f32.mxu1 %v9207_v35 }
 0x18c   : > { %6796 = vmatmul.mubr.msk.f32.gmra.mrb[28].mxu0 %vm555_vm3, %v9659_v37 }
 0x18d   : > { %6822 = vmatmul.mubr.msk.f32.gmra.mrb[28].mxu1 %vm555_vm3, %v9659_v37  ;;  %2481 = vmatprep.mubr.f32.mxu0 %v9207_v35  ;;  %v6939_v37 = vld [vmem:[%s13392_s3 + $0x478] sm:$0xff] }
 0x18e   : > { %2690 = vmatprep.mubr.f32.mxu1 %v9207_v35 }
 0x190   : > { %6797 = vmatmul.mubr.msk.f32.gmra.mrb[30].mxu0 %vm555_vm3, %v9668_v38 }
 0x191   : > { %6823 = vmatmul.mubr.msk.f32.gmra.mrb[30].mxu1 %vm555_vm3, %v9668_v38  ;;  %2487 = vmatprep.mubr.f32.mxu0 %v9207_v35  ;;  %v7807_v38 = vpack.c.bf16 %v6928_v29, %v6924_v28  ;;  %v7823_v28 = vpack.c.bf16 %v6960_v61, %v6956_v8  ;;  %v7887_v29 = vpack.c.bf16 %v6962_v43, %v6958_v9  ;;  %v7003_v8 = vld [vmem:[%s13392_s3 + $0x678] sm:$0xff]  ;;  %v6996_v43 = vld [vmem:[%s13392_s3 + $0x640] sm:$0xff] }
 0x192   : > { %2696 = vmatprep.mubr.f32.mxu1 %v9207_v35  ;;  %v7839_v61 = vpack.c.bf16 %v6992_v63, %v6988_v62  ;;  %v7903_v9 = vpack.c.bf16 %v6994_v2, %v6990_v0  ;;  %v6852_v62 = vld [vmem:[%s9461_s16 + $0xc0] sm:$0xff]  ;;  %v7026_v2 = vld [vmem:[%s13392_s3 + $0x730] sm:$0xff] }
 0x193   : > { %v7020_v63 = vld [vmem:[%s13392_s3 + $0x700] sm:$0xff] }
 0x194   : > { %6798 = vmatmul.mubr.msk.f32.gmra.mrb[32].mxu0 %vm555_vm3, %v9677_v39  ;;  %v7024_v0 = vld [vmem:[%s13392_s3 + $0x720] sm:$0xff] }
 0x195   : > { %6824 = vmatmul.mubr.msk.f32.gmra.mrb[32].mxu1 %vm555_vm3, %v9677_v39  ;;  %2493 = vmatprep.mubr.f32.mxu0 %v9207_v35  ;;  %v7871_v39 = vpack.c.bf16 %v6930_v31, %v6926_v30  ;;  %v7825_v30 = vpack.c.bf16 %v6969_v19, %v6965_v15  ;;  %v6964_v31 = vld [vmem:[%s13392_s3 + $0x540] sm:$0xff]  ;;  %v6998_v19 = vld [vmem:[%s13392_s3 + $0x650] sm:$0xff] }
 0x196   : > { %2702 = vmatprep.mubr.f32.mxu1 %v9207_v35  ;;  %v7000_v15 = vld [vmem:[%s13392_s3 + $0x660] sm:$0xff] }
 0x198   : > { %6799 = vmatmul.mubr.msk.f32.gmra.mrb[34].mxu0 %vm555_vm3, %v9686_v40 }
 0x199   : > { %6825 = vmatmul.mubr.msk.f32.gmra.mrb[34].mxu1 %vm555_vm3, %v9686_v40  ;;  %2499 = vmatprep.mubr.f32.mxu0 %v9207_v35  ;;  %v7809_v40 = vpack.c.bf16 %v6937_v33, %v6933_v32  ;;  %v6968_v32 = vld [vmem:[%s13392_s3 + $0x560] sm:$0xff]  ;;  %v6966_v33 = vld [vmem:[%s13392_s3 + $0x550] sm:$0xff] }
 0x19a   : > { %2708 = vmatprep.mubr.f32.mxu1 %v9207_v35 }
 0x19c   : > { %6800 = vmatmul.mubr.msk.f32.gmra.mrb[36].mxu0 %vm555_vm3, %v9695_v41 }
 0x19d   : > { %6826 = vmatmul.mubr.msk.f32.gmra.mrb[36].mxu1 %vm555_vm3, %v9695_v41  ;;  %2505 = vmatprep.mubr.f32.mxu0 %v9207_v35  ;;  %v6932_v41 = vld [vmem:[%s13392_s3 + $0x440] sm:$0xff] }
 0x19e   : > { %2714 = vmatprep.mubr.f32.mxu1 %v9207_v35 }
 0x1a0   : > { %6801 = vmatmul.mubr.msk.f32.gmra.mrb[38].mxu0 %vm555_vm3, %v9704_v42 }
 0x1a1   : > { %6827 = vmatmul.mubr.msk.f32.gmra.mrb[38].mxu1 %vm555_vm3, %v9704_v42  ;;  %2511 = vmatprep.mubr.f32.mxu0 %v9207_v35  ;;  %v6936_v42 = vld [vmem:[%s13392_s3 + $0x460] sm:$0xff] }
 0x1a2   : > { %2720 = vmatprep.mubr.f32.mxu1 %v9207_v35  ;;  %v7811_v18 = vpack.c.bf16 %v6936_v42, %v6932_v41  ;;  %v6979_v41 = vld [vmem:[%s13392_s3 + $0x5b8] sm:$0xff]  ;;  %v7827_v42 = vpack.c.bf16 %v6968_v32, %v6964_v31  ;;  %v7843_v32 = vpack.c.bf16 %v7000_v15, %v6996_v43 }
 0x1a3   : > { %v7011_v31 = vld [vmem:[%s13392_s3 + $0x6b8] sm:$0xff] }
 0x1a4   : > { %6802 = vmatmul.mubr.msk.f32.gmra.mrb[40].mxu0 %vm555_vm3, %v9713_v44 }
 0x1a5   : > { %6828 = vmatmul.mubr.msk.f32.gmra.mrb[40].mxu1 %vm555_vm3, %v9713_v44  ;;  %2517 = vmatprep.mubr.f32.mxu0 %v9207_v35  ;;  %v6934_v44 = vld [vmem:[%s13392_s3 + $0x450] sm:$0xff] }
 0x1a6   : > { %2726 = vmatprep.mubr.f32.mxu1 %v9207_v35  ;;  %v7875_v20 = vpack.c.bf16 %v6938_v11, %v6934_v44  ;;  %v6972_v11 = vld [vmem:[%s13392_s3 + $0x580] sm:$0xff] }
 0x1a7   : > { %v7831_v23 = vpack.c.bf16 %v6976_v12, %v6972_v11  ;;  %v7019_v11 = vld [vmem:[%s13392_s3 + $0x6f8] sm:$0xff] }
 0x1a8   : > { %6803 = vmatmul.mubr.msk.f32.gmra.mrb[42].mxu0 %vm555_vm3, %v9722_v45 }
 0x1a9   : > { %6829 = vmatmul.mubr.msk.f32.gmra.mrb[42].mxu1 %vm555_vm3, %v9722_v45  ;;  %2523 = vmatprep.mubr.f32.mxu0 %v9207_v35  ;;  %v7873_v45 = vpack.c.bf16 %v6939_v37, %v6935_v36  ;;  %v6970_v36 = vld [vmem:[%s13392_s3 + $0x570] sm:$0xff]  ;;  %v6973_v37 = vld [vmem:[%s13392_s3 + $0x588] sm:$0xff] }
 0x1aa   : > { %2732 = vmatprep.mubr.f32.mxu1 %v9207_v35  ;;  %v7891_v44 = vpack.c.bf16 %v6970_v36, %v6966_v33  ;;  %v7004_v36 = vld [vmem:[%s13392_s3 + $0x680] sm:$0xff] }
 0x1ac   : > { %6804 = vmatmul.mubr.msk.f32.gmra.mrb[44].mxu0 %vm555_vm3, %v10124_v55 }
 0x1ad   : > { %6830 = vmatmul.mubr.msk.f32.gmra.mrb[44].mxu1 %vm555_vm3, %v10124_v55  ;;  %2529 = vmatprep.mubr.f32.mxu0 %v9207_v35 }
 0x1ae   : > { %2738 = vmatprep.mubr.f32.mxu1 %v9207_v35 }
 0x1b0   : > { %6805 = vmatmul.mubr.msk.f32.gmra.mrb[46].mxu0 %vm555_vm3, %v10327_v27 }
 0x1b1   : > { %6831 = vmatmul.mubr.msk.f32.gmra.mrb[46].mxu1 %vm555_vm3, %v10327_v27  ;;  %3031 = vmatprep.mubr.f32.mxu0 %v9207_v35 }
 0x1b2   : > { %3240 = vmatprep.mubr.f32.mxu1 %v9207_v35 }
 0x1b4   : > { %6874 = vmatmul.mubr.msk.f32.vlgmr.msra.gmra.mrb[0].mxu0 %vm555_vm3, %v6832_v34 }
 0x1b5   : > { %6900 = vmatmul.mubr.msk.f32.vlgmr.msra.gmra.mrb[0].mxu1 %vm555_vm3, %v6832_v34  ;;  %3037 = vmatprep.mubr.f32.mxu0 %v9207_v35  ;;  %v7889_v34 = vpack.c.bf16 %v6971_v26, %v6967_v25  ;;  %v7002_v25 = vld [vmem:[%s13392_s3 + $0x670] sm:$0xff]  ;;  %v7005_v26 = vld [vmem:[%s13392_s3 + $0x688] sm:$0xff] }
 0x1b6   : > { %3246 = vmatprep.mubr.f32.mxu1 %v9207_v35  ;;  %7808 = vmatpush1.bf16.msra.mxu0 %v7807_v38  ;;  %v6977_v38 = vld [vmem:[%s13392_s3 + $0x5a8] sm:$0xff]  ;;  %v7907_v33 = vpack.c.bf16 %v7002_v25, %v6998_v19  ;;  %v7030_v19 = vld [vmem:[%s13392_s3 + $0x750] sm:$0xff] }
 0x1b7   : > { %7872 = vmatpush1.bf16.msra.mxu1 %v7871_v39  ;;  %7810 = vmatprep.subr.bf16.mxu0 %v7809_v40  ;;  %v6837_v39 = vld [vmem:[%s9461_s16 + $0x48] sm:$0xff]  ;;  %v6975_v40 = vld [vmem:[%s13392_s3 + $0x598] sm:$0xff] }
 0x1b8   : > { %6875 = vmatmul.mubr.msk.f32.gmra.mrb[2].mxu0 %vm555_vm3, %v6833_v14  ;;  %7874 = vmatprep.subr.bf16.mxu1 %v7873_v45  ;;  %v7829_v45 = vpack.c.bf16 %v6977_v38, %v6973_v37  ;;  %v7008_v37 = vld [vmem:[%s13392_s3 + $0x6a0] sm:$0xff]  ;;  %v7006_v38 = vld [vmem:[%s13392_s3 + $0x690] sm:$0xff] }
 0x1b9   : > { %6901 = vmatmul.mubr.msk.f32.gmra.mrb[2].mxu1 %vm555_vm3, %v6833_v14  ;;  %3043 = vmatprep.mubr.f32.mxu0 %v9207_v35  ;;  %v7893_v14 = vpack.c.bf16 %v6979_v41, %v6975_v40  ;;  %v7010_v40 = vld [vmem:[%s13392_s3 + $0x6b0] sm:$0xff]  ;;  %v7013_v41 = vld [vmem:[%s13392_s3 + $0x6c8] sm:$0xff]  ;;  %v7847_v12 = vpack.c.bf16 %v7008_v37, %v7004_v36 }
 0x1ba   : > { %3252 = vmatprep.mubr.f32.mxu1 %v9207_v35  ;;  %7812 = vmatpush1.bf16.msra.mxu0 %v7811_v18  ;;  %v6985_v18 = vld [vmem:[%s13392_s3 + $0x5e8] sm:$0xff]  ;;  %v7911_v13 = vpack.c.bf16 %v7010_v40, %v7006_v38  ;;  %v7038_v37 = vld [vmem:[%s13392_s3 + $0x790] sm:$0xff] }
 0x1bb   : > { %7876 = vmatpush1.bf16.msra.mxu1 %v7875_v20  ;;  %7814 = vmatprep.subr.bf16.mxu0 %v7813_v21  ;;  %v6838_v20 = vld [vmem:[%s9461_s16 + $0x50] sm:$0xff]  ;;  %v6983_v21 = vld [vmem:[%s13392_s3 + $0x5d8] sm:$0xff]  ;;  %v7045_v40 = vld [vmem:[%s13392_s3 + $0x7c8] sm:$0xff] }
 0x1bc   : > { %6876 = vmatmul.mubr.msk.f32.gmra.mrb[4].mxu0 %vm555_vm3, %v6834_v51  ;;  %7878 = vmatprep.subr.bf16.mxu1 %v7877_v47  ;;  %v7833_v47 = vpack.c.bf16 %v6985_v18, %v6981_v17  ;;  %v7016_v17 = vld [vmem:[%s13392_s3 + $0x6e0] sm:$0xff]  ;;  %v7014_v18 = vld [vmem:[%s13392_s3 + $0x6d0] sm:$0xff] }
 0x1bd   : > { %6902 = vmatmul.mubr.msk.f32.gmra.mrb[4].mxu1 %vm555_vm3, %v6834_v51  ;;  %3049 = vmatprep.mubr.f32.mxu0 %v9207_v35  ;;  %v7897_v51 = vpack.c.bf16 %v6987_v22, %v6983_v21  ;;  %v7018_v21 = vld [vmem:[%s13392_s3 + $0x6f0] sm:$0xff]  ;;  %v7021_v22 = vld [vmem:[%s13392_s3 + $0x708] sm:$0xff]  ;;  %v7851_v49 = vpack.c.bf16 %v7016_v17, %v7012_v16 }
 0x1be   : > { %3258 = vmatprep.mubr.f32.mxu1 %v9207_v35  ;;  %7816 = vmatpush1.bf16.msra.mxu0 %v7815_v3  ;;  %v6993_v3 = vld [vmem:[%s13392_s3 + $0x628] sm:$0xff]  ;;  %v7915_v50 = vpack.c.bf16 %v7018_v21, %v7014_v18  ;;  %v7042_v38 = vld [vmem:[%s13392_s3 + $0x7b0] sm:$0xff] }
 0x1bf   : > { %7880 = vmatpush1.bf16.msra.mxu1 %v7879_v54  ;;  %7818 = vmatprep.subr.bf16.mxu0 %v7817_v56  ;;  %v6839_v54 = vld [vmem:[%s9461_s16 + $0x58] sm:$0xff]  ;;  %v7046_v16 = vld [vmem:[%s13392_s3 + $0x7d0] sm:$0xff]  ;;  %v3836_v21 = vld [vmem:[%s13392_s3 + $0x28] sm:$0xff] }
 0x1c0   : > { %6877 = vmatmul.mubr.msk.f32.gmra.mrb[6].mxu0 %vm555_vm3, %v6835_v1  ;;  %7882 = vmatprep.subr.bf16.mxu1 %v7881_v60  ;;  %v6991_v56 = vld [vmem:[%s13392_s3 + $0x618] sm:$0xff]  ;;  %v7837_v60 = vpack.c.bf16 %v6993_v3, %v6989_v53  ;;  %v6844_v53 = vld [vmem:[%s9461_s16 + $0x80] sm:$0xff]  ;;  %v6845_v3 = vld [vmem:[%s9461_s16 + $0x88] sm:$0xff] }
 0x1c1   : > { %6903 = vmatmul.mubr.msk.f32.gmra.mrb[6].mxu1 %vm555_vm3, %v6835_v1  ;;  %3055 = vmatprep.mubr.f32.mxu0 %v9207_v35  ;;  %v7901_v1 = vpack.c.bf16 %v6995_v57, %v6991_v56  ;;  %v6847_v56 = vld [vmem:[%s9461_s16 + $0x98] sm:$0xff]  ;;  %v6848_v57 = vld [vmem:[%s9461_s16 + $0xa0] sm:$0xff]  ;;  %v7050_v17 = vld [vmem:[%s13392_s3 + $0x7f0] sm:$0xff] }
 0x1c2   : > { %3264 = vmatprep.mubr.f32.mxu1 %v9207_v35  ;;  %7820 = vmatpush1.bf16.msra.mxu0 %v7819_v5  ;;  %v7001_v5 = vld [vmem:[%s13392_s3 + $0x668] sm:$0xff]  ;;  %v7931_v18 = vpack.c.bf16 %v7050_v17, %v7046_v16 }
 0x1c3   : > { %7884 = vmatpush1.bf16.msra.mxu1 %v7883_v6  ;;  %7822 = vmatprep.subr.bf16.mxu0 %v7821_v7  ;;  %v6840_v6 = vld [vmem:[%s9461_s16 + $0x60] sm:$0xff]  ;;  %v6999_v7 = vld [vmem:[%s13392_s3 + $0x658] sm:$0xff] }
 0x1c4   : > { %6878 = vmatmul.mubr.msk.f32.gmra.mrb[8].mxu0 %vm555_vm3, %v6836_v24  ;;  %7886 = vmatprep.subr.bf16.mxu1 %v7885_v10  ;;  %v7841_v10 = vpack.c.bf16 %v7001_v5, %v6997_v4  ;;  %v6855_v4 = vld [vmem:[%s9461_s16 + $0xd8] sm:$0xff] }
 0x1c5   : > { %6904 = vmatmul.mubr.msk.f32.gmra.mrb[8].mxu1 %vm555_vm3, %v6836_v24  ;;  %3061 = vmatprep.mubr.f32.mxu0 %v9207_v35  ;;  %v7905_v24 = vpack.c.bf16 %v7003_v8, %v6999_v7  ;;  %v7033_v7 = vld [vmem:[%s13392_s3 + $0x768] sm:$0xff] }
 0x1c6   : > { %3270 = vmatprep.mubr.f32.mxu1 %v9207_v35  ;;  %7824 = vmatpush1.bf16.msra.mxu0 %v7823_v28  ;;  %v7009_v28 = vld [vmem:[%s13392_s3 + $0x6a8] sm:$0xff] }
 0x1c7   : > { %7888 = vmatpush1.bf16.msra.mxu1 %v7887_v29  ;;  %7826 = vmatprep.subr.bf16.mxu0 %v7825_v30  ;;  %v6841_v29 = vld [vmem:[%s9461_s16 + $0x68] sm:$0xff]  ;;  %v7007_v30 = vld [vmem:[%s13392_s3 + $0x698] sm:$0xff] }
 0x1c8   : > { %6879 = vmatmul.mubr.msk.f32.gmra.mrb[10].mxu0 %vm555_vm3, %v6837_v39  ;;  %7890 = vmatprep.subr.bf16.mxu1 %v7889_v34  ;;  %v7845_v34 = vpack.c.bf16 %v7009_v28, %v7005_v26  ;;  %v7037_v26 = vld [vmem:[%s13392_s3 + $0x788] sm:$0xff] }
 0x1c9   : > { %6905 = vmatmul.mubr.msk.f32.gmra.mrb[10].mxu1 %vm555_vm3, %v6837_v39  ;;  %3067 = vmatprep.mubr.f32.mxu0 %v9207_v35  ;;  %v7909_v39 = vpack.c.bf16 %v7011_v31, %v7007_v30  ;;  %v7041_v28 = vld [vmem:[%s13392_s3 + $0x7a8] sm:$0xff]  ;;  %v7043_v31 = vld [vmem:[%s13392_s3 + $0x7b8] sm:$0xff] }
 0x1ca   : > { %3276 = vmatprep.mubr.f32.mxu1 %v9207_v35  ;;  %7828 = vmatpush1.bf16.msra.mxu0 %v7827_v42  ;;  %v7017_v42 = vld [vmem:[%s13392_s3 + $0x6e8] sm:$0xff]  ;;  %v7861_v30 = vpack.c.bf16 %v7041_v28, %v7037_v26 }
 0x1cb   : > { %7892 = vmatpush1.bf16.msra.mxu1 %v7891_v44  ;;  %7830 = vmatprep.subr.bf16.mxu0 %v7829_v45  ;;  %v6842_v44 = vld [vmem:[%s9461_s16 + $0x70] sm:$0xff]  ;;  %v7015_v45 = vld [vmem:[%s13392_s3 + $0x6d8] sm:$0xff] }
 0x1cc   : > { %6880 = vmatmul.mubr.msk.f32.gmra.mrb[12].mxu0 %vm555_vm3, %v6838_v20  ;;  %7894 = vmatprep.subr.bf16.mxu1 %v7893_v14  ;;  %v7849_v14 = vpack.c.bf16 %v7017_v42, %v7013_v41  ;;  %v7049_v41 = vld [vmem:[%s13392_s3 + $0x7e8] sm:$0xff]  ;;  %v7047_v42 = vld [vmem:[%s13392_s3 + $0x7d8] sm:$0xff] }
 0x1cd   : > { %6906 = vmatmul.mubr.msk.f32.gmra.mrb[12].mxu1 %vm555_vm3, %v6838_v20  ;;  %3073 = vmatprep.mubr.f32.mxu0 %v9207_v35  ;;  %v7913_v20 = vpack.c.bf16 %v7019_v11, %v7015_v45  ;;  %v7051_v45 = vld [vmem:[%s13392_s3 + $0x7f8] sm:$0xff]  ;;  %v7044_v11 = vld [vmem:[%s13392_s3 + $0x7c0] sm:$0xff] }
 0x1ce   : > { %3282 = vmatprep.mubr.f32.mxu1 %v9207_v35  ;;  %7832 = vmatpush1.bf16.msra.mxu0 %v7831_v23  ;;  %v7025_v23 = vld [vmem:[%s13392_s3 + $0x728] sm:$0xff] }
 0x1cf   : > { %7896 = vmatpush1.bf16.msra.mxu1 %v7895_v46  ;;  %7834 = vmatprep.subr.bf16.mxu0 %v7833_v47  ;;  %v6843_v46 = vld [vmem:[%s9461_s16 + $0x78] sm:$0xff] }
 0x1d0   : > { %6881 = vmatmul.mubr.msk.f32.gmra.mrb[14].mxu0 %vm555_vm3, %v6839_v54  ;;  %7898 = vmatprep.subr.bf16.mxu1 %v7897_v51  ;;  %v7023_v47 = vld [vmem:[%s13392_s3 + $0x718] sm:$0xff]  ;;  %v7853_v51 = vpack.c.bf16 %v7025_v23, %v7021_v22 }
 0x1d1   : > { %6907 = vmatmul.mubr.msk.f32.gmra.mrb[14].mxu1 %vm555_vm3, %v6839_v54  ;;  %3079 = vmatprep.mubr.f32.mxu0 %v9207_v35  ;;  %v7917_v52 = vpack.c.bf16 %v7027_v48, %v7023_v47  ;;  %v6846_v54 = vld [vmem:[%s9461_s16 + $0x90] sm:$0xff]  ;;  %v3834_v22 = vld [vmem:[%s13392_s3 + $0x18] sm:$0xff]  ;;  %v3483_v48 = vlaneseq }
 0x1d2   : > { %3288 = vmatprep.mubr.f32.mxu1 %v9207_v35  ;;  %7836 = vmatpush1.bf16.msra.mxu0 %v7835_v58  ;;  %v6849_v58 = vld [vmem:[%s9461_s16 + $0xa8] sm:$0xff] }
 0x1d3   : > { %7900 = vmatpush1.bf16.msra.mxu1 %v7899_v59  ;;  %7838 = vmatprep.subr.bf16.mxu0 %v7837_v60  ;;  %v6850_v59 = vld [vmem:[%s9461_s16 + $0xb0] sm:$0xff]  ;;  %v6851_v60 = vld [vmem:[%s9461_s16 + $0xb8] sm:$0xff]  ;;  %s13344_s16 = scalar_lea.hbm %s13398_s9, %s7537_s26 }
 0x1d4   : > { %6882 = vmatmul.mubr.msk.f32.gmra.mrb[16].mxu0 %vm555_vm3, %v6840_v6  ;;  %7902 = vmatprep.subr.bf16.mxu1 %v7901_v1  ;;  %v7022_v1 = vld [vmem:[%s13392_s3 + $0x710] sm:$0xff] }
 0x1d5   : > { %6908 = vmatmul.mubr.msk.f32.gmra.mrb[16].mxu1 %vm555_vm3, %v6840_v6  ;;  %3085 = vmatprep.mubr.f32.mxu0 %v9207_v35  ;;  %v7919_v5 = vpack.c.bf16 %v7026_v2, %v7022_v1  ;;  %v7029_v6 = vld [vmem:[%s13392_s3 + $0x748] sm:$0xff] }
 0x1d6   : > { %3294 = vmatprep.mubr.f32.mxu1 %v9207_v35  ;;  %7840 = vmatpush1.bf16.msra.mxu0 %v7839_v61  ;;  %v7857_v8 = vpack.c.bf16 %v7033_v7, %v7029_v6  ;;  %v7035_v61 = vld [vmem:[%s13392_s3 + $0x778] sm:$0xff] }
 0x1d7   : > { %7904 = vmatpush1.bf16.msra.mxu1 %v7903_v9  ;;  %7842 = vmatprep.subr.bf16.mxu0 %v7841_v10  ;;  %v7028_v9 = vld [vmem:[%s13392_s3 + $0x740] sm:$0xff] }
 0x1d8   : > { %6883 = vmatmul.mubr.msk.f32.gmra.mrb[18].mxu0 %vm555_vm3, %v6841_v29  ;;  %7906 = vmatprep.subr.bf16.mxu1 %v7905_v24  ;;  %v7032_v10 = vld [vmem:[%s13392_s3 + $0x760] sm:$0xff]  ;;  %v7034_v24 = vld [vmem:[%s13392_s3 + $0x770] sm:$0xff] }
 0x1d9   : > { %6909 = vmatmul.mubr.msk.f32.gmra.mrb[18].mxu1 %vm555_vm3, %v6841_v29  ;;  %3091 = vmatprep.mubr.f32.mxu0 %v9207_v35  ;;  %v7859_v15 = vpack.c.bf16 %v7032_v10, %v7028_v9  ;;  %v7923_v25 = vpack.c.bf16 %v7034_v24, %v7030_v19  ;;  %v7039_v29 = vld [vmem:[%s13392_s3 + $0x798] sm:$0xff] }
 0x1da   : > { %3300 = vmatprep.mubr.f32.mxu1 %v9207_v35  ;;  %7844 = vmatpush1.bf16.msra.mxu0 %v7843_v32  ;;  %v7036_v32 = vld [vmem:[%s13392_s3 + $0x780] sm:$0xff] }
 0x1db   : > { %7908 = vmatpush1.bf16.msra.mxu1 %v7907_v33  ;;  %7846 = vmatprep.subr.bf16.mxu0 %v7845_v34  ;;  %v7040_v33 = vld [vmem:[%s13392_s3 + $0x7a0] sm:$0xff]  ;;  %v7925_v34 = vpack.c.bf16 %v7043_v31, %v7039_v29 }
 0x1dc   : > { %6884 = vmatmul.mubr.msk.f32.gmra.mrb[20].mxu0 %vm555_vm3, %v6842_v44  ;;  %7910 = vmatprep.subr.bf16.mxu1 %v7909_v39  ;;  %v7863_v36 = vpack.c.bf16 %v7040_v33, %v7036_v32  ;;  %v7927_v39 = vpack.c.bf16 %v7042_v38, %v7038_v37 }
 0x1dd   : > { %6910 = vmatmul.mubr.msk.f32.gmra.mrb[20].mxu1 %vm555_vm3, %v6842_v44  ;;  %3097 = vmatprep.mubr.f32.mxu0 %v9207_v35  ;;  %v7865_v44 = vpack.c.bf16 %v7049_v41, %v7045_v40 }
 0x1de   : > { %3306 = vmatprep.mubr.f32.mxu1 %v9207_v35  ;;  %7848 = vmatpush1.bf16.msra.mxu0 %v7847_v12  ;;  %v7048_v12 = vld [vmem:[%s13392_s3 + $0x7e0] sm:$0xff] }
 0x1df   : > { %7912 = vmatpush1.bf16.msra.mxu1 %v7911_v13  ;;  %7850 = vmatprep.subr.bf16.mxu0 %v7849_v14  ;;  %v7929_v13 = vpack.c.bf16 %v7051_v45, %v7047_v42  ;;  %v7867_v14 = vpack.c.bf16 %v7048_v12, %v7044_v11 }
 0x1e0   : > { %6885 = vmatmul.mubr.msk.f32.gmra.mrb[22].mxu0 %vm555_vm3, %v6843_v46  ;;  %7914 = vmatprep.subr.bf16.mxu1 %v7913_v20  ;;  %v3832_v20 = vld [vmem:[%s13392_s3 + $0x8] sm:$0xff] }
 0x1e1   : > { %6911 = vmatmul.mubr.msk.f32.gmra.mrb[22].mxu1 %vm555_vm3, %v6843_v46  ;;  %3103 = vmatprep.mubr.f32.mxu0 %v9207_v35  ;;  %v7933_v23 = vpack.c.bf16 %v3836_v21, %v3832_v20  ;;  %v3838_v46 = vld [vmem:[%s13392_s3 + $0x38] sm:$0xff]  ;;  %v3835_v21 = vld [vmem:[%s13392_s3 + $0x20] sm:$0xff] }
 0x1e2   : > { %3312 = vmatprep.mubr.f32.mxu1 %v9207_v35  ;;  %7852 = vmatpush1.bf16.msra.mxu0 %v7851_v49  ;;  %v7997_v47 = vpack.c.bf16 %v3838_v46, %v3834_v22  ;;  %v10840_v49 = vshrl.u32 %v3483_v48, 7  ;;  %v3833_v22 = vld [vmem:[%s13392_s3 + $0x10] sm:$0xff] }
 0x1e3   : > { %7916 = vmatpush1.bf16.msra.mxu1 %v7915_v50  ;;  %7854 = vmatprep.subr.bf16.mxu0 %v7853_v51  ;;  %v3481_v51 = vld [vmem:[%s13391_s2] sm:$0xf] }
 0x1e4   : > { %6886 = vmatmul.mubr.msk.f32.gmra.mrb[24].mxu0 %vm555_vm3, %v6844_v53  ;;  %7918 = vmatprep.subr.bf16.mxu1 %v7917_v52  ;;  %v3485_v50 = vsub.s32 0, %v10840_v49  ;;  %v3493_v52 = vsub.s32 2, %v10840_v49 }
 0x1e5   : > { %6912 = vmatmul.mubr.msk.f32.gmra.mrb[24].mxu1 %vm555_vm3, %v6844_v53  ;;  %3109 = vmatprep.mubr.f32.mxu0 %v9207_v35  ;;  %v3489_v53 = vsub.s32 1, %v10840_v49 }
 0x1e6   : > { %3318 = vmatprep.mubr.f32.mxu1 %v9207_v35 }
 0x1e7   : > { %7920 = vmatpush1.bf16.msra.mxu1 %v7919_v5 }
 0x1e8   : > { %6887 = vmatmul.mubr.msk.f32.gmra.mrb[26].mxu0 %vm555_vm3, %v6845_v3 }
 0x1e9   : > { %6913 = vmatmul.mubr.msk.f32.gmra.mrb[26].mxu1 %vm555_vm3, %v6845_v3  ;;  %3115 = vmatprep.mubr.f32.mxu0 %v9207_v35  ;;  %v3497_v3 = vsub.s32 3, %v10840_v49 }
 0x1ea   : > { %3324 = vmatprep.mubr.f32.mxu1 %v9207_v35 }
 0x1ec   : > { %6888 = vmatmul.mubr.msk.f32.gmra.mrb[28].mxu0 %vm555_vm3, %v6846_v54 }
 0x1ed   : > { %6914 = vmatmul.mubr.msk.f32.gmra.mrb[28].mxu1 %vm555_vm3, %v6846_v54  ;;  %3121 = vmatprep.mubr.f32.mxu0 %v9207_v35  ;;  %v10851_v54 = vrot.slane %v3481_v51, %v3485_v50 }
 0x1ee   : > { %3330 = vmatprep.mubr.f32.mxu1 %v9207_v35 }
 0x1f0   : > { %6889 = vmatmul.mubr.msk.f32.gmra.mrb[30].mxu0 %vm555_vm3, %v6847_v56 }
 0x1f1   : > { %6915 = vmatmul.mubr.msk.f32.gmra.mrb[30].mxu1 %vm555_vm3, %v6847_v56  ;;  %3127 = vmatprep.mubr.f32.mxu0 %v9207_v35  ;;  %v10855_v56 = vrot.slane %v3481_v51, %v3493_v52 }
 0x1f2   : > { %3336 = vmatprep.mubr.f32.mxu1 %v9207_v35 }
 0x1f4   : > { %6890 = vmatmul.mubr.msk.f32.gmra.mrb[32].mxu0 %vm555_vm3, %v6848_v57 }
 0x1f5   : > { %6916 = vmatmul.mubr.msk.f32.gmra.mrb[32].mxu1 %vm555_vm3, %v6848_v57  ;;  %3133 = vmatprep.mubr.f32.mxu0 %v9207_v35  ;;  %v10859_v57 = vrot.slane %v3481_v51, %v3489_v53 }
 0x1f6   : > { %3342 = vmatprep.mubr.f32.mxu1 %v9207_v35 }
 0x1f8   : > { %6891 = vmatmul.mubr.msk.f32.gmra.mrb[34].mxu0 %vm555_vm3, %v6849_v58 }
 0x1f9   : > { %6917 = vmatmul.mubr.msk.f32.gmra.mrb[34].mxu1 %vm555_vm3, %v6849_v58  ;;  %3139 = vmatprep.mubr.f32.mxu0 %v9207_v35  ;;  %v10863_v58 = vrot.slane %v3481_v51, %v3497_v3 }
 0x1fa   : > { %3348 = vmatprep.mubr.f32.mxu1 %v9207_v35 }
 0x1fc   : > { %6892 = vmatmul.mubr.msk.f32.gmra.mrb[36].mxu0 %vm555_vm3, %v6850_v59 }
 0x1fd   : > { %6918 = vmatmul.mubr.msk.f32.gmra.mrb[36].mxu1 %vm555_vm3, %v6850_v59  ;;  %3145 = vmatprep.mubr.f32.mxu0 %v9207_v35 }
 0x1fe   : > { %3354 = vmatprep.mubr.f32.mxu1 %v9207_v35 }
 0x200   : > { %6893 = vmatmul.mubr.msk.f32.gmra.mrb[38].mxu0 %vm555_vm3, %v6851_v60 }
 0x201   : > { %6919 = vmatmul.mubr.msk.f32.gmra.mrb[38].mxu1 %vm555_vm3, %v6851_v60  ;;  %3151 = vmatprep.mubr.f32.mxu0 %v9207_v35 }
 0x202   : > { %3360 = vmatprep.mubr.f32.mxu1 %v9207_v35 }
 0x204   : > { %6894 = vmatmul.mubr.msk.f32.gmra.mrb[40].mxu0 %vm555_vm3, %v6852_v62 }
 0x205   : > { %6920 = vmatmul.mubr.msk.f32.gmra.mrb[40].mxu1 %vm555_vm3, %v6852_v62  ;;  %3157 = vmatprep.mubr.f32.mxu0 %v9207_v35 }
 0x206   : > { %3366 = vmatprep.mubr.f32.mxu1 %v9207_v35 }
 0x208   : > { %6895 = vmatmul.mubr.msk.f32.gmra.mrb[42].mxu0 %vm555_vm3, %v10124_v55 }
 0x209   : > { %6921 = vmatmul.mubr.msk.f32.gmra.mrb[42].mxu1 %vm555_vm3, %v10124_v55  ;;  %3163 = vmatprep.mubr.f32.mxu0 %v9207_v35  ;;  %v7855_v55 = vpack.c.bf16 %v7024_v0, %v7020_v63 }
 0x20a   : > { %3372 = vmatprep.mubr.f32.mxu1 %v9207_v35 }
 0x20b   : > { %7856 = vmatpush1.bf16.msra.mxu0 %v7855_v55 }
 0x20c   : > { %6896 = vmatmul.mubr.msk.f32.gmra.mrb[44].mxu0 %vm555_vm3, %v10327_v27  ;;  %7858 = vmatprep.subr.bf16.mxu0 %v7857_v8 }
 0x20d   : > { %6922 = vmatmul.mubr.msk.f32.gmra.mrb[44].mxu1 %vm555_vm3, %v10327_v27  ;;  %3169 = vmatprep.mubr.f32.mxu0 %v9207_v35  ;;  %v7031_v27 = vld [vmem:[%s13392_s3 + $0x758] sm:$0xff] }
 0x20e   : > { %3378 = vmatprep.mubr.f32.mxu1 %v9207_v35  ;;  %v7921_v43 = vpack.c.bf16 %v7035_v61, %v7031_v27 }
 0x20f   : > { %7860 = vmatpush1.bf16.msra.mxu0 %v7859_v15 }
 0x210   : > { %6897 = vmatmul.mubr.msk.f32.gmra.mrb[46].mxu0 %vm555_vm3, %v6855_v4  ;;  %7922 = vmatprep.subr.bf16.mxu1 %v7921_v43 }
 0x211   : > { %6923 = vmatmul.mubr.msk.f32.gmra.mrb[46].mxu1 %vm555_vm3, %v6855_v4  ;;  %7862 = vmatprep.subr.bf16.mxu0 %v7861_v30 }
 0x212   : > { %7924 = vmatpush1.bf16.msra.mxu1 %v7923_v25 }
 0x213   : > { %7926 = vmatprep.subr.bf16.mxu1 %v7925_v34  ;;  %7864 = vmatpush1.bf16.msra.mxu0 %v7863_v36 }
 0x214   : > { %7866 = vmatprep.subr.bf16.mxu0 %v7865_v44 }
 0x216   : > { %7928 = vmatpush1.bf16.msra.mxu1 %v7927_v39 }
 0x217   : > { %7930 = vmatprep.subr.bf16.mxu1 %v7929_v13  ;;  %7868 = vmatpush1.bf16.msra.mxu0 %v7867_v14  ;;  %v3831_v14 = vld [vmem:[%s13392_s3] sm:$0xff] }
 0x218   : > { %7934 = vmatprep.subr.bf16.mxu0 %v7933_v23  ;;  %v3837_v23 = vld [vmem:[%s13392_s3 + $0x30] sm:$0xff] }
 0x21a   : > { %7932 = vmatpush1.bf16.msra.mxu1 %v7931_v18 }
 0x21b   : > { %7998 = vmatprep.subr.bf16.mxu1 %v7997_v47 }
 0x287   : > { %v3033_v59 = vpop.f32.mrb[0].mxu0 }
 0x288   : > { %v3503_v60 = vadd.f32 %v10851_v54, %v3033_v59  ;;  %v3242_v62 = vpop.f32.mrb[0].mxu1  ;;  %v3035_v63 = vpop.f32.mrb[1].mxu0  ;;  %v3840_v59 = vld [vmem:[%s13392_s3 + $0x48] sm:$0xff] }
 0x289   : > { %v3505_v0 = vadd.f32 %v10855_v56, %v3242_v62  ;;  %v3504_v1 = vadd.f32 %v10859_v57, %v3035_v63  ;;  %v3244_v55 = vpop.f32.mrb[1].mxu1 }
 0x28a   : > { %v3506_v2 = vadd.f32 %v10863_v58, %v3244_v55 }
 0x28b   : > { %v3599_v4 = vmax.f32 %v3503_v60, %v3505_v0  ;;  %v3039_v5 = vpop.f32.mrb[2].mxu0  ;;  %v3844_v60 = vld [vmem:[%s13392_s3 + $0x68] sm:$0xff]  ;;  %v3842_v0 = vld [vmem:[%s13392_s3 + $0x58] sm:$0xff] }
 0x28c   : > { %v3600_v6 = vmax.f32 %v3504_v1, %v3506_v2  ;;  %v3507_v7 = vadd.f32 %v10851_v54, %v3039_v5  ;;  %v3248_v27 = vpop.f32.mrb[2].mxu1  ;;  %v3041_v8 = vpop.f32.mrb[3].mxu0  ;;  %v3846_v1 = vld [vmem:[%s13392_s3 + $0x78] sm:$0xff]  ;;  %v7999_v5 = vpack.c.bf16 %v3837_v23, %v3833_v22 }
 0x28d   : > { %v3509_v61 = vadd.f32 %v10855_v56, %v3248_v27  ;;  %v3508_v9 = vadd.f32 %v10859_v57, %v3041_v8  ;;  %v3250_v10 = vpop.f32.mrb[3].mxu1  ;;  %v3841_v27 = vld [vmem:[%s13392_s3 + $0x50] sm:$0xff] }
 0x28e   : > { %v3510_v43 = vadd.f32 %v10863_v58, %v3250_v10 }
 0x28f   : > { %v3601_v15 = vmax.f32 %v3507_v7, %v3509_v61  ;;  %v3045_v19 = vpop.f32.mrb[4].mxu0  ;;  %v3843_v7 = vld [vmem:[%s13392_s3 + $0x60] sm:$0xff] }
 0x290   : > { %v3602_v24 = vmax.f32 %v3508_v9, %v3510_v43  ;;  %v3511_v25 = vadd.f32 %v10851_v54, %v3045_v19  ;;  %v3254_v26 = vpop.f32.mrb[4].mxu1  ;;  %v3047_v28 = vpop.f32.mrb[5].mxu0  ;;  %v3845_v19 = vld [vmem:[%s13392_s3 + $0x70] sm:$0xff] }
 0x291   : > { %v10874_v29 = vmax.f32 %v3599_v4, %v3601_v15  ;;  %v3513_v30 = vadd.f32 %v10855_v56, %v3254_v26  ;;  %v3512_v31 = vadd.f32 %v10859_v57, %v3047_v28  ;;  %v3256_v32 = vpop.f32.mrb[5].mxu1  ;;  %v7935_v4 = vpack.c.bf16 %v3835_v21, %v3831_v14 }
 0x292   : > { %v3514_v33 = vadd.f32 %v10863_v58, %v3256_v32  ;;  %v10879_v34 = vmax.f32 %v3600_v6, %v3602_v24  ;;  %v3839_v6 = vld [vmem:[%s13392_s3 + $0x40] sm:$0xff]  ;;  %v7937_v15 = vpack.c.bf16 %v3844_v60, %v3840_v59  ;;  %v10931_v24 = vld [vmem:[%s13392_s3 + $0x88] sm:$0xff]  ;;  %v8001_v32 = vpack.c.bf16 %v3846_v1, %v3842_v0  ;;  %v3858_v59 = vld [vmem:[%s13392_s3 + $0xd8] sm:$0xff] }
 0x293   : > { %v3603_v36 = vmax.f32 %v3511_v25, %v3513_v30  ;;  %v3051_v37 = vpop.f32.mrb[6].mxu0  ;;  %v10936_v25 = vld [vmem:[%s13392_s3 + $0xa8] sm:$0xff]  ;;  %v3862_v60 = vld [vmem:[%s13392_s3 + $0xf8] sm:$0xff] }
 0x294   : > { %v3604_v38 = vmax.f32 %v3512_v31, %v3514_v33  ;;  %v3515_v39 = vadd.f32 %v10851_v54, %v3051_v37  ;;  %v3260_v40 = vpop.f32.mrb[6].mxu1  ;;  %v3053_v41 = vpop.f32.mrb[7].mxu0  ;;  %v3850_v33 = vld [vmem:[%s13392_s3 + $0x98] sm:$0xff] }
 0x295   : > { %v3517_v42 = vadd.f32 %v10855_v56, %v3260_v40  ;;  %v3516_v44 = vadd.f32 %v10859_v57, %v3053_v41  ;;  %v3262_v45 = vpop.f32.mrb[7].mxu1  ;;  %v8003_v41 = vpack.c.bf16 %v3845_v19, %v3841_v27 }
 0x296   : > { %v3518_v11 = vadd.f32 %v10863_v58, %v3262_v45 }
 0x297   : > { %v3605_v12 = vmax.f32 %v3515_v39, %v3517_v42  ;;  %v3057_v13 = vpop.f32.mrb[8].mxu0  ;;  %v7941_v42 = vpack.c.bf16 %v10936_v25, %v10931_v24 }
 0x298   : > { %v3606_v16 = vmax.f32 %v3516_v44, %v3518_v11  ;;  %v3519_v17 = vadd.f32 %v10851_v54, %v3057_v13  ;;  %v3266_v18 = vpop.f32.mrb[8].mxu1  ;;  %v3059_v20 = vpop.f32.mrb[9].mxu0  ;;  %v3847_v44 = vld [vmem:[%s13392_s3 + $0x80] sm:$0xff] }
 0x299   : > { %v3745_v46 = vmax.f32 %v3603_v36, %v3605_v12  ;;  %v3521_v47 = vadd.f32 %v10855_v56, %v3266_v18  ;;  %v3520_v48 = vadd.f32 %v10859_v57, %v3059_v20  ;;  %v3268_v51 = vpop.f32.mrb[9].mxu1  ;;  %v3854_v36 = vld [vmem:[%s13392_s3 + $0xb8] sm:$0xff]  ;;  %v3853_v18 = vld [vmem:[%s13392_s3 + $0xb0] sm:$0xff] }
 0x29a   : > { %v3746_v62 = vmax.f32 %v3604_v38, %v3606_v16  ;;  %v3522_v63 = vadd.f32 %v10863_v58, %v3268_v51  ;;  %v7939_v38 = vpack.c.bf16 %v3843_v7, %v3839_v6  ;;  %v8005_v14 = vpack.c.bf16 %v3854_v36, %v3850_v33  ;;  %v3851_v16 = vld [vmem:[%s13392_s3 + $0xa0] sm:$0xff] }
 0x29b   : > { %v3607_v55 = vmax.f32 %v3519_v17, %v3521_v47  ;;  %v3063_v2 = vpop.f32.mrb[10].mxu0  ;;  %v10938_v26 = vmax.f32 %v3745_v46, 0.0  ;;  %v3849_v17 = vld [vmem:[%s13392_s3 + $0x90] sm:$0xff]  ;;  %v3856_v46 = vld [vmem:[%s13392_s3 + $0xc8] sm:$0xff]  ;;  %v7943_v0 = vpack.c.bf16 %v3851_v16, %v3847_v44 }
 0x29c   : > { %v10922_v8 = vmax.f32 %v3746_v62, 0.0  ;;  %v3608_v61 = vmax.f32 %v3520_v48, %v3522_v63  ;;  %v3523_v9 = vadd.f32 %v10851_v54, %v3063_v2  ;;  %v3272_v10 = vpop.f32.mrb[10].mxu1  ;;  %v3065_v43 = vpop.f32.mrb[11].mxu0  ;;  %v3860_v47 = vld [vmem:[%s13392_s3 + $0xe8] sm:$0xff]  ;;  %v8007_v1 = vpack.c.bf16 %v3853_v18, %v3849_v17  ;;  %v10996_v2 = vld [vmem:[%s13392_s3 + $0xe0] sm:$0xff]  ;;  %v3869_v16 = vld [vmem:[%s13392_s3 + $0x130] sm:$0xff] }
 0x29d   : > { %v3525_v28 = vadd.f32 %v10855_v56, %v3272_v10  ;;  %v3524_v30 = vadd.f32 %v10859_v57, %v3065_v43  ;;  %v3274_v31 = vpop.f32.mrb[11].mxu1  ;;  %v3861_v10 = vld [vmem:[%s13392_s3 + $0xf0] sm:$0xff]  ;;  %v11013_v43 = vld [vmem:[%s13392_s3 + $0x108] sm:$0xff] }
 0x29e   : > { %v3526_v37 = vadd.f32 %v10863_v58, %v3274_v31  ;;  %4169 = vmatprep.mubr.f32.mxu0 %v10922_v8  ;;  %4282 = vmatprep.mubr.f32.mxu1 %v10922_v8  ;;  %v3866_v31 = vld [vmem:[%s13392_s3 + $0x118] sm:$0xff] }
 0x29f   : > { %v3609_v39 = vmax.f32 %v3523_v9, %v3525_v28  ;;  %4170 = vmatmul.mubr.f32.vlgmr.msra.gmra.mrb[48].mxu0 %v10938_v26  ;;  %4283 = vmatmul.mubr.f32.vlgmr.msra.gmra.mrb[48].mxu1 %v10938_v26  ;;  %v3069_v40 = vpop.f32.mrb[12].mxu0  ;;  %v7945_v9 = vpack.c.bf16 %v3860_v47, %v3856_v46 }
 0x2a0   : > { %v3610_v45 = vmax.f32 %v3524_v30, %v3526_v37  ;;  %7936 = vmatpush1.bf16.msra.mxu0 %v7935_v4  ;;  %8000 = vmatpush1.bf16.msra.mxu1 %v7999_v5  ;;  %v10959_v11 = vadd.f32 %v10851_v54, %v3069_v40  ;;  %v3278_v12 = vpop.f32.mrb[12].mxu1  ;;  %v3071_v13 = vpop.f32.mrb[13].mxu0  ;;  %v11001_v4 = vld [vmem:[%s13392_s3 + $0xd0] sm:$0xff]  ;;  %v8009_v30 = vpack.c.bf16 %v3862_v60, %v3858_v59 }
 0x2a1   : > { %v3747_v20 = vmax.f32 %v3607_v55, %v3609_v39  ;;  %v3529_v21 = vadd.f32 %v10855_v56, %v3278_v12  ;;  %v10972_v22 = vadd.f32 %v10859_v57, %v3071_v13  ;;  %v3280_v23 = vpop.f32.mrb[13].mxu1  ;;  %7938 = vmatprep.subr.bf16.mxu0 %v7937_v15  ;;  %8002 = vmatprep.subr.bf16.mxu1 %v8001_v32  ;;  %v10991_v55 = vld [vmem:[%s13392_s3 + $0xc0] sm:$0xff]  ;;  %v11018_v15 = vld [vmem:[%s13392_s3 + $0x128] sm:$0xff]  ;;  %v3870_v32 = vld [vmem:[%s13392_s3 + $0x138] sm:$0xff] }
 0x2a2   : > { %v3748_v48 = vmax.f32 %v3608_v61, %v3610_v45  ;;  %v3530_v51 = vadd.f32 %v10863_v58, %v3280_v23  ;;  %v7947_v36 = vpack.c.bf16 %v10996_v2, %v10991_v55  ;;  %v8011_v39 = vpack.c.bf16 %v3861_v10, %v11001_v4  ;;  %v3867_v13 = vld [vmem:[%s13392_s3 + $0x120] sm:$0xff]  ;;  %v3876_v23 = vld [vmem:[%s13392_s3 + $0x168] sm:$0xff]  ;;  %v11086_v55 = vld [vmem:[%s13392_s3 + $0x150] sm:$0xff] }
 0x2a3   : > { %v3611_v62 = vmax.f32 %v10959_v11, %v3529_v21  ;;  %v3075_v63 = vpop.f32.mrb[14].mxu0  ;;  %v11020_v19 = vmax.f32 %v3747_v20, 0.0  ;;  %v7949_v40 = vpack.c.bf16 %v11018_v15, %v11013_v43  ;;  %v8013_v12 = vpack.c.bf16 %v3870_v32, %v3866_v31  ;;  %v11098_v10 = vld [vmem:[%s13392_s3 + $0x188] sm:$0xff]  ;;  %v3882_v31 = vld [vmem:[%s13392_s3 + $0x198] sm:$0xff] }
 0x2a4   : > { %v11003_v5 = vmax.f32 %v3748_v48, 0.0  ;;  %v3612_v6 = vmax.f32 %v10972_v22, %v3530_v51  ;;  %7940 = vmatpush1.bf16.msra.mxu0 %v7939_v38  ;;  %8004 = vmatpush1.bf16.msra.mxu1 %v8003_v41  ;;  %v3531_v7 = vadd.f32 %v10851_v54, %v3075_v63  ;;  %v3284_v27 = vpop.f32.mrb[14].mxu1  ;;  %v3077_v61 = vpop.f32.mrb[15].mxu0  ;;  %v3863_v41 = vld [vmem:[%s13392_s3 + $0x100] sm:$0xff]  ;;  %v3872_v22 = vld [vmem:[%s13392_s3 + $0x148] sm:$0xff]  ;;  %v3874_v48 = vld [vmem:[%s13392_s3 + $0x158] sm:$0xff] }
 0x2a5   : > { %v3533_v24 = vadd.f32 %v10855_v56, %v3284_v27  ;;  %v3532_v25 = vadd.f32 %v10859_v57, %v3077_v61  ;;  %v3286_v28 = vpop.f32.mrb[15].mxu1  ;;  %7942 = vmatprep.subr.bf16.mxu0 %v7941_v42  ;;  %8006 = vmatprep.subr.bf16.mxu1 %v8005_v14  ;;  %v3865_v14 = vld [vmem:[%s13392_s3 + $0x110] sm:$0xff]  ;;  %v3878_v51 = vld [vmem:[%s13392_s3 + $0x178] sm:$0xff]  ;;  %v7953_v61 = vpack.c.bf16 %v3876_v23, %v3872_v22  ;;  %v11103_v43 = vld [vmem:[%s13392_s3 + $0x1a8] sm:$0xff] }
 0x2a6   : > { %v3534_v33 = vadd.f32 %v10863_v58, %v3286_v28  ;;  %4175 = vmatprep.mubr.f32.mxu0 %v11003_v5  ;;  %4288 = vmatprep.mubr.f32.mxu1 %v11003_v5  ;;  %v8015_v63 = vpack.c.bf16 %v3869_v16, %v3865_v14  ;;  %v3886_v32 = vld [vmem:[%s13392_s3 + $0x1b8] sm:$0xff]  ;;  %v3881_v14 = vld [vmem:[%s13392_s3 + $0x190] sm:$0xff]  ;;  %v3888_v22 = vld [vmem:[%s13392_s3 + $0x1c8] sm:$0xff] }
 0x2a7   : > { %v3613_v37 = vmax.f32 %v3531_v7, %v3533_v24  ;;  %4176 = vmatmul.mubr.f32.gmra.mrb[50].mxu0 %v11020_v19  ;;  %4289 = vmatmul.mubr.f32.gmra.mrb[50].mxu1 %v11020_v19  ;;  %v3081_v38 = vpop.f32.mrb[16].mxu0  ;;  %v3885_v16 = vld [vmem:[%s13392_s3 + $0x1b0] sm:$0xff]  ;;  %v3892_v23 = vld [vmem:[%s13392_s3 + $0x1e8] sm:$0xff] }
 0x2a8   : > { %v3614_v42 = vmax.f32 %v3532_v25, %v3534_v33  ;;  %7944 = vmatpush1.bf16.msra.mxu0 %v7943_v0  ;;  %8008 = vmatpush1.bf16.msra.mxu1 %v8007_v1  ;;  %v11044_v44 = vadd.f32 %v10851_v54, %v3081_v38  ;;  %v3290_v45 = vpop.f32.mrb[16].mxu1  ;;  %v3083_v11 = vpop.f32.mrb[17].mxu0  ;;  %v11076_v0 = vld [vmem:[%s13392_s3 + $0x140] sm:$0xff] }
 0x2a9   : > { %v3749_v17 = vmax.f32 %v3611_v62, %v3613_v37  ;;  %v3537_v18 = vadd.f32 %v10855_v56, %v3290_v45  ;;  %v11057_v20 = vadd.f32 %v10859_v57, %v3083_v11  ;;  %v3292_v21 = vpop.f32.mrb[17].mxu1  ;;  %7946 = vmatprep.subr.bf16.mxu0 %v7945_v9  ;;  %8010 = vmatprep.subr.bf16.mxu1 %v8009_v30  ;;  %v11081_v1 = vld [vmem:[%s13392_s3 + $0x160] sm:$0xff]  ;;  %v3877_v9 = vld [vmem:[%s13392_s3 + $0x170] sm:$0xff] }
 0x2aa   : > { %v3750_v46 = vmax.f32 %v3612_v6, %v3614_v42  ;;  %v3538_v47 = vadd.f32 %v10863_v58, %v3292_v21  ;;  %v7951_v62 = vpack.c.bf16 %v3867_v13, %v3863_v41  ;;  %v8017_v30 = vpack.c.bf16 %v3878_v51, %v3874_v48  ;;  %v3879_v41 = vld [vmem:[%s13392_s3 + $0x180] sm:$0xff]  ;;  %v3890_v48 = vld [vmem:[%s13392_s3 + $0x1d8] sm:$0xff] }
 0x2ab   : > { %v3615_v59 = vmax.f32 %v11044_v44, %v3537_v18  ;;  %v3087_v60 = vpop.f32.mrb[18].mxu0  ;;  %v11105_v15 = vmax.f32 %v3749_v17, 0.0  ;;  %v3883_v13 = vld [vmem:[%s13392_s3 + $0x1a0] sm:$0xff]  ;;  %v3894_v51 = vld [vmem:[%s13392_s3 + $0x1f8] sm:$0xff] }
 0x2ac   : > { %v11088_v2 = vmax.f32 %v3750_v46, 0.0  ;;  %v3616_v4 = vmax.f32 %v11057_v20, %v3538_v47  ;;  %7948 = vmatpush1.bf16.msra.mxu0 %v7947_v36  ;;  %8012 = vmatpush1.bf16.msra.mxu1 %v8011_v39  ;;  %v3539_v6 = vadd.f32 %v10851_v54, %v3087_v60  ;;  %v3296_v7 = vpop.f32.mrb[18].mxu1  ;;  %v3089_v27 = vpop.f32.mrb[19].mxu0  ;;  %v7955_v36 = vpack.c.bf16 %v11081_v1, %v11076_v0  ;;  %v11161_v0 = vld [vmem:[%s13392_s3 + $0x1c0] sm:$0xff] }
 0x2ad   : > { %v3541_v24 = vadd.f32 %v10855_v56, %v3296_v7  ;;  %v3540_v25 = vadd.f32 %v10859_v57, %v3089_v27  ;;  %v3298_v28 = vpop.f32.mrb[19].mxu1  ;;  %7950 = vmatprep.subr.bf16.mxu0 %v7949_v40  ;;  %8014 = vmatprep.subr.bf16.mxu1 %v8013_v12  ;;  %v8019_v39 = vpack.c.bf16 %v3877_v9, %v11086_v55  ;;  %v11166_v1 = vld [vmem:[%s13392_s3 + $0x1e0] sm:$0xff]  ;;  %v11171_v55 = vld [vmem:[%s13392_s3 + $0x1d0] sm:$0xff] }
 0x2ae   : > { %v3542_v33 = vadd.f32 %v10863_v58, %v3298_v28  ;;  %4181 = vmatprep.mubr.f32.mxu0 %v11088_v2  ;;  %4294 = vmatprep.mubr.f32.mxu1 %v11088_v2  ;;  %v7957_v40 = vpack.c.bf16 %v11103_v43, %v11098_v10  ;;  %v8021_v12 = vpack.c.bf16 %v3886_v32, %v3882_v31  ;;  %v3893_v10 = vld [vmem:[%s13392_s3 + $0x1f0] sm:$0xff]  ;;  %v11183_v43 = vld [vmem:[%s13392_s3 + $0x208] sm:$0xff] }
 0x2af   : > { %v3617_v37 = vmax.f32 %v3539_v6, %v3541_v24  ;;  %4182 = vmatmul.mubr.f32.gmra.mrb[52].mxu0 %v11105_v15  ;;  %4295 = vmatmul.mubr.f32.gmra.mrb[52].mxu1 %v11105_v15  ;;  %v3093_v38 = vpop.f32.mrb[20].mxu0  ;;  %v7961_v9 = vpack.c.bf16 %v3892_v23, %v3888_v22  ;;  %v11188_v24 = vld [vmem:[%s13392_s3 + $0x228] sm:$0xff]  ;;  %v8025_v32 = vpack.c.bf16 %v3894_v51, %v3890_v48 }
 0x2b0   : > { %v3618_v42 = vmax.f32 %v3540_v25, %v3542_v33  ;;  %7952 = vmatpush1.bf16.msra.mxu0 %v7951_v62  ;;  %8016 = vmatpush1.bf16.msra.mxu1 %v8015_v63  ;;  %v11129_v44 = vadd.f32 %v10851_v54, %v3093_v38  ;;  %v3302_v45 = vpop.f32.mrb[20].mxu1  ;;  %v3095_v11 = vpop.f32.mrb[21].mxu0  ;;  %v7959_v62 = vpack.c.bf16 %v3883_v13, %v3879_v41  ;;  %v3898_v33 = vld [vmem:[%s13392_s3 + $0x218] sm:$0xff] }
 0x2b1   : > { %v3751_v17 = vmax.f32 %v3615_v59, %v3617_v37  ;;  %v3545_v18 = vadd.f32 %v10855_v56, %v3302_v45  ;;  %v11142_v20 = vadd.f32 %v10859_v57, %v3095_v11  ;;  %v3304_v21 = vpop.f32.mrb[21].mxu1  ;;  %7954 = vmatprep.subr.bf16.mxu0 %v7953_v61  ;;  %8018 = vmatprep.subr.bf16.mxu1 %v8017_v30 }
 0x2b2   : > { %v3752_v46 = vmax.f32 %v3616_v4, %v3618_v42  ;;  %v3546_v47 = vadd.f32 %v10863_v58, %v3304_v21  ;;  %v8023_v63 = vpack.c.bf16 %v3885_v16, %v3881_v14  ;;  %v7963_v38 = vpack.c.bf16 %v11166_v1, %v11161_v0  ;;  %v3899_v16 = vld [vmem:[%s13392_s3 + $0x220] sm:$0xff] }
 0x2b3   : > { %v3619_v59 = vmax.f32 %v11129_v44, %v3545_v18  ;;  %v3099_v60 = vpop.f32.mrb[22].mxu0  ;;  %v11190_v25 = vmax.f32 %v3751_v17, 0.0  ;;  %v8027_v41 = vpack.c.bf16 %v3893_v10, %v11171_v55  ;;  %v7965_v42 = vpack.c.bf16 %v11188_v24, %v11183_v43  ;;  %v3895_v44 = vld [vmem:[%s13392_s3 + $0x200] sm:$0xff]  ;;  %v3897_v17 = vld [vmem:[%s13392_s3 + $0x210] sm:$0xff] }
 0x2b4   : > { %v11173_v4 = vmax.f32 %v3752_v46, 0.0  ;;  %v3620_v6 = vmax.f32 %v11142_v20, %v3546_v47  ;;  %7956 = vmatpush1.bf16.msra.mxu0 %v7955_v36  ;;  %8020 = vmatpush1.bf16.msra.mxu1 %v8019_v39  ;;  %v3547_v7 = vadd.f32 %v10851_v54, %v3099_v60  ;;  %v3308_v27 = vpop.f32.mrb[22].mxu1  ;;  %v3101_v61 = vpop.f32.mrb[23].mxu0  ;;  %v3902_v36 = vld [vmem:[%s13392_s3 + $0x238] sm:$0xff]  ;;  %v3901_v18 = vld [vmem:[%s13392_s3 + $0x230] sm:$0xff]  ;;  %v3904_v46 = vld [vmem:[%s13392_s3 + $0x248] sm:$0xff]  ;;  %v7967_v0 = vpack.c.bf16 %v3899_v16, %v3895_v44 }
 0x2b5   : > { %v3549_v28 = vadd.f32 %v10855_v56, %v3308_v27  ;;  %v3548_v30 = vadd.f32 %v10859_v57, %v3101_v61  ;;  %v3310_v31 = vpop.f32.mrb[23].mxu1  ;;  %7958 = vmatprep.subr.bf16.mxu0 %v7957_v40  ;;  %8022 = vmatprep.subr.bf16.mxu1 %v8021_v12  ;;  %v8029_v14 = vpack.c.bf16 %v3902_v36, %v3898_v33  ;;  %v3908_v47 = vld [vmem:[%s13392_s3 + $0x268] sm:$0xff]  ;;  %v3910_v60 = vld [vmem:[%s13392_s3 + $0x278] sm:$0xff]  ;;  %v11246_v55 = vld [vmem:[%s13392_s3 + $0x240] sm:$0xff] }
 0x2b6   : > { %v3550_v37 = vadd.f32 %v10863_v58, %v3310_v31  ;;  %4187 = vmatprep.mubr.f32.mxu0 %v11173_v4  ;;  %4300 = vmatprep.mubr.f32.mxu1 %v11173_v4  ;;  %v8031_v1 = vpack.c.bf16 %v3901_v18, %v3897_v17  ;;  %v7969_v24 = vpack.c.bf16 %v3908_v47, %v3904_v46  ;;  %v11273_v31 = vld [vmem:[%s13392_s3 + $0x2a8] sm:$0xff] }
 0x2b7   : > { %v3621_v39 = vmax.f32 %v3547_v7, %v3549_v28  ;;  %4188 = vmatmul.mubr.f32.gmra.mrb[54].mxu0 %v11190_v25  ;;  %4301 = vmatmul.mubr.f32.gmra.mrb[54].mxu1 %v11190_v25  ;;  %v3105_v40 = vpop.f32.mrb[24].mxu0  ;;  %v11256_v7 = vld [vmem:[%s13392_s3 + $0x250] sm:$0xff] }
 0x2b8   : > { %v3622_v45 = vmax.f32 %v3548_v30, %v3550_v37  ;;  %7960 = vmatpush1.bf16.msra.mxu0 %v7959_v62  ;;  %8024 = vmatpush1.bf16.msra.mxu1 %v8023_v63  ;;  %v11214_v11 = vadd.f32 %v10851_v54, %v3105_v40  ;;  %v3314_v12 = vpop.f32.mrb[24].mxu1  ;;  %v3107_v13 = vpop.f32.mrb[25].mxu0  ;;  %v3909_v28 = vld [vmem:[%s13392_s3 + $0x270] sm:$0xff]  ;;  %v11268_v30 = vld [vmem:[%s13392_s3 + $0x288] sm:$0xff]  ;;  %v3918_v40 = vld [vmem:[%s13392_s3 + $0x2b8] sm:$0xff] }
 0x2b9   : > { %v3753_v20 = vmax.f32 %v3619_v59, %v3621_v39  ;;  %v3553_v21 = vadd.f32 %v10855_v56, %v3314_v12  ;;  %v11227_v22 = vadd.f32 %v10859_v57, %v3107_v13  ;;  %v3316_v23 = vpop.f32.mrb[25].mxu1  ;;  %7962 = vmatprep.subr.bf16.mxu0 %v7961_v9  ;;  %8026 = vmatprep.subr.bf16.mxu1 %v8025_v32  ;;  %v3906_v59 = vld [vmem:[%s13392_s3 + $0x258] sm:$0xff]  ;;  %v3911_v13 = vld [vmem:[%s13392_s3 + $0x280] sm:$0xff] }
 0x2ba   : > { %v3754_v48 = vmax.f32 %v3620_v6, %v3622_v45  ;;  %v3554_v51 = vadd.f32 %v10863_v58, %v3316_v23  ;;  %v11251_v6 = vld [vmem:[%s13392_s3 + $0x260] sm:$0xff]  ;;  %v3914_v39 = vld [vmem:[%s13392_s3 + $0x298] sm:$0xff]  ;;  %v7973_v12 = vpack.c.bf16 %v11273_v31, %v11268_v30  ;;  %v3917_v23 = vld [vmem:[%s13392_s3 + $0x2b0] sm:$0xff] }
 0x2bb   : > { %v3623_v62 = vmax.f32 %v11214_v11, %v3553_v21  ;;  %v3111_v63 = vpop.f32.mrb[26].mxu0  ;;  %v11275_v32 = vmax.f32 %v3753_v20, 0.0  ;;  %v7971_v44 = vpack.c.bf16 %v11251_v6, %v11246_v55  ;;  %v8035_v11 = vpack.c.bf16 %v3909_v28, %v11256_v7  ;;  %v3915_v21 = vld [vmem:[%s13392_s3 + $0x2a0] sm:$0xff] }
 0x2bc   : > { %v11258_v27 = vmax.f32 %v3754_v48, 0.0  ;;  %v3624_v61 = vmax.f32 %v11227_v22, %v3554_v51  ;;  %7964 = vmatpush1.bf16.msra.mxu0 %v7963_v38  ;;  %8028 = vmatpush1.bf16.msra.mxu1 %v8027_v41  ;;  %v3555_v9 = vadd.f32 %v10851_v54, %v3111_v63  ;;  %v3320_v10 = vpop.f32.mrb[26].mxu1  ;;  %v3113_v43 = vpop.f32.mrb[27].mxu0  ;;  %v8033_v38 = vpack.c.bf16 %v3910_v60, %v3906_v59  ;;  %v3913_v22 = vld [vmem:[%s13392_s3 + $0x290] sm:$0xff]  ;;  %v3920_v59 = vld [vmem:[%s13392_s3 + $0x2c8] sm:$0xff] }
 0x2bd   : > { %v3557_v33 = vadd.f32 %v10855_v56, %v3320_v10  ;;  %v3556_v36 = vadd.f32 %v10859_v57, %v3113_v43  ;;  %v3322_v37 = vpop.f32.mrb[27].mxu1  ;;  %7966 = vmatprep.subr.bf16.mxu0 %v7965_v42  ;;  %8030 = vmatprep.subr.bf16.mxu1 %v8029_v14  ;;  %v8037_v20 = vpack.c.bf16 %v3918_v40, %v3914_v39  ;;  %v3924_v60 = vld [vmem:[%s13392_s3 + $0x2e8] sm:$0xff]  ;;  %v11331_v10 = vld [vmem:[%s13392_s3 + $0x2c0] sm:$0xff]  ;;  %v11341_v43 = vld [vmem:[%s13392_s3 + $0x2d0] sm:$0xff] }
 0x2be   : > { %v3558_v41 = vadd.f32 %v10863_v58, %v3322_v37  ;;  %4193 = vmatprep.mubr.f32.mxu0 %v11258_v27  ;;  %4306 = vmatprep.mubr.f32.mxu1 %v11258_v27  ;;  %v7975_v7 = vpack.c.bf16 %v3915_v21, %v3911_v13  ;;  %v3925_v37 = vld [vmem:[%s13392_s3 + $0x2f0] sm:$0xff]  ;;  %v11358_v39 = vld [vmem:[%s13392_s3 + $0x328] sm:$0xff]  ;;  %v3934_v13 = vld [vmem:[%s13392_s3 + $0x338] sm:$0xff] }
 0x2bf   : > { %v3625_v42 = vmax.f32 %v3555_v9, %v3557_v33  ;;  %4194 = vmatmul.mubr.f32.gmra.mrb[56].mxu0 %v11275_v32  ;;  %4307 = vmatmul.mubr.f32.gmra.mrb[56].mxu1 %v11275_v32  ;;  %v3117_v45 = vpop.f32.mrb[28].mxu0  ;;  %v8039_v9 = vpack.c.bf16 %v3917_v23, %v3913_v22  ;;  %v3927_v21 = vld [vmem:[%s13392_s3 + $0x300] sm:$0xff] }
 0x2c0   : > { %v3626_v14 = vmax.f32 %v3556_v36, %v3558_v41  ;;  %7968 = vmatpush1.bf16.msra.mxu0 %v7967_v0  ;;  %8032 = vmatpush1.bf16.msra.mxu1 %v8031_v1  ;;  %v11299_v16 = vadd.f32 %v10851_v54, %v3117_v45  ;;  %v3326_v17 = vpop.f32.mrb[28].mxu1  ;;  %v3119_v18 = vpop.f32.mrb[29].mxu0  ;;  %v3926_v1 = vld [vmem:[%s13392_s3 + $0x2f8] sm:$0xff]  ;;  %v7977_v36 = vpack.c.bf16 %v3924_v60, %v3920_v59  ;;  %v3929_v59 = vld [vmem:[%s13392_s3 + $0x310] sm:$0xff] }
 0x2c1   : > { %v3755_v46 = vmax.f32 %v3623_v62, %v3625_v42  ;;  %v3561_v47 = vadd.f32 %v10855_v56, %v3326_v17  ;;  %v11312_v48 = vadd.f32 %v10859_v57, %v3119_v18  ;;  %v3328_v51 = vpop.f32.mrb[29].mxu1  ;;  %7970 = vmatprep.subr.bf16.mxu0 %v7969_v24  ;;  %8034 = vmatprep.subr.bf16.mxu1 %v8033_v38  ;;  %v3922_v62 = vld [vmem:[%s13392_s3 + $0x2d8] sm:$0xff]  ;;  %v11353_v38 = vld [vmem:[%s13392_s3 + $0x308] sm:$0xff]  ;;  %v3933_v60 = vld [vmem:[%s13392_s3 + $0x330] sm:$0xff] }
 0x2c2   : > { %v3756_v63 = vmax.f32 %v3624_v61, %v3626_v14  ;;  %v3562_v0 = vadd.f32 %v10863_v58, %v3328_v51  ;;  %v11336_v61 = vld [vmem:[%s13392_s3 + $0x2e0] sm:$0xff]  ;;  %v8041_v45 = vpack.c.bf16 %v3926_v1, %v3922_v62  ;;  %v8043_v18 = vpack.c.bf16 %v3925_v37, %v11341_v43  ;;  %v11426_v37 = vld [vmem:[%s13392_s3 + $0x350] sm:$0xff] }
 0x2c3   : > { %v3627_v55 = vmax.f32 %v11299_v16, %v3561_v47  ;;  %v3123_v6 = vpop.f32.mrb[30].mxu0  ;;  %v11360_v40 = vmax.f32 %v3755_v46, 0.0  ;;  %v7979_v16 = vpack.c.bf16 %v11336_v61, %v11331_v10  ;;  %v3931_v51 = vld [vmem:[%s13392_s3 + $0x320] sm:$0xff]  ;;  %v3942_v61 = vld [vmem:[%s13392_s3 + $0x378] sm:$0xff] }
 0x2c4   : > { %v11343_v24 = vmax.f32 %v3756_v63, 0.0  ;;  %v3628_v28 = vmax.f32 %v11312_v48, %v3562_v0  ;;  %7972 = vmatpush1.bf16.msra.mxu0 %v7971_v44  ;;  %8036 = vmatpush1.bf16.msra.mxu1 %v8035_v11  ;;  %v3563_v30 = vadd.f32 %v10851_v54, %v3123_v6  ;;  %v3332_v31 = vpop.f32.mrb[30].mxu1  ;;  %v3125_v33 = vpop.f32.mrb[31].mxu0  ;;  %v3930_v11 = vld [vmem:[%s13392_s3 + $0x318] sm:$0xff]  ;;  %v3936_v6 = vld [vmem:[%s13392_s3 + $0x348] sm:$0xff] }
 0x2c5   : > { %v3565_v41 = vadd.f32 %v10855_v56, %v3332_v31  ;;  %v3564_v44 = vadd.f32 %v10859_v57, %v3125_v33  ;;  %v3334_v42 = vpop.f32.mrb[31].mxu1  ;;  %7974 = vmatprep.subr.bf16.mxu0 %v7973_v12  ;;  %8038 = vmatprep.subr.bf16.mxu1 %v8037_v20  ;;  %v7981_v20 = vpack.c.bf16 %v11358_v39, %v11353_v38 }
 0x2c6   : > { %v3566_v14 = vadd.f32 %v10863_v58, %v3334_v42  ;;  %4199 = vmatprep.mubr.f32.mxu0 %v11343_v24  ;;  %4312 = vmatprep.mubr.f32.mxu1 %v11343_v24  ;;  %v8045_v48 = vpack.c.bf16 %v3934_v13, %v3930_v11  ;;  %v7983_v31 = vpack.c.bf16 %v3931_v51, %v3927_v21  ;;  %v3941_v11 = vld [vmem:[%s13392_s3 + $0x370] sm:$0xff]  ;;  %v11438_v13 = vld [vmem:[%s13392_s3 + $0x388] sm:$0xff] }
 0x2c7   : > { %v3629_v12 = vmax.f32 %v3563_v30, %v3565_v41  ;;  %4200 = vmatmul.mubr.f32.gmra.mrb[58].mxu0 %v11360_v40  ;;  %4313 = vmatmul.mubr.f32.gmra.mrb[58].mxu1 %v11360_v40  ;;  %v3129_v17 = vpop.f32.mrb[32].mxu0  ;;  %v8047_v33 = vpack.c.bf16 %v3933_v60, %v3929_v59  ;;  %v8051_v51 = vpack.c.bf16 %v3941_v11, %v11426_v37  ;;  %v3954_v37 = vld [vmem:[%s13392_s3 + $0x3d8] sm:$0xff]  ;;  %v11506_v11 = vld [vmem:[%s13392_s3 + $0x3e0] sm:$0xff] }
 0x2c8   : > { %v3630_v22 = vmax.f32 %v3564_v44, %v3566_v14  ;;  %7976 = vmatpush1.bf16.msra.mxu0 %v7975_v7  ;;  %8040 = vmatpush1.bf16.msra.mxu1 %v8039_v9  ;;  %v11384_v23 = vadd.f32 %v10851_v54, %v3129_v17  ;;  %v3338_v46 = vpop.f32.mrb[32].mxu1  ;;  %v3131_v47 = vpop.f32.mrb[33].mxu0  ;;  %v3940_v7 = vld [vmem:[%s13392_s3 + $0x368] sm:$0xff] }
 0x2c9   : > { %v3757_v63 = vmax.f32 %v3627_v55, %v3629_v12  ;;  %v3569_v0 = vadd.f32 %v10855_v56, %v3338_v46  ;;  %v11397_v62 = vadd.f32 %v10859_v57, %v3131_v47  ;;  %v3340_v1 = vpop.f32.mrb[33].mxu1  ;;  %7978 = vmatprep.subr.bf16.mxu0 %v7977_v36  ;;  %8042 = vmatprep.subr.bf16.mxu1 %v8041_v45  ;;  %v3938_v55 = vld [vmem:[%s13392_s3 + $0x358] sm:$0xff]  ;;  %v11416_v36 = vld [vmem:[%s13392_s3 + $0x340] sm:$0xff]  ;;  %v11443_v14 = vld [vmem:[%s13392_s3 + $0x3a8] sm:$0xff] }
 0x2ca   : > { %v3758_v9 = vmax.f32 %v3628_v28, %v3630_v22  ;;  %v3570_v10 = vadd.f32 %v10863_v58, %v3340_v1  ;;  %v11421_v28 = vld [vmem:[%s13392_s3 + $0x360] sm:$0xff]  ;;  %v7985_v45 = vpack.c.bf16 %v3940_v7, %v3936_v6  ;;  %v8049_v21 = vpack.c.bf16 %v3942_v61, %v3938_v55  ;;  %v3946_v22 = vld [vmem:[%s13392_s3 + $0x398] sm:$0xff] }
 0x2cb   : > { %v3631_v43 = vmax.f32 %v11384_v23, %v3569_v0  ;;  %v3135_v30 = vpop.f32.mrb[34].mxu0  ;;  %v3950_v23 = vld [vmem:[%s13392_s3 + $0x3b8] sm:$0xff]  ;;  %v7987_v47 = vpack.c.bf16 %v11421_v28, %v11416_v36  ;;  %v7989_v59 = vpack.c.bf16 %v11443_v14, %v11438_v13  ;;  %v3943_v6 = vld [vmem:[%s13392_s3 + $0x380] sm:$0xff]  ;;  %v3956_v28 = vld [vmem:[%s13392_s3 + $0x3e8] sm:$0xff] }
 0x2cc   : > { %v11428_v38 = vmax.f32 %v3758_v9, 0.0  ;;  %v3632_v39 = vmax.f32 %v11397_v62, %v3570_v10  ;;  %7980 = vmatpush1.bf16.msra.mxu0 %v7979_v16  ;;  %8044 = vmatpush1.bf16.msra.mxu1 %v8043_v18  ;;  %v3571_v41 = vadd.f32 %v10851_v54, %v3135_v30  ;;  %v3344_v44 = vpop.f32.mrb[34].mxu1  ;;  %v3137_v42 = vpop.f32.mrb[35].mxu0  ;;  %v11445_v16 = vmax.f32 %v3757_v63, 0.0  ;;  %v3947_v7 = vld [vmem:[%s13392_s3 + $0x3a0] sm:$0xff]  ;;  %v3945_v30 = vld [vmem:[%s13392_s3 + $0x390] sm:$0xff] }
 0x2cd   : > { %v3573_v12 = vadd.f32 %v10855_v56, %v3344_v44  ;;  %v3572_v17 = vadd.f32 %v10859_v57, %v3137_v42  ;;  %v3346_v18 = vpop.f32.mrb[35].mxu1  ;;  %7982 = vmatprep.subr.bf16.mxu0 %v7981_v20  ;;  %8046 = vmatprep.subr.bf16.mxu1 %v8045_v48  ;;  %v8053_v1 = vpack.c.bf16 %v3950_v23, %v3946_v22  ;;  %v11511_v13 = vld [vmem:[%s13392_s3 + $0x3d0] sm:$0xff] }
 0x2ce   : > { %v3574_v46 = vadd.f32 %v10863_v58, %v3346_v18  ;;  %4205 = vmatprep.mubr.f32.mxu0 %v11428_v38  ;;  %4318 = vmatprep.mubr.f32.mxu1 %v11428_v38  ;;  %v3957_v23 = vld [vmem:[%s13392_s3 + $0x3f0] sm:$0xff] }
 0x2cf   : > { %v3633_v20 = vmax.f32 %v3571_v41, %v3573_v12  ;;  %4206 = vmatmul.mubr.f32.gmra.mrb[60].mxu0 %v11445_v16  ;;  %4319 = vmatmul.mubr.f32.gmra.mrb[60].mxu1 %v11445_v16  ;;  %v3141_v48 = vpop.f32.mrb[36].mxu0  ;;  %v3958_v41 = vld [vmem:[%s13392_s3 + $0x3f8] sm:$0xff] }
 0x2d0   : > { %v3634_v60 = vmax.f32 %v3572_v17, %v3574_v46  ;;  %7984 = vmatpush1.bf16.msra.mxu0 %v7983_v31  ;;  %8048 = vmatpush1.bf16.msra.mxu1 %v8047_v33  ;;  %v11466_v63 = vadd.f32 %v10851_v54, %v3141_v48  ;;  %v3350_v0 = vpop.f32.mrb[36].mxu1  ;;  %v3143_v62 = vpop.f32.mrb[37].mxu0  ;;  %v3949_v31 = vld [vmem:[%s13392_s3 + $0x3b0] sm:$0xff]  ;;  %v11523_v46 = vld [vmem:[%s13392_s3 + $0x808] sm:$0xff] }
 0x2d1   : > { %v3759_v9 = vmax.f32 %v3631_v43, %v3633_v20  ;;  %v3577_v10 = vadd.f32 %v10855_v56, %v3350_v0  ;;  %v11476_v55 = vadd.f32 %v10859_v57, %v3143_v62  ;;  %v3352_v61 = vpop.f32.mrb[37].mxu1  ;;  %7986 = vmatprep.subr.bf16.mxu0 %v7985_v45  ;;  %8050 = vmatprep.subr.bf16.mxu1 %v8049_v21  ;;  %v3952_v43 = vld [vmem:[%s13392_s3 + $0x3c8] sm:$0xff]  ;;  %v7055_v0 = vld [vmem:[%s13392_s3 + $0x818] sm:$0xff] }
 0x2d2   : > { %v3760_v33 = vmax.f32 %v3632_v39, %v3634_v60  ;;  %v3578_v36 = vadd.f32 %v10863_v58, %v3352_v61  ;;  %v7991_v45 = vpack.c.bf16 %v3947_v7, %v3943_v6  ;;  %v11501_v39 = vld [vmem:[%s13392_s3 + $0x3c0] sm:$0xff]  ;;  %v8055_v22 = vpack.c.bf16 %v3949_v31, %v3945_v30  ;;  %v11528_v20 = vld [vmem:[%s13392_s3 + $0x828] sm:$0xff]  ;;  %v7059_v62 = vld [vmem:[%s13392_s3 + $0x838] sm:$0xff] }
 0x2d3   : > { %v3635_v44 = vmax.f32 %v11466_v63, %v3577_v10  ;;  %v3147_v42 = vpop.f32.mrb[38].mxu0  ;;  %v7993_v63 = vpack.c.bf16 %v3956_v28, %v3952_v43  ;;  %v8057_v7 = vpack.c.bf16 %v3958_v41, %v3954_v37  ;;  %v3768_v10 = vmax.f32 %v10879_v34, 0.0 }
 0x2d4   : > { %v11513_v14 = vmax.f32 %v3760_v33, 0.0  ;;  %v3636_v12 = vmax.f32 %v11476_v55, %v3578_v36  ;;  %7988 = vmatpush1.bf16.msra.mxu0 %v7987_v47  ;;  %8052 = vmatpush1.bf16.msra.mxu1 %v8051_v51  ;;  %v3579_v17 = vadd.f32 %v10851_v54, %v3147_v42  ;;  %v3356_v18 = vpop.f32.mrb[38].mxu1  ;;  %v3149_v21 = vpop.f32.mrb[39].mxu0  ;;  %v11530_v47 = vmax.f32 %v3759_v9, 0.0  ;;  %v7052_v42 = vld [vmem:[%s13392_s3 + $0x800] sm:$0xff] }
 0x2d5   : > { %v3581_v48 = vadd.f32 %v10855_v56, %v3356_v18  ;;  %v3580_v51 = vadd.f32 %v10859_v57, %v3149_v21  ;;  %v3358_v60 = vpop.f32.mrb[39].mxu1  ;;  %7990 = vmatprep.subr.bf16.mxu0 %v7989_v59  ;;  %8054 = vmatprep.subr.bf16.mxu1 %v8053_v1  ;;  %v7995_v59 = vpack.c.bf16 %v11506_v11, %v11501_v39  ;;  %v7065_v18 = vld [vmem:[%s13392_s3 + $0x868] sm:$0xff] }
 0x2d6   : > { %v3582_v6 = vadd.f32 %v10863_v58, %v3358_v60  ;;  %4211 = vmatprep.mubr.f32.mxu0 %v11513_v14  ;;  %4324 = vmatprep.mubr.f32.mxu1 %v11513_v14  ;;  %v8059_v55 = vpack.c.bf16 %v3957_v23, %v11511_v13  ;;  %v8061_v61 = vpack.c.bf16 %v11528_v20, %v11523_v46  ;;  %v7058_v13 = vld [vmem:[%s13392_s3 + $0x830] sm:$0xff]  ;;  %v7067_v23 = vld [vmem:[%s13392_s3 + $0x878] sm:$0xff]  ;;  %v11591_v46 = vld [vmem:[%s13392_s3 + $0x840] sm:$0xff] }
 0x2d7   : > { %v3637_v1 = vmax.f32 %v3579_v17, %v3581_v48  ;;  %4212 = vmatmul.mubr.f32.gmra.mrb[62].mxu0 %v11530_v47  ;;  %4325 = vmatmul.mubr.f32.gmra.mrb[62].mxu1 %v11530_v47  ;;  %v3153_v9 = vpop.f32.mrb[40].mxu0  ;;  %v8125_v36 = vpack.c.bf16 %v7059_v62, %v7055_v0  ;;  %v7061_v17 = vld [vmem:[%s13392_s3 + $0x848] sm:$0xff]  ;;  %v7064_v0 = vld [vmem:[%s13392_s3 + $0x860] sm:$0xff]  ;;  %v7062_v62 = vld [vmem:[%s13392_s3 + $0x850] sm:$0xff] }
 0x2d8   : > { %v3638_v30 = vmax.f32 %v3580_v51, %v3582_v6  ;;  %7992 = vmatpush1.bf16.msra.mxu0 %v7991_v45  ;;  %8056 = vmatpush1.bf16.msra.mxu1 %v8055_v22  ;;  %v11552_v31 = vadd.f32 %v10851_v54, %v3153_v9  ;;  %v3362_v43 = vpop.f32.mrb[40].mxu1  ;;  %v3155_v33 = vpop.f32.mrb[41].mxu0  ;;  %v7056_v45 = vld [vmem:[%s13392_s3 + $0x820] sm:$0xff]  ;;  %v7063_v22 = vld [vmem:[%s13392_s3 + $0x858] sm:$0xff]  ;;  %v7066_v6 = vld [vmem:[%s13392_s3 + $0x870] sm:$0xff] }
 0x2d9   : > { %v11554_v28 = vmax.f32 %v3635_v44, %v3637_v1  ;;  %v3585_v37 = vadd.f32 %v10855_v56, %v3362_v43  ;;  %4395 = vmatprep.mubr.f32.mxu0 %v3768_v10  ;;  %4508 = vmatprep.mubr.f32.mxu1 %v3768_v10  ;;  %v11558_v34 = vadd.f32 %v10859_v57, %v3155_v33  ;;  %v3364_v41 = vpop.f32.mrb[41].mxu1  ;;  %v7054_v44 = vld [vmem:[%s13392_s3 + $0x810] sm:$0xff] }
 0x2da   : > { %v11569_v39 = vmax.f32 %v3636_v12, %v3638_v30  ;;  %v3586_v11 = vadd.f32 %v10863_v58, %v3364_v41  ;;  %7994 = vmatprep.subr.bf16.mxu0 %v7993_v63  ;;  %8058 = vmatprep.subr.bf16.mxu1 %v8057_v7  ;;  %v8063_v63 = vpack.c.bf16 %v7056_v45, %v7052_v42  ;;  %v3767_v7 = vmax.f32 %v10874_v29, 0.0  ;;  %v7073_v30 = vld [vmem:[%s13392_s3 + $0x8a8] sm:$0xff]  ;;  %v7075_v41 = vld [vmem:[%s13392_s3 + $0x8b8] sm:$0xff] }
 0x2db   : > { %v3639_v21 = vmax.f32 %v11552_v31, %v3585_v37  ;;  %v3159_v12 = vpop.f32.mrb[42].mxu0  ;;  %v8127_v10 = vpack.c.bf16 %v7058_v13, %v7054_v44  ;;  %v8065_v43 = vpack.c.bf16 %v7065_v18, %v7061_v17  ;;  %v8129_v29 = vpack.c.bf16 %v7067_v23, %v7063_v22  ;;  %v7072_v23 = vld [vmem:[%s13392_s3 + $0x8a0] sm:$0xff] }
 0x2dc   : > { %v3640_v20 = vmax.f32 %v11558_v34, %v3586_v11  ;;  %7996 = vmatpush1.bf16.msra.mxu0 %v7995_v59  ;;  %8060 = vmatpush1.bf16.msra.mxu1 %v8059_v55  ;;  %v3587_v48 = vadd.f32 %v10851_v54, %v3159_v12  ;;  %v3368_v51 = vpop.f32.mrb[42].mxu1  ;;  %v3161_v60 = vpop.f32.mrb[43].mxu0  ;;  %v7069_v55 = vld [vmem:[%s13392_s3 + $0x888] sm:$0xff]  ;;  %v7071_v34 = vld [vmem:[%s13392_s3 + $0x898] sm:$0xff] }
 0x2dd   : > { %v3589_v59 = vadd.f32 %v10855_v56, %v3368_v51  ;;  %v3588_v1 = vadd.f32 %v10859_v57, %v3161_v60  ;;  %v3370_v9 = vpop.f32.mrb[43].mxu1  ;;  %8062 = vmatprep.subr.bf16.mxu0 %v8061_v61  ;;  %8126 = vmatprep.subr.bf16.mxu1 %v8125_v36  ;;  %v8067_v61 = vpack.c.bf16 %v7064_v0, %v11591_v46  ;;  %v7070_v51 = vld [vmem:[%s13392_s3 + $0x890] sm:$0xff] }
 0x2de   : > { %v3590_v31 = vadd.f32 %v10863_v58, %v3370_v9  ;;  %v8131_v36 = vpack.c.bf16 %v7066_v6, %v7062_v62  ;;  %v8069_v13 = vpack.c.bf16 %v7073_v30, %v7069_v55  ;;  %v7074_v60 = vld [vmem:[%s13392_s3 + $0x8b0] sm:$0xff]  ;;  %v7081_v62 = vld [vmem:[%s13392_s3 + $0x8e8] sm:$0xff]  ;;  %v7079_v6 = vld [vmem:[%s13392_s3 + $0x8d8] sm:$0xff] }
 0x2df   : > { %v3641_v33 = vmax.f32 %v3587_v48, %v3589_v59  ;;  %4396 = vmatmul.mubr.f32.vlgmr.msra.gmra.mrb[48].mxu0 %v3767_v7  ;;  %4509 = vmatmul.mubr.f32.vlgmr.msra.gmra.mrb[48].mxu1 %v3767_v7  ;;  %v3165_v37 = vpop.f32.mrb[44].mxu0  ;;  %v8133_v48 = vpack.c.bf16 %v7075_v41, %v7071_v34  ;;  %v7083_v7 = vld [vmem:[%s13392_s3 + $0x8f8] sm:$0xff] }
 0x2e0   : > { %v3642_v42 = vmax.f32 %v3588_v1, %v3590_v31  ;;  %4401 = vmatprep.mubr.f32.mxu0 %v10922_v8  ;;  %4514 = vmatprep.mubr.f32.mxu1 %v10922_v8  ;;  %v11624_v45 = vadd.f32 %v10851_v54, %v3165_v37  ;;  %v3374_v44 = vpop.f32.mrb[44].mxu1  ;;  %v3167_v11 = vpop.f32.mrb[45].mxu0  ;;  %v7068_v8 = vld [vmem:[%s13392_s3 + $0x880] sm:$0xff]  ;;  %v7087_v41 = vld [vmem:[%s13392_s3 + $0x918] sm:$0xff] }
 0x2e1   : > { %v11626_v17 = vmax.f32 %v3639_v21, %v3641_v33  ;;  %8064 = vmatpush1.bf16.msra.mxu0 %v8063_v63  ;;  %8128 = vmatpush1.bf16.msra.mxu1 %v8127_v10  ;;  %v3593_v18 = vadd.f32 %v10855_v56, %v3374_v44  ;;  %v11630_v12 = vadd.f32 %v10859_v57, %v3167_v11  ;;  %v3376_v22 = vpop.f32.mrb[45].mxu1  ;;  %v7077_v63 = vld [vmem:[%s13392_s3 + $0x8c8] sm:$0xff]  ;;  %v7080_v33 = vld [vmem:[%s13392_s3 + $0x8e0] sm:$0xff] }
 0x2e2   : > { %v11638_v46 = vmax.f32 %v3640_v20, %v3642_v42  ;;  %v3594_v21 = vadd.f32 %v10863_v58, %v3376_v22  ;;  %8066 = vmatprep.subr.bf16.mxu0 %v8065_v43  ;;  %8130 = vmatprep.subr.bf16.mxu1 %v8129_v29  ;;  %v8071_v10 = vpack.c.bf16 %v7072_v23, %v7068_v8  ;;  %v7076_v29 = vld [vmem:[%s13392_s3 + $0x8c0] sm:$0xff]  ;;  %v7091_v42 = vld [vmem:[%s13392_s3 + $0x938] sm:$0xff]  ;;  %v7086_v23 = vld [vmem:[%s13392_s3 + $0x910] sm:$0xff] }
 0x2e3   : > { %v3643_v20 = vmax.f32 %v11624_v45, %v3593_v18  ;;  %4402 = vmatmul.mubr.f32.gmra.mrb[50].mxu0 %v10938_v26  ;;  %4515 = vmatmul.mubr.f32.gmra.mrb[50].mxu1 %v10938_v26  ;;  %v3171_v0 = vpop.f32.mrb[46].mxu0  ;;  %v8135_v43 = vpack.c.bf16 %v7074_v60, %v7070_v51  ;;  %v8073_v37 = vpack.c.bf16 %v7081_v62, %v7077_v63  ;;  %v7088_v18 = vld [vmem:[%s13392_s3 + $0x920] sm:$0xff]  ;;  %v7097_v60 = vld [vmem:[%s13392_s3 + $0x968] sm:$0xff]  ;;  %v7095_v63 = vld [vmem:[%s13392_s3 + $0x958] sm:$0xff] }
 0x2e4   : > { %v3644_v59 = vmax.f32 %v11630_v12, %v3594_v21  ;;  %4407 = vmatprep.mubr.f32.mxu0 %v11003_v5  ;;  %4520 = vmatprep.mubr.f32.mxu1 %v11003_v5  ;;  %v3595_v26 = vadd.f32 %v10851_v54, %v3171_v0  ;;  %v3380_v1 = vpop.f32.mrb[46].mxu1  ;;  %v3173_v9 = vpop.f32.mrb[47].mxu0  ;;  %v8075_v44 = vpack.c.bf16 %v7080_v33, %v7076_v29  ;;  %v7090_v21 = vld [vmem:[%s13392_s3 + $0x930] sm:$0xff]  ;;  %v7100_v33 = vld [vmem:[%s13392_s3 + $0x980] sm:$0xff] }
 0x2e5   : > { %8068 = vmatpush1.bf16.msra.mxu0 %v8067_v61  ;;  %8132 = vmatpush1.bf16.msra.mxu1 %v8131_v36  ;;  %v3597_v55 = vadd.f32 %v10855_v56, %v3380_v1  ;;  %v3596_v30 = vadd.f32 %v10859_v57, %v3173_v9  ;;  %v3382_v31 = vpop.f32.mrb[47].mxu1  ;;  %v8137_v61 = vpack.c.bf16 %v7083_v7, %v7079_v6  ;;  %v7078_v56 = vld [vmem:[%s13392_s3 + $0x8d0] sm:$0xff]  ;;  %v7085_v36 = vld [vmem:[%s13392_s3 + $0x908] sm:$0xff]  ;;  %v7092_v6 = vld [vmem:[%s13392_s3 + $0x940] sm:$0xff] }
 0x2e6   : > { %v3598_v54 = vadd.f32 %v10863_v58, %v3382_v31  ;;  %8070 = vmatprep.subr.bf16.mxu0 %v8069_v13  ;;  %8134 = vmatprep.subr.bf16.mxu1 %v8133_v48  ;;  %v7082_v57 = vld [vmem:[%s13392_s3 + $0x8f0] sm:$0xff]  ;;  %v7089_v58 = vld [vmem:[%s13392_s3 + $0x928] sm:$0xff]  ;;  %v7084_v13 = vld [vmem:[%s13392_s3 + $0x900] sm:$0xff]  ;;  %v8141_v8 = vpack.c.bf16 %v7091_v42, %v7087_v41  ;;  %v8143_v62 = vpack.c.bf16 %v7090_v21, %v7086_v23 }
 0x2e7   : > { %v3645_v34 = vmax.f32 %v3595_v26, %v3597_v55  ;;  %4408 = vmatmul.mubr.f32.gmra.mrb[52].mxu0 %v11020_v19  ;;  %4521 = vmatmul.mubr.f32.gmra.mrb[52].mxu1 %v11020_v19  ;;  %v8139_v11 = vpack.c.bf16 %v7082_v57, %v7078_v56  ;;  %v8077_v22 = vpack.c.bf16 %v7089_v58, %v7085_v36  ;;  %v7093_v48 = vld [vmem:[%s13392_s3 + $0x948] sm:$0xff]  ;;  %v7096_v7 = vld [vmem:[%s13392_s3 + $0x960] sm:$0xff]  ;;  %v7094_v1 = vld [vmem:[%s13392_s3 + $0x950] sm:$0xff] }
 0x2e8   : > { %v3646_v45 = vmax.f32 %v3596_v30, %v3598_v54  ;;  %4413 = vmatprep.mubr.f32.mxu0 %v11088_v2  ;;  %4526 = vmatprep.mubr.f32.mxu1 %v11088_v2  ;;  %v8079_v0 = vpack.c.bf16 %v7088_v18, %v7084_v13  ;;  %v7098_v9 = vld [vmem:[%s13392_s3 + $0x970] sm:$0xff]  ;;  %v7105_v55 = vld [vmem:[%s13392_s3 + $0x9a8] sm:$0xff]  ;;  %v7103_v30 = vld [vmem:[%s13392_s3 + $0x998] sm:$0xff] }
 0x2e9   : > { %8072 = vmatpush1.bf16.msra.mxu0 %v8071_v10  ;;  %8136 = vmatpush1.bf16.msra.mxu1 %v8135_v43  ;;  %v11703_v12 = vmax.f32 %v3643_v20, %v3645_v34  ;;  %v7099_v20 = vld [vmem:[%s13392_s3 + $0x978] sm:$0xff]  ;;  %v7101_v10 = vld [vmem:[%s13392_s3 + $0x988] sm:$0xff]  ;;  %v8083_v43 = vpack.c.bf16 %v7096_v7, %v7092_v6  ;;  %v8147_v29 = vpack.c.bf16 %v7098_v9, %v7094_v1  ;;  %v7104_v54 = vld [vmem:[%s13392_s3 + $0x9a0] sm:$0xff] }
 0x2ea   : > { %8074 = vmatprep.subr.bf16.mxu0 %v8073_v37  ;;  %8138 = vmatprep.subr.bf16.mxu1 %v8137_v61  ;;  %v11714_v51 = vmax.f32 %v3644_v59, %v3646_v45  ;;  %v8081_v59 = vpack.c.bf16 %v7097_v60, %v7093_v48  ;;  %v8145_v26 = vpack.c.bf16 %v7099_v20, %v7095_v63  ;;  %v7107_v31 = vld [vmem:[%s13392_s3 + $0x9b8] sm:$0xff]  ;;  %v7102_v56 = vld [vmem:[%s13392_s3 + $0x990] sm:$0xff]  ;;  %v7109_v36 = vld [vmem:[%s13392_s3 + $0x9c8] sm:$0xff] }
 0x2eb   : > { %4414 = vmatmul.mubr.f32.gmra.mrb[54].mxu0 %v11105_v15  ;;  %4527 = vmatmul.mubr.f32.gmra.mrb[54].mxu1 %v11105_v15  ;;  %v8085_v37 = vpack.c.bf16 %v7105_v55, %v7101_v10  ;;  %v8149_v61 = vpack.c.bf16 %v7107_v31, %v7103_v30  ;;  %v7106_v57 = vld [vmem:[%s13392_s3 + $0x9b0] sm:$0xff]  ;;  %v7113_v34 = vld [vmem:[%s13392_s3 + $0x9e8] sm:$0xff]  ;;  %v7111_v58 = vld [vmem:[%s13392_s3 + $0x9d8] sm:$0xff]  ;;  %v8087_v42 = vpack.c.bf16 %v7104_v54, %v7100_v33 }
 0x2ec   : > { %4419 = vmatprep.mubr.f32.mxu0 %v11173_v4  ;;  %4532 = vmatprep.mubr.f32.mxu1 %v11173_v4  ;;  %v7115_v41 = vld [vmem:[%s13392_s3 + $0x9f8] sm:$0xff]  ;;  %v8151_v45 = vpack.c.bf16 %v7106_v57, %v7102_v56  ;;  %v8089_v13 = vpack.c.bf16 %v7113_v34, %v7109_v36  ;;  %v7117_v23 = vld [vmem:[%s13392_s3 + $0xa08] sm:$0xff] }
 0x2ed   : > { %8076 = vmatpush1.bf16.msra.mxu0 %v8075_v44  ;;  %8140 = vmatpush1.bf16.msra.mxu1 %v8139_v11  ;;  %v7108_v44 = vld [vmem:[%s13392_s3 + $0x9c0] sm:$0xff]  ;;  %v8153_v18 = vpack.c.bf16 %v7115_v41, %v7111_v58  ;;  %v7121_v21 = vld [vmem:[%s13392_s3 + $0xa28] sm:$0xff]  ;;  %v7119_v48 = vld [vmem:[%s13392_s3 + $0xa18] sm:$0xff] }
 0x2ee   : > { %8078 = vmatprep.subr.bf16.mxu0 %v8077_v22  ;;  %8142 = vmatprep.subr.bf16.mxu1 %v8141_v8  ;;  %v7112_v11 = vld [vmem:[%s13392_s3 + $0x9e0] sm:$0xff]  ;;  %v7110_v22 = vld [vmem:[%s13392_s3 + $0x9d0] sm:$0xff]  ;;  %v7123_v60 = vld [vmem:[%s13392_s3 + $0xa38] sm:$0xff]  ;;  %v8093_v6 = vpack.c.bf16 %v7121_v21, %v7117_v23 }
 0x2ef   : > { %4420 = vmatmul.mubr.f32.gmra.mrb[56].mxu0 %v11190_v25  ;;  %4533 = vmatmul.mubr.f32.gmra.mrb[56].mxu1 %v11190_v25  ;;  %v7114_v8 = vld [vmem:[%s13392_s3 + $0x9f0] sm:$0xff]  ;;  %v8091_v63 = vpack.c.bf16 %v7112_v11, %v7108_v44  ;;  %v8157_v7 = vpack.c.bf16 %v7123_v60, %v7119_v48  ;;  %v7125_v1 = vld [vmem:[%s13392_s3 + $0xa48] sm:$0xff]  ;;  %v7127_v10 = vld [vmem:[%s13392_s3 + $0xa58] sm:$0xff] }
 0x2f0   : > { %4425 = vmatprep.mubr.f32.mxu0 %v11258_v27  ;;  %4538 = vmatprep.mubr.f32.mxu1 %v11258_v27  ;;  %v8155_v20 = vpack.c.bf16 %v7114_v8, %v7110_v22  ;;  %v7129_v9 = vld [vmem:[%s13392_s3 + $0xa68] sm:$0xff]  ;;  %v7131_v55 = vld [vmem:[%s13392_s3 + $0xa78] sm:$0xff]  ;;  %v7132_v41 = vld [vmem:[%s13392_s3 + $0xa80] sm:$0xff] }
 0x2f1   : > { %8080 = vmatpush1.bf16.msra.mxu0 %v8079_v0  ;;  %8144 = vmatpush1.bf16.msra.mxu1 %v8143_v62  ;;  %v7116_v0 = vld [vmem:[%s13392_s3 + $0xa00] sm:$0xff]  ;;  %v8097_v33 = vpack.c.bf16 %v7129_v9, %v7125_v1  ;;  %v8161_v54 = vpack.c.bf16 %v7131_v55, %v7127_v10  ;;  %v7137_v56 = vld [vmem:[%s13392_s3 + $0xaa8] sm:$0xff]  ;;  %v7135_v57 = vld [vmem:[%s13392_s3 + $0xa98] sm:$0xff] }
 0x2f2   : > { %8082 = vmatprep.subr.bf16.mxu0 %v8081_v59  ;;  %8146 = vmatprep.subr.bf16.mxu1 %v8145_v26  ;;  %v7120_v62 = vld [vmem:[%s13392_s3 + $0xa20] sm:$0xff]  ;;  %v7118_v59 = vld [vmem:[%s13392_s3 + $0xa10] sm:$0xff]  ;;  %v7139_v36 = vld [vmem:[%s13392_s3 + $0xab8] sm:$0xff] }
 0x2f3   : > { %4426 = vmatmul.mubr.f32.gmra.mrb[58].mxu0 %v11275_v32  ;;  %4539 = vmatmul.mubr.f32.gmra.mrb[58].mxu1 %v11275_v32  ;;  %v7122_v26 = vld [vmem:[%s13392_s3 + $0xa30] sm:$0xff]  ;;  %v8095_v30 = vpack.c.bf16 %v7120_v62, %v7116_v0  ;;  %v8165_v44 = vpack.c.bf16 %v7139_v36, %v7135_v57  ;;  %v7145_v22 = vld [vmem:[%s13392_s3 + $0xae8] sm:$0xff]  ;;  %v7143_v8 = vld [vmem:[%s13392_s3 + $0xad8] sm:$0xff] }
 0x2f4   : > { %4431 = vmatprep.mubr.f32.mxu0 %v11343_v24  ;;  %4544 = vmatprep.mubr.f32.mxu1 %v11343_v24  ;;  %v8159_v31 = vpack.c.bf16 %v7122_v26, %v7118_v59  ;;  %v7134_v11 = vld [vmem:[%s13392_s3 + $0xa90] sm:$0xff]  ;;  %v7147_v23 = vld [vmem:[%s13392_s3 + $0xaf8] sm:$0xff]  ;;  %v7140_v60 = vld [vmem:[%s13392_s3 + $0xac0] sm:$0xff] }
 0x2f5   : > { %8084 = vmatpush1.bf16.msra.mxu0 %v8083_v43  ;;  %8148 = vmatpush1.bf16.msra.mxu1 %v8147_v29  ;;  %v7124_v43 = vld [vmem:[%s13392_s3 + $0xa40] sm:$0xff]  ;;  %v8169_v0 = vpack.c.bf16 %v7147_v23, %v7143_v8  ;;  %v7142_v62 = vld [vmem:[%s13392_s3 + $0xad0] sm:$0xff]  ;;  %v7153_v59 = vld [vmem:[%s13392_s3 + $0xb28] sm:$0xff] }
 0x2f6   : > { %8086 = vmatprep.subr.bf16.mxu0 %v8085_v37  ;;  %8150 = vmatprep.subr.bf16.mxu1 %v8149_v61  ;;  %v7128_v29 = vld [vmem:[%s13392_s3 + $0xa60] sm:$0xff]  ;;  %v7130_v37 = vld [vmem:[%s13392_s3 + $0xa70] sm:$0xff]  ;;  %v7133_v61 = vld [vmem:[%s13392_s3 + $0xa88] sm:$0xff] }
 0x2f7   : > { %4432 = vmatmul.mubr.f32.gmra.mrb[60].mxu0 %v11360_v40  ;;  %4545 = vmatmul.mubr.f32.gmra.mrb[60].mxu1 %v11360_v40  ;;  %v8099_v34 = vpack.c.bf16 %v7128_v29, %v7124_v43  ;;  %v7151_v26 = vld [vmem:[%s13392_s3 + $0xb18] sm:$0xff]  ;;  %v7148_v55 = vld [vmem:[%s13392_s3 + $0xb00] sm:$0xff]  ;;  %v7150_v29 = vld [vmem:[%s13392_s3 + $0xb10] sm:$0xff] }
 0x2f8   : > { %4437 = vmatprep.mubr.f32.mxu0 %v11428_v38  ;;  %4550 = vmatprep.mubr.f32.mxu1 %v11428_v38  ;;  %v7155_v1 = vld [vmem:[%s13392_s3 + $0xb38] sm:$0xff]  ;;  %v7156_v36 = vld [vmem:[%s13392_s3 + $0xb40] sm:$0xff] }
 0x2f9   : > { %8088 = vmatpush1.bf16.msra.mxu0 %v8087_v42  ;;  %8152 = vmatpush1.bf16.msra.mxu1 %v8151_v45  ;;  %v7136_v42 = vld [vmem:[%s13392_s3 + $0xaa0] sm:$0xff]  ;;  %v8101_v45 = vpack.c.bf16 %v7137_v56, %v7133_v61  ;;  %v8173_v43 = vpack.c.bf16 %v7155_v1, %v7151_v26  ;;  %v7163_v61 = vld [vmem:[%s13392_s3 + $0xb78] sm:$0xff] }
 0x2fa   : > { %8090 = vmatprep.subr.bf16.mxu0 %v8089_v13  ;;  %8154 = vmatprep.subr.bf16.mxu1 %v8153_v18  ;;  %v7138_v13 = vld [vmem:[%s13392_s3 + $0xab0] sm:$0xff]  ;;  %v7141_v18 = vld [vmem:[%s13392_s3 + $0xac8] sm:$0xff]  ;;  %v8103_v21 = vpack.c.bf16 %v7136_v42, %v7132_v41  ;;  %v7164_v23 = vld [vmem:[%s13392_s3 + $0xb80] sm:$0xff] }
 0x2fb   : > { %4438 = vmatmul.mubr.f32.gmra.mrb[62].mxu0 %v11445_v16  ;;  %4551 = vmatmul.mubr.f32.gmra.mrb[62].mxu1 %v11445_v16  ;;  %v8167_v48 = vpack.c.bf16 %v7138_v13, %v7134_v11  ;;  %v7158_v42 = vld [vmem:[%s13392_s3 + $0xb50] sm:$0xff]  ;;  %v7169_v11 = vld [vmem:[%s13392_s3 + $0xba8] sm:$0xff]  ;;  %v7167_v13 = vld [vmem:[%s13392_s3 + $0xb98] sm:$0xff] }
 0x2fc   : > { %4767 = vmatprep.mubr.f32.mxu0 %v11003_v5  ;;  %4880 = vmatprep.mubr.f32.mxu1 %v11003_v5  ;;  %v7126_v5 = vld [vmem:[%s13392_s3 + $0xa50] sm:$0xff]  ;;  %v7172_v1 = vld [vmem:[%s13392_s3 + $0xbc0] sm:$0xff] }
 0x2fd   : > { %8092 = vmatpush1.bf16.msra.mxu0 %v8091_v63  ;;  %8156 = vmatpush1.bf16.msra.mxu1 %v8155_v20  ;;  %v8163_v58 = vpack.c.bf16 %v7130_v37, %v7126_v5  ;;  %v7144_v63 = vld [vmem:[%s13392_s3 + $0xae0] sm:$0xff]  ;;  %v8105_v20 = vpack.c.bf16 %v7145_v22, %v7141_v18  ;;  %v7161_v5 = vld [vmem:[%s13392_s3 + $0xb68] sm:$0xff]  ;;  %v7159_v37 = vld [vmem:[%s13392_s3 + $0xb58] sm:$0xff] }
 0x2fe   : > { %8094 = vmatprep.subr.bf16.mxu0 %v8093_v6  ;;  %8158 = vmatprep.subr.bf16.mxu1 %v8157_v7  ;;  %v7146_v6 = vld [vmem:[%s13392_s3 + $0xaf0] sm:$0xff]  ;;  %v7149_v7 = vld [vmem:[%s13392_s3 + $0xb08] sm:$0xff]  ;;  %v8107_v9 = vpack.c.bf16 %v7144_v63, %v7140_v60  ;;  %v8177_v41 = vpack.c.bf16 %v7163_v61, %v7159_v37  ;;  %v7171_v18 = vld [vmem:[%s13392_s3 + $0xbb8] sm:$0xff] }
 0x2ff   : > { %v8171_v10 = vpack.c.bf16 %v7146_v6, %v7142_v62  ;;  %v8181_v60 = vpack.c.bf16 %v7171_v18, %v7167_v13  ;;  %v7166_v63 = vld [vmem:[%s13392_s3 + $0xb90] sm:$0xff]  ;;  %v7177_v62 = vld [vmem:[%s13392_s3 + $0xbe8] sm:$0xff]  ;;  %v7175_v6 = vld [vmem:[%s13392_s3 + $0xbd8] sm:$0xff] }
 0x300   : > { %v7188_v18 = vld [vmem:[%s13392_s3 + $0xc40] sm:$0xff] }
 0x301   : > { %8096 = vmatpush1.bf16.msra.mxu0 %v8095_v30  ;;  %8160 = vmatpush1.bf16.msra.mxu1 %v8159_v31  ;;  %v7152_v30 = vld [vmem:[%s13392_s3 + $0xb20] sm:$0xff]  ;;  %v8109_v31 = vpack.c.bf16 %v7153_v59, %v7149_v7  ;;  %v7179_v7 = vld [vmem:[%s13392_s3 + $0xbf8] sm:$0xff] }
 0x302   : > { %8098 = vmatprep.subr.bf16.mxu0 %v8097_v33  ;;  %8162 = vmatprep.subr.bf16.mxu1 %v8161_v54  ;;  %v7154_v33 = vld [vmem:[%s13392_s3 + $0xb30] sm:$0xff]  ;;  %v7157_v54 = vld [vmem:[%s13392_s3 + $0xb48] sm:$0xff]  ;;  %v8111_v56 = vpack.c.bf16 %v7152_v30, %v7148_v55  ;;  %v8185_v55 = vpack.c.bf16 %v7179_v7, %v7175_v6  ;;  %v7196_v6 = vld [vmem:[%s13392_s3 + $0xc80] sm:$0xff] }
 0x303   : > { %v8175_v57 = vpack.c.bf16 %v7154_v33, %v7150_v29  ;;  %v7174_v30 = vld [vmem:[%s13392_s3 + $0xbd0] sm:$0xff]  ;;  %v7185_v29 = vld [vmem:[%s13392_s3 + $0xc28] sm:$0xff]  ;;  %v7183_v33 = vld [vmem:[%s13392_s3 + $0xc18] sm:$0xff] }
 0x304   : > { %v7200_v7 = vld [vmem:[%s13392_s3 + $0xca0] sm:$0xff] }
 0x305   : > { %8100 = vmatpush1.bf16.msra.mxu0 %v8099_v34  ;;  %8164 = vmatpush1.bf16.msra.mxu1 %v8163_v58  ;;  %v7160_v34 = vld [vmem:[%s13392_s3 + $0xb60] sm:$0xff]  ;;  %v8113_v58 = vpack.c.bf16 %v7161_v5, %v7157_v54  ;;  %v7187_v54 = vld [vmem:[%s13392_s3 + $0xc38] sm:$0xff] }
 0x306   : > { %8102 = vmatprep.subr.bf16.mxu0 %v8101_v45  ;;  %8166 = vmatprep.subr.bf16.mxu1 %v8165_v44  ;;  %v7162_v45 = vld [vmem:[%s13392_s3 + $0xb70] sm:$0xff]  ;;  %v7165_v44 = vld [vmem:[%s13392_s3 + $0xb88] sm:$0xff]  ;;  %v8115_v22 = vpack.c.bf16 %v7160_v34, %v7156_v36  ;;  %v7184_v36 = vld [vmem:[%s13392_s3 + $0xc20] sm:$0xff] }
 0x307   : > { %v8179_v8 = vpack.c.bf16 %v7162_v45, %v7158_v42  ;;  %v7182_v34 = vld [vmem:[%s13392_s3 + $0xc10] sm:$0xff]  ;;  %v7193_v42 = vld [vmem:[%s13392_s3 + $0xc68] sm:$0xff]  ;;  %v7191_v45 = vld [vmem:[%s13392_s3 + $0xc58] sm:$0xff] }
 0x309   : > { %8104 = vmatpush1.bf16.msra.mxu0 %v8103_v21  ;;  %8168 = vmatpush1.bf16.msra.mxu1 %v8167_v48  ;;  %v7168_v21 = vld [vmem:[%s13392_s3 + $0xba0] sm:$0xff]  ;;  %v8117_v48 = vpack.c.bf16 %v7169_v11, %v7165_v44  ;;  %v7195_v44 = vld [vmem:[%s13392_s3 + $0xc78] sm:$0xff] }
 0x30a   : > { %8106 = vmatprep.subr.bf16.mxu0 %v8105_v20  ;;  %8170 = vmatprep.subr.bf16.mxu1 %v8169_v0  ;;  %v7170_v20 = vld [vmem:[%s13392_s3 + $0xbb0] sm:$0xff]  ;;  %v7173_v0 = vld [vmem:[%s13392_s3 + $0xbc8] sm:$0xff]  ;;  %v8119_v59 = vpack.c.bf16 %v7168_v21, %v7164_v23  ;;  %v8257_v23 = vpack.c.bf16 %v7195_v44, %v7191_v45  ;;  %v7212_v45 = vld [vmem:[%s13392_s3 + $0xd00] sm:$0xff] }
 0x30b   : > { %v8183_v26 = vpack.c.bf16 %v7170_v20, %v7166_v63  ;;  %v7190_v21 = vld [vmem:[%s13392_s3 + $0xc50] sm:$0xff]  ;;  %v7201_v63 = vld [vmem:[%s13392_s3 + $0xca8] sm:$0xff]  ;;  %v7199_v20 = vld [vmem:[%s13392_s3 + $0xc98] sm:$0xff] }
 0x30c   : > { %v7216_v44 = vld [vmem:[%s13392_s3 + $0xd20] sm:$0xff] }
 0x30d   : > { %8108 = vmatpush1.bf16.msra.mxu0 %v8107_v9  ;;  %8172 = vmatpush1.bf16.msra.mxu1 %v8171_v10  ;;  %v7176_v9 = vld [vmem:[%s13392_s3 + $0xbe0] sm:$0xff]  ;;  %v8121_v10 = vpack.c.bf16 %v7177_v62, %v7173_v0  ;;  %v7203_v0 = vld [vmem:[%s13392_s3 + $0xcb8] sm:$0xff] }
 0x30e   : > { %8110 = vmatprep.subr.bf16.mxu0 %v8109_v31  ;;  %8174 = vmatprep.subr.bf16.mxu1 %v8173_v43  ;;  %v7178_v31 = vld [vmem:[%s13392_s3 + $0xbf0] sm:$0xff]  ;;  %v7181_v43 = vld [vmem:[%s13392_s3 + $0xc08] sm:$0xff]  ;;  %v8123_v5 = vpack.c.bf16 %v7176_v9, %v7172_v1 }
 0x30f   : > { %v8187_v37 = vpack.c.bf16 %v7178_v31, %v7174_v30  ;;  %v8189_v61 = vpack.c.bf16 %v7185_v29, %v7181_v43  ;;  %v7198_v1 = vld [vmem:[%s13392_s3 + $0xc90] sm:$0xff]  ;;  %v7207_v30 = vld [vmem:[%s13392_s3 + $0xcd8] sm:$0xff]  ;;  %v8199_v43 = vpack.c.bf16 %v7200_v7, %v7196_v6 }
 0x310   : > { %v7202_v9 = vld [vmem:[%s13392_s3 + $0xcb0] sm:$0xff]  ;;  %v7211_v31 = vld [vmem:[%s13392_s3 + $0xcf8] sm:$0xff] }
 0x311   : > { %8112 = vmatpush1.bf16.msra.mxu0 %v8111_v56  ;;  %8176 = vmatpush1.bf16.msra.mxu1 %v8175_v57  ;;  %v8253_v56 = vpack.c.bf16 %v7187_v54, %v7183_v33  ;;  %v7180_v57 = vld [vmem:[%s13392_s3 + $0xc00] sm:$0xff]  ;;  %v8263_v29 = vpack.c.bf16 %v7202_v9, %v7198_v1  ;;  %v7222_v6 = vld [vmem:[%s13392_s3 + $0xd50] sm:$0xff]  ;;  %v7231_v1 = vld [vmem:[%s13392_s3 + $0xd98] sm:$0xff] }
 0x312   : > { %8114 = vmatprep.subr.bf16.mxu0 %v8113_v58  ;;  %8178 = vmatprep.subr.bf16.mxu1 %v8177_v41  ;;  %v7186_v58 = vld [vmem:[%s13392_s3 + $0xc30] sm:$0xff]  ;;  %v7189_v41 = vld [vmem:[%s13392_s3 + $0xc48] sm:$0xff]  ;;  %v8191_v11 = vpack.c.bf16 %v7184_v36, %v7180_v57  ;;  %v7204_v33 = vld [vmem:[%s13392_s3 + $0xcc0] sm:$0xff] }
 0x313   : > { %v8255_v13 = vpack.c.bf16 %v7186_v58, %v7182_v34  ;;  %v7208_v54 = vld [vmem:[%s13392_s3 + $0xce0] sm:$0xff]  ;;  %v7213_v57 = vld [vmem:[%s13392_s3 + $0xd08] sm:$0xff]  ;;  %v7215_v34 = vld [vmem:[%s13392_s3 + $0xd18] sm:$0xff] }
 0x314   : > { %v7217_v36 = vld [vmem:[%s13392_s3 + $0xd28] sm:$0xff]  ;;  %v7219_v58 = vld [vmem:[%s13392_s3 + $0xd38] sm:$0xff]  ;;  %v7226_v7 = vld [vmem:[%s13392_s3 + $0xd70] sm:$0xff] }
 0x315   : > { %8116 = vmatpush1.bf16.msra.mxu0 %v8115_v22  ;;  %8180 = vmatpush1.bf16.msra.mxu1 %v8179_v8  ;;  %v7192_v22 = vld [vmem:[%s13392_s3 + $0xc60] sm:$0xff]  ;;  %v8193_v8 = vpack.c.bf16 %v7193_v42, %v7189_v41  ;;  %v8203_v41 = vpack.c.bf16 %v7208_v54, %v7204_v33  ;;  %v7235_v9 = vld [vmem:[%s13392_s3 + $0xdb8] sm:$0xff]  ;;  %v7230_v33 = vld [vmem:[%s13392_s3 + $0xd90] sm:$0xff] }
 0x316   : > { %8118 = vmatprep.subr.bf16.mxu0 %v8117_v48  ;;  %8182 = vmatprep.subr.bf16.mxu1 %v8181_v60  ;;  %v7194_v48 = vld [vmem:[%s13392_s3 + $0xc70] sm:$0xff]  ;;  %v7197_v60 = vld [vmem:[%s13392_s3 + $0xc88] sm:$0xff]  ;;  %v8195_v62 = vpack.c.bf16 %v7192_v22, %v7188_v18 }
 0x317   : > { %v7214_v18 = vld [vmem:[%s13392_s3 + $0xd10] sm:$0xff] }
 0x318   : > { %v7218_v22 = vld [vmem:[%s13392_s3 + $0xd30] sm:$0xff] }
 0x319   : > { %8120 = vmatpush1.bf16.msra.mxu0 %v8119_v59  ;;  %8184 = vmatpush1.bf16.msra.mxu1 %v8183_v26  ;;  %v8197_v59 = vpack.c.bf16 %v7201_v63, %v7197_v60  ;;  %v8261_v26 = vpack.c.bf16 %v7203_v0, %v7199_v20  ;;  %v8207_v60 = vpack.c.bf16 %v7216_v44, %v7212_v45  ;;  %v7220_v20 = vld [vmem:[%s13392_s3 + $0xd40] sm:$0xff]  ;;  %v7234_v54 = vld [vmem:[%s13392_s3 + $0xdb0] sm:$0xff] }
 0x31a   : > { %8122 = vmatprep.subr.bf16.mxu0 %v8121_v10  ;;  %8186 = vmatprep.subr.bf16.mxu1 %v8185_v55  ;;  %v7205_v10 = vld [vmem:[%s13392_s3 + $0xcc8] sm:$0xff]  ;;  %v8271_v63 = vpack.c.bf16 %v7218_v22, %v7214_v18  ;;  %v7224_v0 = vld [vmem:[%s13392_s3 + $0xd60] sm:$0xff]  ;;  %v7238_v44 = vld [vmem:[%s13392_s3 + $0xdd0] sm:$0xff] }
 0x31b   : > { %v7209_v55 = vld [vmem:[%s13392_s3 + $0xce8] sm:$0xff]  ;;  %v7247_v18 = vld [vmem:[%s13392_s3 + $0xe18] sm:$0xff] }
 0x31c   : > { %v7251_v22 = vld [vmem:[%s13392_s3 + $0xe38] sm:$0xff] }
 0x31d   : > { %8124 = vmatpush1.bf16.msra.mxu0 %v8123_v5  ;;  %8188 = vmatpush1.bf16.msra.mxu1 %v8187_v37  ;;  %v8201_v5 = vpack.c.bf16 %v7209_v55, %v7205_v10  ;;  %v8265_v37 = vpack.c.bf16 %v7211_v31, %v7207_v30  ;;  %v8211_v10 = vpack.c.bf16 %v7224_v0, %v7220_v20  ;;  %v7228_v30 = vld [vmem:[%s13392_s3 + $0xd80] sm:$0xff]  ;;  %v7250_v0 = vld [vmem:[%s13392_s3 + $0xe30] sm:$0xff] }
 0x31e   : > { %8190 = vmatprep.subr.bf16.mxu0 %v8189_v61  ;;  %8254 = vmatprep.subr.bf16.mxu1 %v8253_v56  ;;  %v7206_v61 = vld [vmem:[%s13392_s3 + $0xcd0] sm:$0xff]  ;;  %v8275_v55 = vpack.c.bf16 %v7226_v7, %v7222_v6  ;;  %v7232_v31 = vld [vmem:[%s13392_s3 + $0xda0] sm:$0xff]  ;;  %v8285_v20 = vpack.c.bf16 %v7251_v22, %v7247_v18  ;;  %v7255_v6 = vld [vmem:[%s13392_s3 + $0xe58] sm:$0xff] }
 0x31f   : > { %v7210_v56 = vld [vmem:[%s13392_s3 + $0xcf0] sm:$0xff]  ;;  %v7259_v7 = vld [vmem:[%s13392_s3 + $0xe78] sm:$0xff]  ;;  %v7272_v18 = vld [vmem:[%s13392_s3 + $0xee0] sm:$0xff] }
 0x320   : > { %4768 = vmatmul.mubr.f32.vlgmr.msra.gmra.mrb[48].mxu0 %v11020_v19  ;;  %4881 = vmatmul.mubr.f32.vlgmr.msra.gmra.mrb[48].mxu1 %v11020_v19  ;;  %v8259_v19 = vpack.c.bf16 %v7194_v48, %v7190_v21  ;;  %v8267_v42 = vpack.c.bf16 %v7210_v56, %v7206_v61  ;;  %v7223_v21 = vld [vmem:[%s13392_s3 + $0xd58] sm:$0xff] }
 0x321   : > { %4773 = vmatprep.mubr.f32.mxu0 %v11088_v2  ;;  %4886 = vmatprep.mubr.f32.mxu1 %v11088_v2  ;;  %v7227_v48 = vld [vmem:[%s13392_s3 + $0xd78] sm:$0xff] }
 0x322   : > { %8192 = vmatpush1.bf16.msra.mxu0 %v8191_v11  ;;  %8256 = vmatpush1.bf16.msra.mxu1 %v8255_v13  ;;  %v8205_v11 = vpack.c.bf16 %v7217_v36, %v7213_v57  ;;  %v8269_v13 = vpack.c.bf16 %v7219_v58, %v7215_v34  ;;  %v7239_v61 = vld [vmem:[%s13392_s3 + $0xdd8] sm:$0xff]  ;;  %v8215_v57 = vpack.c.bf16 %v7232_v31, %v7228_v30  ;;  %v7236_v34 = vld [vmem:[%s13392_s3 + $0xdc0] sm:$0xff]  ;;  %v7258_v30 = vld [vmem:[%s13392_s3 + $0xe70] sm:$0xff] }
 0x323   : > { %8194 = vmatprep.subr.bf16.mxu0 %v8193_v8  ;;  %8258 = vmatprep.subr.bf16.mxu1 %v8257_v23  ;;  %v7221_v8 = vld [vmem:[%s13392_s3 + $0xd48] sm:$0xff]  ;;  %v7243_v56 = vld [vmem:[%s13392_s3 + $0xdf8] sm:$0xff]  ;;  %v8279_v36 = vpack.c.bf16 %v7234_v54, %v7230_v33  ;;  %v7240_v58 = vld [vmem:[%s13392_s3 + $0xde0] sm:$0xff] }
 0x324   : > { %4774 = vmatmul.mubr.f32.gmra.mrb[50].mxu0 %v11105_v15  ;;  %4887 = vmatmul.mubr.f32.gmra.mrb[50].mxu1 %v11105_v15  ;;  %v7225_v23 = vld [vmem:[%s13392_s3 + $0xd68] sm:$0xff]  ;;  %v8281_v45 = vpack.c.bf16 %v7243_v56, %v7239_v61  ;;  %v7267_v33 = vld [vmem:[%s13392_s3 + $0xeb8] sm:$0xff]  ;;  %v7264_v61 = vld [vmem:[%s13392_s3 + $0xea0] sm:$0xff] }
 0x325   : > { %4779 = vmatprep.mubr.f32.mxu0 %v11173_v4  ;;  %4892 = vmatprep.mubr.f32.mxu1 %v11173_v4  ;;  %v7261_v31 = vld [vmem:[%s13392_s3 + $0xe88] sm:$0xff] }
 0x326   : > { %8196 = vmatpush1.bf16.msra.mxu0 %v8195_v62  ;;  %8260 = vmatpush1.bf16.msra.mxu1 %v8259_v19  ;;  %v8209_v62 = vpack.c.bf16 %v7225_v23, %v7221_v8  ;;  %v8273_v19 = vpack.c.bf16 %v7227_v48, %v7223_v21  ;;  %v12233_v8 = vmax.f32 %v11554_v28, 0.0  ;;  %v8219_v23 = vpack.c.bf16 %v7240_v58, %v7236_v34  ;;  %v7244_v48 = vld [vmem:[%s13392_s3 + $0xe00] sm:$0xff]  ;;  %v7246_v28 = vld [vmem:[%s13392_s3 + $0xe10] sm:$0xff]  ;;  %v7269_v58 = vld [vmem:[%s13392_s3 + $0xec8] sm:$0xff] }
 0x327   : > { %8198 = vmatprep.subr.bf16.mxu0 %v8197_v59  ;;  %8262 = vmatprep.subr.bf16.mxu1 %v8261_v26  ;;  %v7229_v59 = vld [vmem:[%s13392_s3 + $0xd88] sm:$0xff]  ;;  %v7266_v34 = vld [vmem:[%s13392_s3 + $0xeb0] sm:$0xff] }
 0x328   : > { %4780 = vmatmul.mubr.f32.gmra.mrb[52].mxu0 %v11190_v25  ;;  %4893 = vmatmul.mubr.f32.gmra.mrb[52].mxu1 %v11190_v25  ;;  %v7233_v26 = vld [vmem:[%s13392_s3 + $0xda8] sm:$0xff] }
 0x329   : > { %4785 = vmatprep.mubr.f32.mxu0 %v11258_v27  ;;  %4898 = vmatprep.mubr.f32.mxu1 %v11258_v27 }
 0x32a   : > { %8200 = vmatpush1.bf16.msra.mxu0 %v8199_v43  ;;  %8264 = vmatpush1.bf16.msra.mxu1 %v8263_v29  ;;  %v8213_v43 = vpack.c.bf16 %v7233_v26, %v7229_v59  ;;  %v8277_v29 = vpack.c.bf16 %v7235_v9, %v7231_v1  ;;  %v8287_v26 = vpack.c.bf16 %v7250_v0, %v7246_v28  ;;  %v7252_v1 = vld [vmem:[%s13392_s3 + $0xe40] sm:$0xff]  ;;  %v7283_v28 = vld [vmem:[%s13392_s3 + $0xf38] sm:$0xff] }
 0x32b   : > { %8202 = vmatprep.subr.bf16.mxu0 %v8201_v5  ;;  %8266 = vmatprep.subr.bf16.mxu1 %v8265_v37  ;;  %v7237_v5 = vld [vmem:[%s13392_s3 + $0xdc8] sm:$0xff]  ;;  %v7256_v9 = vld [vmem:[%s13392_s3 + $0xe60] sm:$0xff] }
 0x32c   : > { %4786 = vmatmul.mubr.f32.gmra.mrb[54].mxu0 %v11275_v32  ;;  %4899 = vmatmul.mubr.f32.gmra.mrb[54].mxu1 %v11275_v32  ;;  %v7241_v37 = vld [vmem:[%s13392_s3 + $0xde8] sm:$0xff]  ;;  %v8227_v54 = vpack.c.bf16 %v7256_v9, %v7252_v1  ;;  %v7282_v1 = vld [vmem:[%s13392_s3 + $0xf30] sm:$0xff] }
 0x32d   : > { %4791 = vmatprep.mubr.f32.mxu0 %v11343_v24  ;;  %4904 = vmatprep.mubr.f32.mxu1 %v11343_v24  ;;  %v7285_v9 = vld [vmem:[%s13392_s3 + $0xf48] sm:$0xff] }
 0x32e   : > { %8204 = vmatpush1.bf16.msra.mxu0 %v8203_v41  ;;  %8268 = vmatpush1.bf16.msra.mxu1 %v8267_v42  ;;  %v12208_v41 = vmax.f32 %v11569_v39, 0.0  ;;  %v8217_v42 = vpack.c.bf16 %v7241_v37, %v7237_v5  ;;  %v7249_v39 = vld [vmem:[%s13392_s3 + $0xe28] sm:$0xff]  ;;  %v7260_v37 = vld [vmem:[%s13392_s3 + $0xe80] sm:$0xff] }
 0x32f   : > { %8206 = vmatprep.subr.bf16.mxu0 %v8205_v11  ;;  %8270 = vmatprep.subr.bf16.mxu1 %v8269_v13  ;;  %v7242_v11 = vld [vmem:[%s13392_s3 + $0xdf0] sm:$0xff]  ;;  %v7245_v13 = vld [vmem:[%s13392_s3 + $0xe08] sm:$0xff] }
 0x330   : > { %4792 = vmatmul.mubr.f32.gmra.mrb[56].mxu0 %v11360_v40  ;;  %4905 = vmatmul.mubr.f32.gmra.mrb[56].mxu1 %v11360_v40  ;;  %v8283_v21 = vpack.c.bf16 %v7242_v11, %v7238_v44  ;;  %v7275_v44 = vld [vmem:[%s13392_s3 + $0xef8] sm:$0xff]  ;;  %v8231_v11 = vpack.c.bf16 %v7264_v61, %v7260_v37  ;;  %v7290_v37 = vld [vmem:[%s13392_s3 + $0xf70] sm:$0xff]  ;;  %v7293_v61 = vld [vmem:[%s13392_s3 + $0xf88] sm:$0xff] }
 0x331   : > { %4797 = vmatprep.mubr.f32.mxu0 %v11428_v38  ;;  %4910 = vmatprep.mubr.f32.mxu1 %v11428_v38 }
 0x332   : > { %8208 = vmatpush1.bf16.msra.mxu0 %v8207_v60  ;;  %8272 = vmatpush1.bf16.msra.mxu1 %v8271_v63  ;;  %v7248_v60 = vld [vmem:[%s13392_s3 + $0xe20] sm:$0xff]  ;;  %v8221_v63 = vpack.c.bf16 %v7249_v39, %v7245_v13 }
 0x333   : > { %8210 = vmatprep.subr.bf16.mxu0 %v8209_v62  ;;  %8274 = vmatprep.subr.bf16.mxu1 %v8273_v19  ;;  %v7253_v62 = vld [vmem:[%s13392_s3 + $0xe48] sm:$0xff]  ;;  %v8223_v59 = vpack.c.bf16 %v7248_v60, %v7244_v48  ;;  %v7268_v39 = vld [vmem:[%s13392_s3 + $0xec0] sm:$0xff]  ;;  %v7274_v48 = vld [vmem:[%s13392_s3 + $0xef0] sm:$0xff] }
 0x334   : > { %4798 = vmatmul.mubr.f32.gmra.mrb[58].mxu0 %v11445_v16  ;;  %4911 = vmatmul.mubr.f32.gmra.mrb[58].mxu1 %v11445_v16  ;;  %v7257_v19 = vld [vmem:[%s13392_s3 + $0xe68] sm:$0xff]  ;;  %v8235_v0 = vpack.c.bf16 %v7272_v18, %v7268_v39  ;;  %v7298_v39 = vld [vmem:[%s13392_s3 + $0xfb0] sm:$0xff] }
 0x335   : > { %4803 = vmatprep.mubr.f32.mxu0 %v11513_v14  ;;  %4916 = vmatprep.mubr.f32.mxu1 %v11513_v14  ;;  %v7277_v60 = vld [vmem:[%s13392_s3 + $0xf08] sm:$0xff] }
 0x336   : > { %8212 = vmatpush1.bf16.msra.mxu0 %v8211_v10  ;;  %8276 = vmatpush1.bf16.msra.mxu1 %v8275_v55  ;;  %v8225_v10 = vpack.c.bf16 %v7257_v19, %v7253_v62  ;;  %v8289_v55 = vpack.c.bf16 %v7259_v7, %v7255_v6  ;;  %v7276_v19 = vld [vmem:[%s13392_s3 + $0xf00] sm:$0xff]  ;;  %v7301_v18 = vld [vmem:[%s13392_s3 + $0xfc8] sm:$0xff] }
 0x337   : > { %8214 = vmatprep.subr.bf16.mxu0 %v8213_v43  ;;  %8278 = vmatprep.subr.bf16.mxu1 %v8277_v29  ;;  %v7265_v43 = vld [vmem:[%s13392_s3 + $0xea8] sm:$0xff]  ;;  %v7263_v29 = vld [vmem:[%s13392_s3 + $0xe98] sm:$0xff]  ;;  %v7280_v6 = vld [vmem:[%s13392_s3 + $0xf20] sm:$0xff] }
 0x338   : > { %4804 = vmatmul.mubr.f32.gmra.mrb[60].mxu0 %v11530_v47  ;;  %4917 = vmatmul.mubr.f32.gmra.mrb[60].mxu1 %v11530_v47  ;;  %v8229_v56 = vpack.c.bf16 %v7265_v43, %v7261_v31  ;;  %v7284_v43 = vld [vmem:[%s13392_s3 + $0xf40] sm:$0xff] }
 0x339   : > { %4809 = vmatprep.mubr.f32.mxu0 %v12208_v41  ;;  %4922 = vmatprep.mubr.f32.mxu1 %v12208_v41 }
 0x33a   : > { %8216 = vmatpush1.bf16.msra.mxu0 %v8215_v57  ;;  %8280 = vmatpush1.bf16.msra.mxu1 %v8279_v36  ;;  %v8293_v57 = vpack.c.bf16 %v7267_v33, %v7263_v29  ;;  %v7262_v36 = vld [vmem:[%s13392_s3 + $0xe90] sm:$0xff]  ;;  %v7288_v29 = vld [vmem:[%s13392_s3 + $0xf60] sm:$0xff] }
 0x33b   : > { %8218 = vmatprep.subr.bf16.mxu0 %v8217_v42  ;;  %8282 = vmatprep.subr.bf16.mxu1 %v8281_v45  ;;  %v7273_v42 = vld [vmem:[%s13392_s3 + $0xee8] sm:$0xff]  ;;  %v7271_v45 = vld [vmem:[%s13392_s3 + $0xed8] sm:$0xff]  ;;  %v8295_v13 = vpack.c.bf16 %v7266_v34, %v7262_v36  ;;  %v8243_v34 = vpack.c.bf16 %v7288_v29, %v7284_v43  ;;  %v7314_v43 = vld [vmem:[%s13392_s3 + $0x1030] sm:$0xff] }
 0x33c   : > { %4810 = vmatmul.mubr.f32.gmra.mrb[62].mxu0 %v12233_v8  ;;  %4923 = vmatmul.mubr.f32.gmra.mrb[62].mxu1 %v12233_v8  ;;  %v8233_v22 = vpack.c.bf16 %v7273_v42, %v7269_v58  ;;  %v7299_v36 = vld [vmem:[%s13392_s3 + $0xfb8] sm:$0xff]  ;;  %v7292_v42 = vld [vmem:[%s13392_s3 + $0xf80] sm:$0xff]  ;;  %v7317_v29 = vld [vmem:[%s13392_s3 + $0x1048] sm:$0xff] }
 0x33d   : > { %5171 = vmatprep.mubr.f32.mxu0 %v11088_v2  ;;  %5284 = vmatprep.mubr.f32.mxu1 %v11088_v2  ;;  %v7254_v2 = vld [vmem:[%s13392_s3 + $0xe50] sm:$0xff] }
 0x33e   : > { %8220 = vmatpush1.bf16.msra.mxu0 %v8219_v23  ;;  %8284 = vmatpush1.bf16.msra.mxu1 %v8283_v21  ;;  %v8291_v5 = vpack.c.bf16 %v7258_v30, %v7254_v2  ;;  %v8297_v23 = vpack.c.bf16 %v7275_v44, %v7271_v45  ;;  %v7270_v21 = vld [vmem:[%s13392_s3 + $0xed0] sm:$0xff]  ;;  %v7291_v2 = vld [vmem:[%s13392_s3 + $0xf78] sm:$0xff]  ;;  %v8239_v30 = vpack.c.bf16 %v7280_v6, %v7276_v19  ;;  %v7296_v45 = vld [vmem:[%s13392_s3 + $0xfa0] sm:$0xff] }
 0x33f   : > { %8222 = vmatprep.subr.bf16.mxu0 %v8221_v63  ;;  %8286 = vmatprep.subr.bf16.mxu1 %v8285_v20  ;;  %v7281_v63 = vld [vmem:[%s13392_s3 + $0xf28] sm:$0xff]  ;;  %v7279_v20 = vld [vmem:[%s13392_s3 + $0xf18] sm:$0xff]  ;;  %v8299_v62 = vpack.c.bf16 %v7274_v48, %v7270_v21  ;;  %v8247_v48 = vpack.c.bf16 %v7296_v45, %v7292_v42  ;;  %v7306_v19 = vld [vmem:[%s13392_s3 + $0xff0] sm:$0xff] }
 0x340   : > { %v8237_v7 = vpack.c.bf16 %v7281_v63, %v7277_v60  ;;  %v7307_v21 = vld [vmem:[%s13392_s3 + $0xff8] sm:$0xff]  ;;  %v7300_v63 = vld [vmem:[%s13392_s3 + $0xfc0] sm:$0xff]  ;;  %v7309_v6 = vld [vmem:[%s13392_s3 + $0x1008] sm:$0xff] }
 0x341   : > { %v7322_v42 = vld [vmem:[%s13392_s3 + $0x1070] sm:$0xff]  ;;  %v7325_v45 = vld [vmem:[%s13392_s3 + $0x1088] sm:$0xff] }
 0x342   : > { %8224 = vmatpush1.bf16.msra.mxu0 %v8223_v59  ;;  %8288 = vmatpush1.bf16.msra.mxu1 %v8287_v26  ;;  %v8301_v59 = vpack.c.bf16 %v7283_v28, %v7279_v20  ;;  %v7278_v26 = vld [vmem:[%s13392_s3 + $0xf10] sm:$0xff]  ;;  %v7304_v20 = vld [vmem:[%s13392_s3 + $0xfe0] sm:$0xff] }
 0x343   : > { %8226 = vmatprep.subr.bf16.mxu0 %v8225_v10  ;;  %8290 = vmatprep.subr.bf16.mxu1 %v8289_v55  ;;  %v7289_v10 = vld [vmem:[%s13392_s3 + $0xf68] sm:$0xff]  ;;  %v7287_v55 = vld [vmem:[%s13392_s3 + $0xf58] sm:$0xff]  ;;  %v8303_v31 = vpack.c.bf16 %v7282_v1, %v7278_v26  ;;  %v8251_v1 = vpack.c.bf16 %v7304_v20, %v7300_v63 }
 0x344   : > { %v8241_v33 = vpack.c.bf16 %v7289_v10, %v7285_v9  ;;  %v7315_v26 = vld [vmem:[%s13392_s3 + $0x1038] sm:$0xff]  ;;  %v7333_v63 = vld [vmem:[%s13392_s3 + $0x10c8] sm:$0xff] }
 0x345   : > { %v7337_v20 = vld [vmem:[%s13392_s3 + $0x10e8] sm:$0xff] }
 0x346   : > { %8228 = vmatpush1.bf16.msra.mxu0 %v8227_v54  ;;  %8292 = vmatpush1.bf16.msra.mxu1 %v8291_v5  ;;  %v8305_v54 = vpack.c.bf16 %v7291_v2, %v7287_v55  ;;  %v7286_v5 = vld [vmem:[%s13392_s3 + $0xf50] sm:$0xff]  ;;  %v7308_v2 = vld [vmem:[%s13392_s3 + $0x1000] sm:$0xff] }
 0x347   : > { %8230 = vmatprep.subr.bf16.mxu0 %v8229_v56  ;;  %8294 = vmatprep.subr.bf16.mxu1 %v8293_v57  ;;  %v7297_v56 = vld [vmem:[%s13392_s3 + $0xfa8] sm:$0xff]  ;;  %v7295_v57 = vld [vmem:[%s13392_s3 + $0xf98] sm:$0xff]  ;;  %v8307_v58 = vpack.c.bf16 %v7290_v37, %v7286_v5 }
 0x348   : > { %v8245_v44 = vpack.c.bf16 %v7297_v56, %v7293_v61  ;;  %v7323_v5 = vld [vmem:[%s13392_s3 + $0x1078] sm:$0xff]  ;;  %v7316_v56 = vld [vmem:[%s13392_s3 + $0x1040] sm:$0xff] }
 0x34a   : > { %8232 = vmatpush1.bf16.msra.mxu0 %v8231_v11  ;;  %8296 = vmatpush1.bf16.msra.mxu1 %v8295_v13  ;;  %v8309_v11 = vpack.c.bf16 %v7299_v36, %v7295_v57  ;;  %v7294_v13 = vld [vmem:[%s13392_s3 + $0xf90] sm:$0xff]  ;;  %v7320_v57 = vld [vmem:[%s13392_s3 + $0x1060] sm:$0xff] }
 0x34b   : > { %8234 = vmatprep.subr.bf16.mxu0 %v8233_v22  ;;  %8298 = vmatprep.subr.bf16.mxu1 %v8297_v23  ;;  %v7305_v22 = vld [vmem:[%s13392_s3 + $0xfe8] sm:$0xff]  ;;  %v7303_v23 = vld [vmem:[%s13392_s3 + $0xfd8] sm:$0xff]  ;;  %v8311_v60 = vpack.c.bf16 %v7298_v39, %v7294_v13  ;;  %v8323_v39 = vpack.c.bf16 %v7320_v57, %v7316_v56 }
 0x34c   : > { %v8249_v28 = vpack.c.bf16 %v7305_v22, %v7301_v18  ;;  %v7331_v13 = vld [vmem:[%s13392_s3 + $0x10b8] sm:$0xff]  ;;  %v7324_v18 = vld [vmem:[%s13392_s3 + $0x1080] sm:$0xff]  ;;  %v7349_v56 = vld [vmem:[%s13392_s3 + $0x1148] sm:$0xff] }
 0x34d   : > { %v7328_v22 = vld [vmem:[%s13392_s3 + $0x10a0] sm:$0xff]  ;;  %v7353_v57 = vld [vmem:[%s13392_s3 + $0x1168] sm:$0xff] }
 0x34e   : > { %8236 = vmatpush1.bf16.msra.mxu0 %v8235_v0  ;;  %8300 = vmatpush1.bf16.msra.mxu1 %v8299_v62  ;;  %v8313_v0 = vpack.c.bf16 %v7307_v21, %v7303_v23  ;;  %v7302_v62 = vld [vmem:[%s13392_s3 + $0xfd0] sm:$0xff] }
 0x34f   : > { %8238 = vmatprep.subr.bf16.mxu0 %v8237_v7  ;;  %8302 = vmatprep.subr.bf16.mxu1 %v8301_v59  ;;  %v7313_v7 = vld [vmem:[%s13392_s3 + $0x1028] sm:$0xff]  ;;  %v7311_v59 = vld [vmem:[%s13392_s3 + $0x1018] sm:$0xff]  ;;  %v8315_v9 = vpack.c.bf16 %v7306_v19, %v7302_v62  ;;  %v8327_v62 = vpack.c.bf16 %v7328_v22, %v7324_v18 }
 0x350   : > { %v8317_v10 = vpack.c.bf16 %v7313_v7, %v7309_v6  ;;  %v8381_v55 = vpack.c.bf16 %v7315_v26, %v7311_v59  ;;  %v7332_v6 = vld [vmem:[%s13392_s3 + $0x10c0] sm:$0xff]  ;;  %v8329_v59 = vpack.c.bf16 %v7337_v20, %v7333_v63  ;;  %v7357_v18 = vld [vmem:[%s13392_s3 + $0x1188] sm:$0xff] }
 0x351   : > { %v7336_v7 = vld [vmem:[%s13392_s3 + $0x10e0] sm:$0xff]  ;;  %v7361_v22 = vld [vmem:[%s13392_s3 + $0x11a8] sm:$0xff] }
 0x352   : > { %8240 = vmatpush1.bf16.msra.mxu0 %v8239_v30  ;;  %8304 = vmatpush1.bf16.msra.mxu1 %v8303_v31  ;;  %v7312_v30 = vld [vmem:[%s13392_s3 + $0x1020] sm:$0xff]  ;;  %v7310_v31 = vld [vmem:[%s13392_s3 + $0x1010] sm:$0xff] }
 0x353   : > { %8242 = vmatprep.subr.bf16.mxu0 %v8241_v33  ;;  %8306 = vmatprep.subr.bf16.mxu1 %v8305_v54  ;;  %v7321_v33 = vld [vmem:[%s13392_s3 + $0x1068] sm:$0xff]  ;;  %v7319_v54 = vld [vmem:[%s13392_s3 + $0x1058] sm:$0xff]  ;;  %v8319_v37 = vpack.c.bf16 %v7312_v30, %v7308_v2  ;;  %v8383_v61 = vpack.c.bf16 %v7314_v43, %v7310_v31  ;;  %v8331_v31 = vpack.c.bf16 %v7336_v7, %v7332_v6  ;;  %v7356_v63 = vld [vmem:[%s13392_s3 + $0x1180] sm:$0xff] }
 0x354   : > { %v8321_v36 = vpack.c.bf16 %v7321_v33, %v7317_v29  ;;  %v7343_v2 = vld [vmem:[%s13392_s3 + $0x1118] sm:$0xff]  ;;  %v7340_v29 = vld [vmem:[%s13392_s3 + $0x1100] sm:$0xff]  ;;  %v7365_v6 = vld [vmem:[%s13392_s3 + $0x11c8] sm:$0xff] }
 0x355   : > { %v7347_v30 = vld [vmem:[%s13392_s3 + $0x1138] sm:$0xff]  ;;  %v7344_v33 = vld [vmem:[%s13392_s3 + $0x1120] sm:$0xff]  ;;  %v7369_v7 = vld [vmem:[%s13392_s3 + $0x11e8] sm:$0xff] }
 0x356   : > { %8244 = vmatpush1.bf16.msra.mxu0 %v8243_v34  ;;  %8308 = vmatpush1.bf16.msra.mxu1 %v8307_v58  ;;  %v8385_v34 = vpack.c.bf16 %v7323_v5, %v7319_v54  ;;  %v7318_v58 = vld [vmem:[%s13392_s3 + $0x1050] sm:$0xff]  ;;  %v8397_v5 = vpack.c.bf16 %v7347_v30, %v7343_v2  ;;  %v7360_v20 = vld [vmem:[%s13392_s3 + $0x11a0] sm:$0xff]  ;;  %v12630_v2 = vmax.f32 %v11638_v46, 0.0  ;;  %v8345_v30 = vpack.c.bf16 %v7369_v7, %v7365_v6  ;;  %v7377_v46 = vld [vmem:[%s13392_s3 + $0x1228] sm:$0xff] }
 0x357   : > { %8246 = vmatprep.subr.bf16.mxu0 %v8245_v44  ;;  %8310 = vmatprep.subr.bf16.mxu1 %v8309_v11  ;;  %v7329_v44 = vld [vmem:[%s13392_s3 + $0x10a8] sm:$0xff]  ;;  %v7327_v11 = vld [vmem:[%s13392_s3 + $0x1098] sm:$0xff]  ;;  %v7392_v6 = vld [vmem:[%s13392_s3 + $0x12a0] sm:$0xff] }
 0x358   : > { %v8325_v23 = vpack.c.bf16 %v7329_v44, %v7325_v45  ;;  %v8389_v21 = vpack.c.bf16 %v7331_v13, %v7327_v11  ;;  %v7348_v45 = vld [vmem:[%s13392_s3 + $0x1140] sm:$0xff]  ;;  %v8337_v11 = vpack.c.bf16 %v7353_v57, %v7349_v56 }
 0x359   : > { %v7352_v44 = vld [vmem:[%s13392_s3 + $0x1160] sm:$0xff] }
 0x35a   : > { %8248 = vmatpush1.bf16.msra.mxu0 %v8247_v48  ;;  %8312 = vmatpush1.bf16.msra.mxu1 %v8311_v60  ;;  %v7326_v48 = vld [vmem:[%s13392_s3 + $0x1090] sm:$0xff]  ;;  %v7372_v57 = vld [vmem:[%s13392_s3 + $0x1200] sm:$0xff] }
 0x35b   : > { %8250 = vmatprep.subr.bf16.mxu0 %v8249_v28  ;;  %8314 = vmatprep.subr.bf16.mxu1 %v8313_v0  ;;  %v7330_v60 = vld [vmem:[%s13392_s3 + $0x10b0] sm:$0xff]  ;;  %v7335_v28 = vld [vmem:[%s13392_s3 + $0x10d8] sm:$0xff] }
 0x35c   : > { %v7339_v0 = vld [vmem:[%s13392_s3 + $0x10f8] sm:$0xff]  ;;  %v8391_v19 = vpack.c.bf16 %v7330_v60, %v7326_v48  ;;  %v8339_v48 = vpack.c.bf16 %v7352_v44, %v7348_v45  ;;  %v7381_v45 = vld [vmem:[%s13392_s3 + $0x1248] sm:$0xff] }
 0x35d   : > { %v8393_v26 = vpack.c.bf16 %v7339_v0, %v7335_v28  ;;  %v8341_v28 = vpack.c.bf16 %v7361_v22, %v7357_v18  ;;  %v7385_v44 = vld [vmem:[%s13392_s3 + $0x1268] sm:$0xff]  ;;  %v7380_v18 = vld [vmem:[%s13392_s3 + $0x1240] sm:$0xff] }
 0x35e   : > { %8252 = vmatpush1.bf16.msra.mxu0 %v8251_v1  ;;  %8316 = vmatpush1.bf16.msra.mxu1 %v8315_v9  ;;  %v7334_v1 = vld [vmem:[%s13392_s3 + $0x10d0] sm:$0xff]  ;;  %v7384_v22 = vld [vmem:[%s13392_s3 + $0x1260] sm:$0xff] }
 0x35f   : > { %8318 = vmatprep.subr.bf16.mxu0 %v8317_v10  ;;  %8382 = vmatprep.subr.bf16.mxu1 %v8381_v55  ;;  %v7338_v9 = vld [vmem:[%s13392_s3 + $0x10f0] sm:$0xff]  ;;  %v7341_v10 = vld [vmem:[%s13392_s3 + $0x1108] sm:$0xff] }
 0x360   : > { %v7345_v55 = vld [vmem:[%s13392_s3 + $0x1128] sm:$0xff]  ;;  %v8395_v43 = vpack.c.bf16 %v7338_v9, %v7334_v1  ;;  %v8343_v1 = vpack.c.bf16 %v7360_v20, %v7356_v63  ;;  %v7391_v20 = vld [vmem:[%s13392_s3 + $0x1298] sm:$0xff] }
 0x361   : > { %5172 = vmatmul.mubr.f32.vlgmr.msra.gmra.mrb[48].mxu0 %v11105_v15  ;;  %5285 = vmatmul.mubr.f32.vlgmr.msra.gmra.mrb[48].mxu1 %v11105_v15  ;;  %v8387_v15 = vpack.c.bf16 %v7322_v42, %v7318_v58  ;;  %v8333_v54 = vpack.c.bf16 %v7345_v55, %v7341_v10  ;;  %v8335_v58 = vpack.c.bf16 %v7344_v33, %v7340_v29  ;;  %v7364_v10 = vld [vmem:[%s13392_s3 + $0x11c0] sm:$0xff]  ;;  %v7370_v29 = vld [vmem:[%s13392_s3 + $0x11f0] sm:$0xff]  ;;  %v7373_v33 = vld [vmem:[%s13392_s3 + $0x1208] sm:$0xff] }
 0x362   : > { %5177 = vmatprep.mubr.f32.mxu0 %v11173_v4  ;;  %5290 = vmatprep.mubr.f32.mxu1 %v11173_v4  ;;  %v7368_v55 = vld [vmem:[%s13392_s3 + $0x11e0] sm:$0xff]  ;;  %v7393_v63 = vld [vmem:[%s13392_s3 + $0x12a8] sm:$0xff] }
 0x363   : > { %8320 = vmatpush1.bf16.msra.mxu0 %v8319_v37  ;;  %8384 = vmatpush1.bf16.msra.mxu1 %v8383_v61  ;;  %v7342_v37 = vld [vmem:[%s13392_s3 + $0x1110] sm:$0xff] }
 0x364   : > { %8322 = vmatprep.subr.bf16.mxu0 %v8321_v36  ;;  %8386 = vmatprep.subr.bf16.mxu1 %v8385_v34  ;;  %v7346_v61 = vld [vmem:[%s13392_s3 + $0x1130] sm:$0xff]  ;;  %v7351_v36 = vld [vmem:[%s13392_s3 + $0x1158] sm:$0xff] }
 0x365   : > { %5178 = vmatmul.mubr.f32.gmra.mrb[50].mxu0 %v11190_v25  ;;  %5291 = vmatmul.mubr.f32.gmra.mrb[50].mxu1 %v11190_v25  ;;  %v7355_v34 = vld [vmem:[%s13392_s3 + $0x1178] sm:$0xff]  ;;  %v8399_v42 = vpack.c.bf16 %v7346_v61, %v7342_v37  ;;  %v12655_v37 = vmax.f32 %v11626_v17, 0.0  ;;  %v8347_v61 = vpack.c.bf16 %v7368_v55, %v7364_v10  ;;  %v7374_v17 = vld [vmem:[%s13392_s3 + $0x1210] sm:$0xff]  ;;  %v7401_v10 = vld [vmem:[%s13392_s3 + $0x12e8] sm:$0xff] }
 0x366   : > { %5183 = vmatprep.mubr.f32.mxu0 %v11258_v27  ;;  %5296 = vmatprep.mubr.f32.mxu1 %v11258_v27  ;;  %v8401_v13 = vpack.c.bf16 %v7355_v34, %v7351_v36  ;;  %v7376_v36 = vld [vmem:[%s13392_s3 + $0x1220] sm:$0xff]  ;;  %v8349_v34 = vpack.c.bf16 %v7377_v46, %v7373_v33  ;;  %v7399_v55 = vld [vmem:[%s13392_s3 + $0x12d8] sm:$0xff] }
 0x367   : > { %8324 = vmatpush1.bf16.msra.mxu0 %v8323_v39  ;;  %8388 = vmatpush1.bf16.msra.mxu1 %v8387_v15  ;;  %v7350_v39 = vld [vmem:[%s13392_s3 + $0x1150] sm:$0xff]  ;;  %v7400_v33 = vld [vmem:[%s13392_s3 + $0x12e0] sm:$0xff] }
 0x368   : > { %8326 = vmatprep.subr.bf16.mxu0 %v8325_v23  ;;  %8390 = vmatprep.subr.bf16.mxu1 %v8389_v21  ;;  %v7354_v15 = vld [vmem:[%s13392_s3 + $0x1170] sm:$0xff]  ;;  %v7359_v23 = vld [vmem:[%s13392_s3 + $0x1198] sm:$0xff] }
 0x369   : > { %5184 = vmatmul.mubr.f32.gmra.mrb[52].mxu0 %v11275_v32  ;;  %5297 = vmatmul.mubr.f32.gmra.mrb[52].mxu1 %v11275_v32  ;;  %v7363_v21 = vld [vmem:[%s13392_s3 + $0x11b8] sm:$0xff]  ;;  %v8403_v60 = vpack.c.bf16 %v7354_v15, %v7350_v39  ;;  %v8351_v39 = vpack.c.bf16 %v7376_v36, %v7372_v57  ;;  %v7409_v57 = vld [vmem:[%s13392_s3 + $0x1328] sm:$0xff] }
 0x36a   : > { %5189 = vmatprep.mubr.f32.mxu0 %v11343_v24  ;;  %5302 = vmatprep.mubr.f32.mxu1 %v11343_v24  ;;  %v8405_v0 = vpack.c.bf16 %v7363_v21, %v7359_v23  ;;  %v8353_v23 = vpack.c.bf16 %v7385_v44, %v7381_v45  ;;  %v7407_v36 = vld [vmem:[%s13392_s3 + $0x1318] sm:$0xff]  ;;  %v7408_v45 = vld [vmem:[%s13392_s3 + $0x1320] sm:$0xff] }
 0x36b   : > { %8328 = vmatpush1.bf16.msra.mxu0 %v8327_v62  ;;  %8392 = vmatpush1.bf16.msra.mxu1 %v8391_v19  ;;  %v7358_v62 = vld [vmem:[%s13392_s3 + $0x1190] sm:$0xff] }
 0x36c   : > { %8330 = vmatprep.subr.bf16.mxu0 %v8329_v59  ;;  %8394 = vmatprep.subr.bf16.mxu1 %v8393_v26  ;;  %v7362_v19 = vld [vmem:[%s13392_s3 + $0x11b0] sm:$0xff]  ;;  %v7367_v59 = vld [vmem:[%s13392_s3 + $0x11d8] sm:$0xff] }
 0x36d   : > { %5190 = vmatmul.mubr.f32.gmra.mrb[54].mxu0 %v11360_v40  ;;  %5303 = vmatmul.mubr.f32.gmra.mrb[54].mxu1 %v11360_v40  ;;  %v7371_v26 = vld [vmem:[%s13392_s3 + $0x11f8] sm:$0xff]  ;;  %v8407_v9 = vpack.c.bf16 %v7362_v19, %v7358_v62  ;;  %v7388_v19 = vld [vmem:[%s13392_s3 + $0x1280] sm:$0xff] }
 0x36e   : > { %5195 = vmatprep.mubr.f32.mxu0 %v11428_v38  ;;  %5308 = vmatprep.mubr.f32.mxu1 %v11428_v38 }
 0x36f   : > { %8332 = vmatpush1.bf16.msra.mxu0 %v8331_v31  ;;  %8396 = vmatpush1.bf16.msra.mxu1 %v8395_v43  ;;  %v8409_v31 = vpack.c.bf16 %v7371_v26, %v7367_v59  ;;  %v7366_v43 = vld [vmem:[%s13392_s3 + $0x11d0] sm:$0xff] }
 0x370   : > { %8334 = vmatprep.subr.bf16.mxu0 %v8333_v54  ;;  %8398 = vmatprep.subr.bf16.mxu1 %v8397_v5  ;;  %v7375_v54 = vld [vmem:[%s13392_s3 + $0x1218] sm:$0xff]  ;;  %v8411_v56 = vpack.c.bf16 %v7370_v29, %v7366_v43  ;;  %v7390_v26 = vld [vmem:[%s13392_s3 + $0x1290] sm:$0xff]  ;;  %v7396_v29 = vld [vmem:[%s13392_s3 + $0x12c0] sm:$0xff] }
 0x371   : > { %5196 = vmatmul.mubr.f32.gmra.mrb[56].mxu0 %v11445_v16  ;;  %5309 = vmatmul.mubr.f32.gmra.mrb[56].mxu1 %v11445_v16  ;;  %v7379_v5 = vld [vmem:[%s13392_s3 + $0x1238] sm:$0xff] }
 0x372   : > { %5201 = vmatprep.mubr.f32.mxu0 %v11513_v14  ;;  %5314 = vmatprep.mubr.f32.mxu1 %v11513_v14 }
 0x373   : > { %8336 = vmatpush1.bf16.msra.mxu0 %v8335_v58  ;;  %8400 = vmatpush1.bf16.msra.mxu1 %v8399_v42  ;;  %v8413_v58 = vpack.c.bf16 %v7379_v5, %v7375_v54  ;;  %v7378_v42 = vld [vmem:[%s13392_s3 + $0x1230] sm:$0xff] }
 0x374   : > { %8338 = vmatprep.subr.bf16.mxu0 %v8337_v11  ;;  %8402 = vmatprep.subr.bf16.mxu1 %v8401_v13  ;;  %v7383_v11 = vld [vmem:[%s13392_s3 + $0x1258] sm:$0xff]  ;;  %v8415_v15 = vpack.c.bf16 %v7378_v42, %v7374_v17  ;;  %v7398_v5 = vld [vmem:[%s13392_s3 + $0x12d0] sm:$0xff]  ;;  %v7404_v42 = vld [vmem:[%s13392_s3 + $0x1300] sm:$0xff] }
 0x375   : > { %5202 = vmatmul.mubr.f32.gmra.mrb[58].mxu0 %v11530_v47  ;;  %5315 = vmatmul.mubr.f32.gmra.mrb[58].mxu1 %v11530_v47  ;;  %v7387_v13 = vld [vmem:[%s13392_s3 + $0x1278] sm:$0xff] }
 0x376   : > { %5207 = vmatprep.mubr.f32.mxu0 %v12208_v41  ;;  %5320 = vmatprep.mubr.f32.mxu1 %v12208_v41  ;;  %v8417_v21 = vpack.c.bf16 %v7387_v13, %v7383_v11  ;;  %v7406_v13 = vld [vmem:[%s13392_s3 + $0x1310] sm:$0xff] }
 0x377   : > { %8340 = vmatpush1.bf16.msra.mxu0 %v8339_v48  ;;  %8404 = vmatpush1.bf16.msra.mxu1 %v8403_v60  ;;  %v7386_v48 = vld [vmem:[%s13392_s3 + $0x1270] sm:$0xff]  ;;  %v7389_v60 = vld [vmem:[%s13392_s3 + $0x1288] sm:$0xff] }
 0x378   : > { %8342 = vmatprep.subr.bf16.mxu0 %v8341_v28  ;;  %8406 = vmatprep.subr.bf16.mxu1 %v8405_v0  ;;  %v7395_v28 = vld [vmem:[%s13392_s3 + $0x12b8] sm:$0xff]  ;;  %v8355_v0 = vpack.c.bf16 %v7384_v22, %v7380_v18  ;;  %v8357_v7 = vpack.c.bf16 %v7393_v63, %v7389_v60  ;;  %v7417_v18 = vld [vmem:[%s13392_s3 + $0x1368] sm:$0xff]  ;;  %v7416_v60 = vld [vmem:[%s13392_s3 + $0x1360] sm:$0xff] }
 0x379   : > { %5208 = vmatmul.mubr.f32.gmra.mrb[60].mxu0 %v12233_v8  ;;  %5321 = vmatmul.mubr.f32.gmra.mrb[60].mxu1 %v12233_v8  ;;  %v8421_v59 = vpack.c.bf16 %v7395_v28, %v7391_v20  ;;  %v7415_v22 = vld [vmem:[%s13392_s3 + $0x1358] sm:$0xff]  ;;  %v7414_v28 = vld [vmem:[%s13392_s3 + $0x1350] sm:$0xff] }
 0x37a   : > { %5213 = vmatprep.mubr.f32.mxu0 %v12630_v2  ;;  %5326 = vmatprep.mubr.f32.mxu1 %v12630_v2 }
 0x37b   : > { %8344 = vmatpush1.bf16.msra.mxu0 %v8343_v1  ;;  %8408 = vmatpush1.bf16.msra.mxu1 %v8407_v9  ;;  %v7394_v1 = vld [vmem:[%s13392_s3 + $0x12b0] sm:$0xff]  ;;  %v7397_v9 = vld [vmem:[%s13392_s3 + $0x12c8] sm:$0xff] }
 0x37c   : > { %8346 = vmatprep.subr.bf16.mxu0 %v8345_v30  ;;  %8410 = vmatprep.subr.bf16.mxu1 %v8409_v31  ;;  %v7403_v30 = vld [vmem:[%s13392_s3 + $0x12f8] sm:$0xff]  ;;  %v8359_v31 = vpack.c.bf16 %v7392_v6, %v7388_v19  ;;  %v8423_v43 = vpack.c.bf16 %v7394_v1, %v7390_v26  ;;  %v8361_v46 = vpack.c.bf16 %v7401_v10, %v7397_v9  ;;  %v7425_v19 = vld [vmem:[%s13392_s3 + $0x13a8] sm:$0xff]  ;;  %v7420_v1 = vld [vmem:[%s13392_s3 + $0x1380] sm:$0xff] }
 0x37d   : > { %5214 = vmatmul.mubr.f32.gmra.mrb[62].mxu0 %v12655_v37  ;;  %5327 = vmatmul.mubr.f32.gmra.mrb[62].mxu1 %v12655_v37  ;;  %v8425_v54 = vpack.c.bf16 %v7403_v30, %v7399_v55  ;;  %v7423_v6 = vld [vmem:[%s13392_s3 + $0x1398] sm:$0xff]  ;;  %v7424_v9 = vld [vmem:[%s13392_s3 + $0x13a0] sm:$0xff]  ;;  %v7422_v30 = vld [vmem:[%s13392_s3 + $0x1390] sm:$0xff] }
 0x37e   : > { %5575 = vmatprep.mubr.f32.mxu0 %v11173_v4  ;;  %5688 = vmatprep.mubr.f32.mxu1 %v11173_v4  ;;  %v7382_v4 = vld [vmem:[%s13392_s3 + $0x1250] sm:$0xff] }
 0x37f   : > { %8348 = vmatpush1.bf16.msra.mxu0 %v8347_v61  ;;  %8412 = vmatpush1.bf16.msra.mxu1 %v8411_v56  ;;  %v8419_v62 = vpack.c.bf16 %v7386_v48, %v7382_v4  ;;  %v7402_v61 = vld [vmem:[%s13392_s3 + $0x12f0] sm:$0xff]  ;;  %v7405_v56 = vld [vmem:[%s13392_s3 + $0x1308] sm:$0xff]  ;;  %v7412_v48 = vld [vmem:[%s13392_s3 + $0x1340] sm:$0xff] }
 0x380   : > { %8350 = vmatprep.subr.bf16.mxu0 %v8349_v34  ;;  %8414 = vmatprep.subr.bf16.mxu1 %v8413_v58  ;;  %v7411_v34 = vld [vmem:[%s13392_s3 + $0x1338] sm:$0xff]  ;;  %v8363_v58 = vpack.c.bf16 %v7400_v33, %v7396_v29  ;;  %v8427_v17 = vpack.c.bf16 %v7402_v61, %v7398_v5  ;;  %v8365_v44 = vpack.c.bf16 %v7409_v57, %v7405_v56  ;;  %v7433_v29 = vld [vmem:[%s13392_s3 + $0x13e8] sm:$0xff]  ;;  %v7428_v61 = vld [vmem:[%s13392_s3 + $0x13c0] sm:$0xff] }
 0x381   : > { %v8429_v11 = vpack.c.bf16 %v7411_v34, %v7407_v36  ;;  %v7431_v33 = vld [vmem:[%s13392_s3 + $0x13d8] sm:$0xff]  ;;  %v7432_v56 = vld [vmem:[%s13392_s3 + $0x13e0] sm:$0xff]  ;;  %v7430_v34 = vld [vmem:[%s13392_s3 + $0x13d0] sm:$0xff] }
 0x383   : > { %8352 = vmatpush1.bf16.msra.mxu0 %v8351_v39  ;;  %8416 = vmatpush1.bf16.msra.mxu1 %v8415_v15  ;;  %v7410_v39 = vld [vmem:[%s13392_s3 + $0x1330] sm:$0xff]  ;;  %v7413_v15 = vld [vmem:[%s13392_s3 + $0x1348] sm:$0xff] }
 0x384   : > { %8354 = vmatprep.subr.bf16.mxu0 %v8353_v23  ;;  %8418 = vmatprep.subr.bf16.mxu1 %v8417_v21  ;;  %v7419_v23 = vld [vmem:[%s13392_s3 + $0x1378] sm:$0xff]  ;;  %v8367_v21 = vpack.c.bf16 %v7408_v45, %v7404_v42  ;;  %v8431_v4 = vpack.c.bf16 %v7410_v39, %v7406_v13  ;;  %v8369_v63 = vpack.c.bf16 %v7417_v18, %v7413_v15  ;;  %v5880_v42 = vld [vmem:[%s13394_s5 + $0x88] sm:$0xff]  ;;  %v7452_v45 = vld [vmem:[%s13394_s5 + $0x180] sm:$0xff] }
 0x385   : > { %v8433_v20 = vpack.c.bf16 %v7419_v23, %v7415_v22  ;;  %v5863_v15 = vld [vmem:[%s13394_s5] sm:$0xff]  ;;  %v5864_v18 = vld [vmem:[%s13394_s5 + $0x8] sm:$0xff]  ;;  %v5881_v23 = vld [vmem:[%s13394_s5 + $0x90] sm:$0xff] }
 0x387   : > { %8356 = vmatpush1.bf16.msra.mxu0 %v8355_v0  ;;  %8420 = vmatpush1.bf16.msra.mxu1 %v8419_v62  ;;  %v7418_v0 = vld [vmem:[%s13392_s3 + $0x1370] sm:$0xff]  ;;  %v7421_v62 = vld [vmem:[%s13392_s3 + $0x1388] sm:$0xff] }
 0x388   : > { %8358 = vmatprep.subr.bf16.mxu0 %v8357_v7  ;;  %8422 = vmatprep.subr.bf16.mxu1 %v8421_v59  ;;  %v7427_v7 = vld [vmem:[%s13392_s3 + $0x13b8] sm:$0xff]  ;;  %v8371_v59 = vpack.c.bf16 %v7416_v60, %v7412_v48  ;;  %v8435_v26 = vpack.c.bf16 %v7418_v0, %v7414_v28  ;;  %v8373_v10 = vpack.c.bf16 %v7425_v19, %v7421_v62  ;;  %v7454_v60 = vld [vmem:[%s13394_s5 + $0x190] sm:$0xff] }
 0x389   : > { %v8437_v55 = vpack.c.bf16 %v7427_v7, %v7423_v6  ;;  %v5882_v48 = vld [vmem:[%s13394_s5 + $0x98] sm:$0xff]  ;;  %v5865_v28 = vld [vmem:[%s13394_s5 + $0x10] sm:$0xff]  ;;  %v5883_v6 = vld [vmem:[%s13394_s5 + $0xa0] sm:$0xff] }
 0x38a   : > { %v5866_v0 = vld [vmem:[%s13394_s5 + $0x18] sm:$0xff]  ;;  %v8481_v19 = vpack.c.bf16 %v5882_v48, %v5881_v23  ;;  %v5892_v23 = vld [vmem:[%s13394_s5 + $0xe8] sm:$0xff] }
 0x38b   : > { %8360 = vmatpush1.bf16.msra.mxu0 %v8359_v31  ;;  %8424 = vmatpush1.bf16.msra.mxu1 %v8423_v43  ;;  %v7426_v31 = vld [vmem:[%s13392_s3 + $0x13b0] sm:$0xff]  ;;  %v7429_v43 = vld [vmem:[%s13392_s3 + $0x13c8] sm:$0xff] }
 0x38c   : > { %8362 = vmatprep.subr.bf16.mxu0 %v8361_v46  ;;  %8426 = vmatprep.subr.bf16.mxu1 %v8425_v54  ;;  %v7435_v46 = vld [vmem:[%s13392_s3 + $0x13f8] sm:$0xff]  ;;  %v8375_v54 = vpack.c.bf16 %v7424_v9, %v7420_v1  ;;  %v8439_v5 = vpack.c.bf16 %v7426_v31, %v7422_v30  ;;  %v8377_v57 = vpack.c.bf16 %v7433_v29, %v7429_v43  ;;  %v5884_v1 = vld [vmem:[%s13394_s5 + $0xa8] sm:$0xff]  ;;  %v7456_v9 = vld [vmem:[%s13394_s5 + $0x1a0] sm:$0xff] }
 0x38d   : > { %v8441_v36 = vpack.c.bf16 %v7435_v46, %v7431_v33  ;;  %v8485_v31 = vpack.c.bf16 %v5884_v1, %v5883_v6  ;;  %v5868_v43 = vld [vmem:[%s13394_s5 + $0x28] sm:$0xff]  ;;  %v5885_v46 = vld [vmem:[%s13394_s5 + $0xb0] sm:$0xff] }
 0x38e   : > { %v7441_v33 = vld [vmem:[%s13394_s5 + $0x128] sm:$0xff] }
 0x38f   : > { %8364 = vmatpush1.bf16.msra.mxu0 %v8363_v58  ;;  %8428 = vmatpush1.bf16.msra.mxu1 %v8427_v17  ;;  %v7434_v58 = vld [vmem:[%s13392_s3 + $0x13f0] sm:$0xff]  ;;  %v5879_v17 = vld [vmem:[%s13394_s5 + $0x80] sm:$0xff] }
 0x390   : > { %8366 = vmatprep.subr.bf16.mxu0 %v8365_v44  ;;  %8430 = vmatprep.subr.bf16.mxu1 %v8429_v11  ;;  %v7453_v44 = vld [vmem:[%s13394_s5 + $0x188] sm:$0xff]  ;;  %v8379_v11 = vpack.c.bf16 %v7432_v56, %v7428_v61  ;;  %v8443_v13 = vpack.c.bf16 %v7434_v58, %v7430_v34  ;;  %v8477_v39 = vpack.c.bf16 %v5880_v42, %v5879_v17 }
 0x391   : > { %v8445_v22 = vpack.c.bf16 %v7453_v44, %v7452_v45  ;;  %v5872_v17 = vld [vmem:[%s13394_s5 + $0x48] sm:$0xff]  ;;  %v5873_v44 = vld [vmem:[%s13394_s5 + $0x50] sm:$0xff] }
 0x393   : > { %8368 = vmatpush1.bf16.msra.mxu0 %v8367_v21  ;;  %8432 = vmatpush1.bf16.msra.mxu1 %v8431_v4  ;;  %v7436_v21 = vld [vmem:[%s13394_s5 + $0x100] sm:$0xff]  ;;  %v7437_v4 = vld [vmem:[%s13394_s5 + $0x108] sm:$0xff] }
 0x394   : > { %8370 = vmatprep.subr.bf16.mxu0 %v8369_v63  ;;  %8434 = vmatprep.subr.bf16.mxu1 %v8433_v20  ;;  %v7455_v63 = vld [vmem:[%s13394_s5 + $0x198] sm:$0xff]  ;;  %v8479_v20 = vpack.c.bf16 %v5864_v18, %v5863_v15  ;;  %v8447_v62 = vpack.c.bf16 %v7437_v4, %v7436_v21  ;;  %v7461_v15 = vld [vmem:[%s13394_s5 + $0x1c8] sm:$0xff]  ;;  %v5891_v18 = vld [vmem:[%s13394_s5 + $0xe0] sm:$0xff] }
 0x395   : > { %v8449_v7 = vpack.c.bf16 %v7455_v63, %v7454_v60  ;;  %v7444_v21 = vld [vmem:[%s13394_s5 + $0x140] sm:$0xff]  ;;  %v7445_v4 = vld [vmem:[%s13394_s5 + $0x148] sm:$0xff]  ;;  %v8501_v48 = vpack.c.bf16 %v5892_v23, %v5891_v18 }
 0x396   : > { %v8463_v60 = vpack.c.bf16 %v7445_v4, %v7444_v21  ;;  %v5875_v63 = vld [vmem:[%s13394_s5 + $0x60] sm:$0xff] }
 0x397   : > { %8372 = vmatpush1.bf16.msra.mxu0 %v8371_v59  ;;  %8436 = vmatpush1.bf16.msra.mxu1 %v8435_v26  ;;  %v7438_v59 = vld [vmem:[%s13394_s5 + $0x110] sm:$0xff]  ;;  %v7439_v26 = vld [vmem:[%s13394_s5 + $0x118] sm:$0xff] }
 0x398   : > { %8374 = vmatprep.subr.bf16.mxu0 %v8373_v10  ;;  %8438 = vmatprep.subr.bf16.mxu1 %v8437_v55  ;;  %v7457_v10 = vld [vmem:[%s13394_s5 + $0x1a8] sm:$0xff]  ;;  %v8483_v55 = vpack.c.bf16 %v5866_v0, %v5865_v28  ;;  %v8451_v30 = vpack.c.bf16 %v7439_v26, %v7438_v59  ;;  %v7462_v0 = vld [vmem:[%s13394_s5 + $0x1d0] sm:$0xff]  ;;  %v7447_v26 = vld [vmem:[%s13394_s5 + $0x158] sm:$0xff] }
 0x399   : > { %v8453_v29 = vpack.c.bf16 %v7457_v10, %v7456_v9  ;;  %v7446_v59 = vld [vmem:[%s13394_s5 + $0x150] sm:$0xff] }
 0x39a   : > { %v8467_v9 = vpack.c.bf16 %v7447_v26, %v7446_v59  ;;  %v5877_v10 = vld [vmem:[%s13394_s5 + $0x70] sm:$0xff]  ;;  %v7519_v59 = vld [vmem:[%s13394_s5 + $0x398] sm:$0xff] }
 0x39b   : > { %8376 = vmatpush1.bf16.msra.mxu0 %v8375_v54  ;;  %8440 = vmatpush1.bf16.msra.mxu1 %v8439_v5  ;;  %v5886_v54 = vld [vmem:[%s13394_s5 + $0xb8] sm:$0xff] }
 0x39c   : > { %8378 = vmatprep.subr.bf16.mxu0 %v8377_v57  ;;  %8442 = vmatprep.subr.bf16.mxu1 %v8441_v36  ;;  %v8489_v56 = vpack.c.bf16 %v5886_v54, %v5885_v46  ;;  %v5870_v57 = vld [vmem:[%s13394_s5 + $0x38] sm:$0xff]  ;;  %v5888_v36 = vld [vmem:[%s13394_s5 + $0xc8] sm:$0xff] }
 0x39d   : > { %v7449_v46 = vld [vmem:[%s13394_s5 + $0x168] sm:$0xff] }
 0x39f   : > { %8380 = vmatpush1.bf16.msra.mxu0 %v8379_v11  ;;  %8444 = vmatpush1.bf16.msra.mxu1 %v8443_v13  ;;  %v5874_v11 = vld [vmem:[%s13394_s5 + $0x58] sm:$0xff] }
 0x3a0   : > { %8478 = vmatprep.subr.bf16.mxu1 %v8477_v39  ;;  %8446 = vmatprep.subr.bf16.mxu0 %v8445_v22  ;;  %v8499_v13 = vpack.c.bf16 %v5874_v11, %v5873_v44  ;;  %v7460_v39 = vld [vmem:[%s13394_s5 + $0x1c0] sm:$0xff] }
 0x3a1   : > { %v8461_v22 = vpack.c.bf16 %v7461_v15, %v7460_v39 }
 0x3a2   : > { %5576 = vmatmul.mubr.f32.vlgmr.msra.gmra.mrb[48].mxu0 %v11190_v25  ;;  %5689 = vmatmul.mubr.f32.vlgmr.msra.gmra.mrb[48].mxu1 %v11190_v25  ;;  %v5867_v25 = vld [vmem:[%s13394_s5 + $0x20] sm:$0xff] }
 0x3a3   : > { %5581 = vmatprep.mubr.f32.mxu0 %v11258_v27  ;;  %5694 = vmatprep.mubr.f32.mxu1 %v11258_v27  ;;  %v7440_v27 = vld [vmem:[%s13394_s5 + $0x120] sm:$0xff]  ;;  %v8487_v5 = vpack.c.bf16 %v5868_v43, %v5867_v25 }
 0x3a4   : > { %8480 = vmatpush3.bf16.msra.mxu1 %v8479_v20  ;;  %8448 = vmatpush3.bf16.msra.mxu0 %v8447_v62  ;;  %v8455_v61 = vpack.c.bf16 %v7441_v33, %v7440_v27  ;;  %v5876_v20 = vld [vmem:[%s13394_s5 + $0x68] sm:$0xff]  ;;  %v7463_v62 = vld [vmem:[%s13394_s5 + $0x1d8] sm:$0xff]  ;;  %v7516_v43 = vld [vmem:[%s13394_s5 + $0x380] sm:$0xff] }
 0x3a5   : > { %8482 = vmatprep.subr.bf16.mxu1 %v8481_v19  ;;  %8450 = vmatprep.subr.bf16.mxu0 %v8449_v7  ;;  %v8503_v28 = vpack.c.bf16 %v5876_v20, %v5875_v63  ;;  %v5893_v19 = vld [vmem:[%s13394_s5 + $0xf0] sm:$0xff]  ;;  %v8465_v6 = vpack.c.bf16 %v7463_v62, %v7462_v0  ;;  %v5894_v7 = vld [vmem:[%s13394_s5 + $0xf8] sm:$0xff]  ;;  %v7517_v27 = vld [vmem:[%s13394_s5 + $0x388] sm:$0xff] }
 0x3a6   : > { %5582 = vmatmul.mubr.f32.gmra.mrb[50].mxu0 %v11275_v32  ;;  %5695 = vmatmul.mubr.f32.gmra.mrb[50].mxu1 %v11275_v32  ;;  %v5869_v32 = vld [vmem:[%s13394_s5 + $0x30] sm:$0xff]  ;;  %v8505_v1 = vpack.c.bf16 %v5894_v7, %v5893_v19  ;;  %v7448_v33 = vld [vmem:[%s13394_s5 + $0x160] sm:$0xff]  ;;  %v8541_v54 = vpack.c.bf16 %v7517_v27, %v7516_v43  ;;  %v7501_v0 = vld [vmem:[%s13394_s5 + $0x308] sm:$0xff] }
 0x3a7   : > { %5587 = vmatprep.mubr.f32.mxu0 %v11343_v24  ;;  %5700 = vmatprep.mubr.f32.mxu1 %v11343_v24  ;;  %v5887_v24 = vld [vmem:[%s13394_s5 + $0xc0] sm:$0xff]  ;;  %v8491_v34 = vpack.c.bf16 %v5870_v57, %v5869_v32  ;;  %v7450_v57 = vld [vmem:[%s13394_s5 + $0x170] sm:$0xff] }
 0x3a8   : > { %8484 = vmatpush3.bf16.msra.mxu1 %v8483_v55  ;;  %8452 = vmatpush3.bf16.msra.mxu0 %v8451_v30  ;;  %v8493_v58 = vpack.c.bf16 %v5888_v36, %v5887_v24  ;;  %v5878_v55 = vld [vmem:[%s13394_s5 + $0x78] sm:$0xff]  ;;  %v7464_v30 = vld [vmem:[%s13394_s5 + $0x1e0] sm:$0xff]  ;;  %v7518_v7 = vld [vmem:[%s13394_s5 + $0x390] sm:$0xff] }
 0x3a9   : > { %8486 = vmatprep.subr.bf16.mxu1 %v8485_v31  ;;  %8454 = vmatprep.subr.bf16.mxu0 %v8453_v29  ;;  %v8507_v25 = vpack.c.bf16 %v5878_v55, %v5877_v10  ;;  %v7465_v31 = vld [vmem:[%s13394_s5 + $0x1e8] sm:$0xff]  ;;  %v7451_v24 = vld [vmem:[%s13394_s5 + $0x178] sm:$0xff] }
 0x3aa   : > { %5588 = vmatmul.mubr.f32.gmra.mrb[52].mxu0 %v11360_v40  ;;  %5701 = vmatmul.mubr.f32.gmra.mrb[52].mxu1 %v11360_v40  ;;  %v5871_v40 = vld [vmem:[%s13394_s5 + $0x40] sm:$0xff]  ;;  %v8469_v29 = vpack.c.bf16 %v7465_v31, %v7464_v30  ;;  %v8475_v36 = vpack.c.bf16 %v7451_v24, %v7450_v57 }
 0x3ab   : > { %5593 = vmatprep.mubr.f32.mxu0 %v11428_v38  ;;  %5706 = vmatprep.mubr.f32.mxu1 %v11428_v38  ;;  %v8495_v38 = vpack.c.bf16 %v5872_v17, %v5871_v40  ;;  %v5769_v17 = vld [vmem:[%s13393_s4] sm:$0xf] }
 0x3ac   : > { %8488 = vmatpush3.bf16.msra.mxu1 %v8487_v5  ;;  %8456 = vmatpush3.bf16.msra.mxu0 %v8455_v61  ;;  %v8471_v5 = vpack.c.bf16 %v7449_v46, %v7448_v33  ;;  %v7466_v61 = vld [vmem:[%s13394_s5 + $0x1f0] sm:$0xff]  ;;  %v8545_v33 = vpack.c.bf16 %v7519_v59, %v7518_v7 }
 0x3ad   : > { %8490 = vmatprep.subr.bf16.mxu1 %v8489_v56  ;;  %v7467_v56 = vld [vmem:[%s13394_s5 + $0x1f8] sm:$0xff]  ;;  %v7502_v46 = vld [vmem:[%s13394_s5 + $0x310] sm:$0xff] }
 0x3ae   : > { %5594 = vmatmul.mubr.f32.gmra.mrb[54].mxu0 %v11445_v16  ;;  %5707 = vmatmul.mubr.f32.gmra.mrb[54].mxu1 %v11445_v16  ;;  %v3790_v16 = vmax.f32 %v11714_v51, 0.0  ;;  %v5889_v51 = vld [vmem:[%s13394_s5 + $0xd0] sm:$0xff]  ;;  %v8473_v32 = vpack.c.bf16 %v7467_v56, %v7466_v61  ;;  %v7520_v56 = vld [vmem:[%s13394_s5 + $0x3a0] sm:$0xff] }
 0x3af   : > { %5599 = vmatprep.mubr.f32.mxu0 %v11513_v14  ;;  %5712 = vmatprep.mubr.f32.mxu1 %v11513_v14  ;;  %v3789_v14 = vmax.f32 %v11703_v12, 0.0  ;;  %v7442_v12 = vld [vmem:[%s13394_s5 + $0x130] sm:$0xff] }
 0x3b0   : > { %8492 = vmatpush3.bf16.msra.mxu1 %v8491_v34  ;;  %v7484_v34 = vld [vmem:[%s13394_s5 + $0x280] sm:$0xff] }
 0x3b1   : > { %8494 = vmatprep.subr.bf16.mxu1 %v8493_v58  ;;  %v7485_v58 = vld [vmem:[%s13394_s5 + $0x288] sm:$0xff] }
 0x3b2   : > { %5600 = vmatmul.mubr.f32.gmra.mrb[56].mxu0 %v11530_v47  ;;  %5713 = vmatmul.mubr.f32.gmra.mrb[56].mxu1 %v11530_v47  ;;  %v7458_v47 = vld [vmem:[%s13394_s5 + $0x1b0] sm:$0xff]  ;;  %v8509_v40 = vpack.c.bf16 %v7485_v58, %v7484_v34 }
 0x3b3   : > { %5605 = vmatprep.mubr.f32.mxu0 %v12208_v41  ;;  %5718 = vmatprep.mubr.f32.mxu1 %v12208_v41  ;;  %v7459_v41 = vld [vmem:[%s13394_s5 + $0x1b8] sm:$0xff] }
 0x3b4   : > { %8496 = vmatpush3.bf16.msra.mxu1 %v8495_v38  ;;  %v13078_v38 = vrot.slane %v5769_v17, %v3485_v50 }
 0x3b6   : > { %5606 = vmatmul.mubr.f32.gmra.mrb[58].mxu0 %v12233_v8  ;;  %5719 = vmatmul.mubr.f32.gmra.mrb[58].mxu1 %v12233_v8  ;;  %v8457_v8 = vpack.c.bf16 %v7459_v41, %v7458_v47  ;;  %v13090_v47 = vrot.slane %v5769_v17, %v3497_v3 }
 0x3b7   : > { %5611 = vmatprep.mubr.f32.mxu0 %v12630_v2  ;;  %5724 = vmatprep.mubr.f32.mxu1 %v12630_v2  ;;  %v5890_v2 = vld [vmem:[%s13394_s5 + $0xd8] sm:$0xff] }
 0x3b8   : > { %v8497_v42 = vpack.c.bf16 %v5890_v2, %v5889_v51  ;;  %8458 = vmatprep.subr.bf16.mxu0 %v8457_v8 }
 0x3ba   : > { %5612 = vmatmul.mubr.f32.gmra.mrb[60].mxu0 %v12655_v37  ;;  %5725 = vmatmul.mubr.f32.gmra.mrb[60].mxu1 %v12655_v37  ;;  %v7443_v37 = vld [vmem:[%s13394_s5 + $0x138] sm:$0xff] }
 0x3bb   : > { %5617 = vmatprep.mubr.f32.mxu0 %v3790_v16  ;;  %5730 = vmatprep.mubr.f32.mxu1 %v3790_v16  ;;  %v8459_v45 = vpack.c.bf16 %v7443_v37, %v7442_v12  ;;  %v13082_v16 = vrot.slane %v5769_v17, %v3493_v52 }
 0x3bc   : > { %8498 = vmatprep.subr.bf16.mxu1 %v8497_v42 }
 0x3bd   : > { %8460 = vmatpush3.bf16.msra.mxu0 %v8459_v45  ;;  %8500 = vmatpush3.bf16.msra.mxu1 %v8499_v13 }
 0x3be   : > { %5618 = vmatmul.mubr.f32.gmra.mrb[62].mxu0 %v3789_v14  ;;  %5731 = vmatmul.mubr.f32.gmra.mrb[62].mxu1 %v3789_v14  ;;  %v13086_v14 = vrot.slane %v5769_v17, %v3489_v53  ;;  %v7469_v17 = vld [vmem:[%s13394_s5 + $0x208] sm:$0xff] }
 0x3bf   : > { %8462 = vmatprep.subr.bf16.mxu0 %v8461_v22  ;;  %8502 = vmatprep.subr.bf16.mxu1 %v8501_v48 }
 0x3c1   : > { %8464 = vmatpush3.bf16.msra.mxu0 %v8463_v60  ;;  %8504 = vmatpush3.bf16.msra.mxu1 %v8503_v28  ;;  %v7500_v28 = vld [vmem:[%s13394_s5 + $0x300] sm:$0xff] }
 0x3c2   : > { %8466 = vmatprep.subr.bf16.mxu0 %v8465_v6  ;;  %8506 = vmatprep.subr.bf16.mxu1 %v8505_v1 }
 0x3c5   : > { %8468 = vmatpush3.bf16.msra.mxu0 %v8467_v9  ;;  %8508 = vmatpush3.bf16.msra.mxu1 %v8507_v25  ;;  %v8543_v25 = vpack.c.bf16 %v7501_v0, %v7500_v28  ;;  %v7488_v28 = vld [vmem:[%s13394_s5 + $0x2a0] sm:$0xff] }
 0x3c6   : > { %8470 = vmatprep.subr.bf16.mxu0 %v8469_v29  ;;  %8542 = vmatprep.subr.bf16.mxu1 %v8541_v54  ;;  %v7503_v54 = vld [vmem:[%s13394_s5 + $0x318] sm:$0xff] }
 0x3c7   : > { %v8547_v58 = vpack.c.bf16 %v7503_v54, %v7502_v46  ;;  %v7472_v54 = vld [vmem:[%s13394_s5 + $0x220] sm:$0xff] }
 0x3c9   : > { %8472 = vmatpush3.bf16.msra.mxu0 %v8471_v5 }
 0x3ca   : > { %8474 = vmatprep.subr.bf16.mxu0 %v8473_v32  ;;  %v7521_v32 = vld [vmem:[%s13394_s5 + $0x3a8] sm:$0xff] }
 0x3cd   : > { %8476 = vmatpush3.bf16.msra.mxu0 %v8475_v36 }
 0x3ce   : > { %8510 = vmatprep.subr.bf16.mxu0 %v8509_v40  ;;  %v7468_v40 = vld [vmem:[%s13394_s5 + $0x200] sm:$0xff] }
 0x475   : > { %v5577_v41 = vpop.f32.mrb[48].mxu0  ;;  %v5690_v51 = vpop.f32.mrb[48].mxu1 }
 0x476   : > { %v5791_v8 = vadd.f32 %v13078_v38, %v5577_v41  ;;  %v5793_v2 = vadd.f32 %v13082_v16, %v5690_v51  ;;  %v5579_v50 = vpop.f32.mrb[49].mxu0  ;;  %v5692_v12 = vpop.f32.mrb[49].mxu1  ;;  %v7504_v41 = vld [vmem:[%s13394_s5 + $0x320] sm:$0xff] }
 0x477   : > { %v5792_v37 = vadd.f32 %v13086_v14, %v5579_v50  ;;  %v5794_v52 = vadd.f32 %v13090_v47, %v5692_v12 }
 0x478   : > { %v5823_v42 = vmax.f32 %v5791_v8, %v5793_v2 }
 0x479   : > { %v5824_v45 = vmax.f32 %v5792_v37, %v5794_v52  ;;  %v5583_v53 = vpop.f32.mrb[50].mxu0  ;;  %v5696_v44 = vpop.f32.mrb[50].mxu1  ;;  %v8549_v37 = vpack.c.bf16 %v7521_v32, %v7520_v56  ;;  %v7505_v52 = vld [vmem:[%s13394_s5 + $0x328] sm:$0xff] }
 0x47a   : > { %v5795_v49 = vadd.f32 %v13078_v38, %v5583_v53  ;;  %v5797_v3 = vadd.f32 %v13082_v16, %v5696_v44  ;;  %v5585_v11 = vpop.f32.mrb[51].mxu0  ;;  %v5698_v13 = vpop.f32.mrb[51].mxu1 }
 0x47b   : > { %v5796_v39 = vadd.f32 %v13086_v14, %v5585_v11  ;;  %v5798_v15 = vadd.f32 %v13090_v47, %v5698_v13  ;;  %v7523_v11 = vld [vmem:[%s13394_s5 + $0x3b8] sm:$0xff] }
 0x47c   : > { %v5825_v18 = vmax.f32 %v5795_v49, %v5797_v3  ;;  %v7522_v3 = vld [vmem:[%s13394_s5 + $0x3b0] sm:$0xff] }
 0x47d   : > { %v5826_v22 = vmax.f32 %v5796_v39, %v5798_v15  ;;  %v5589_v23 = vpop.f32.mrb[52].mxu0  ;;  %v5702_v21 = vpop.f32.mrb[52].mxu1  ;;  %v8511_v39 = vpack.c.bf16 %v7469_v17, %v7468_v40  ;;  %v7470_v15 = vld [vmem:[%s13394_s5 + $0x210] sm:$0xff]  ;;  %v8553_v59 = vpack.c.bf16 %v7523_v11, %v7522_v3  ;;  %v7491_v40 = vld [vmem:[%s13394_s5 + $0x2b8] sm:$0xff] }
 0x47e   : > { %v5859_v4 = vmax.f32 %v5823_v42, %v5825_v18  ;;  %v5799_v48 = vadd.f32 %v13078_v38, %v5589_v23  ;;  %v5801_v60 = vadd.f32 %v13082_v16, %v5702_v21  ;;  %v5591_v63 = vpop.f32.mrb[53].mxu0  ;;  %v5704_v20 = vpop.f32.mrb[53].mxu1  ;;  %v7486_v42 = vld [vmem:[%s13394_s5 + $0x290] sm:$0xff]  ;;  %v7471_v18 = vld [vmem:[%s13394_s5 + $0x218] sm:$0xff] }
 0x47f   : > { %v5800_v62 = vadd.f32 %v13086_v14, %v5591_v63  ;;  %v5802_v19 = vadd.f32 %v13090_v47, %v5704_v20  ;;  %v5860_v6 = vmax.f32 %v5824_v45, %v5826_v22  ;;  %v7487_v45 = vld [vmem:[%s13394_s5 + $0x298] sm:$0xff]  ;;  %v7506_v63 = vld [vmem:[%s13394_s5 + $0x330] sm:$0xff] }
 0x480   : > { %v5827_v26 = vmax.f32 %v5799_v48, %v5801_v60  ;;  %v5861_v30 = vmax.f32 %v5859_v4, 0.0  ;;  %v8551_v48 = vpack.c.bf16 %v7505_v52, %v7504_v41  ;;  %v8513_v60 = vpack.c.bf16 %v7487_v45, %v7486_v42  ;;  %v7507_v20 = vld [vmem:[%s13394_s5 + $0x338] sm:$0xff] }
 0x481   : > { %v5828_v1 = vmax.f32 %v5800_v62, %v5802_v19  ;;  %v5595_v9 = vpop.f32.mrb[54].mxu0  ;;  %v5708_v10 = vpop.f32.mrb[54].mxu1  ;;  %v5862_v55 = vmax.f32 %v5860_v6, 0.0  ;;  %v7475_v3 = vld [vmem:[%s13394_s5 + $0x238] sm:$0xff] }
 0x482   : > { %v5803_v31 = vadd.f32 %v13078_v38, %v5595_v9  ;;  %v5805_v43 = vadd.f32 %v13082_v16, %v5708_v10  ;;  %v5597_v29 = vpop.f32.mrb[55].mxu0  ;;  %v5710_v27 = vpop.f32.mrb[55].mxu1  ;;  %v7525_v9 = vld [vmem:[%s13394_s5 + $0x3c8] sm:$0xff] }
 0x483   : > { %v5804_v5 = vadd.f32 %v13086_v14, %v5597_v29  ;;  %v5806_v61 = vadd.f32 %v13090_v47, %v5710_v27  ;;  %6071 = vmatprep.mubr.f32.mxu1 %v5862_v55 }
 0x484   : > { %v5829_v57 = vmax.f32 %v5803_v31, %v5805_v43  ;;  %6072 = vmatmul.mubr.f32.vlgmr.msra.gmra.mrb[64].mxu1 %v5861_v30  ;;  %v8515_v30 = vpack.c.bf16 %v7471_v18, %v7470_v15  ;;  %v8555_v31 = vpack.c.bf16 %v7507_v20, %v7506_v63 }
 0x485   : > { %v5830_v24 = vmax.f32 %v5804_v5, %v5806_v61  ;;  %8544 = vmatpush3.bf16.msra.mxu1 %v8543_v25  ;;  %v5601_v36 = vpop.f32.mrb[56].mxu0  ;;  %v5714_v34 = vpop.f32.mrb[56].mxu1  ;;  %v7473_v5 = vld [vmem:[%s13394_s5 + $0x228] sm:$0xff]  ;;  %v7508_v61 = vld [vmem:[%s13394_s5 + $0x340] sm:$0xff] }
 0x486   : > { %v5900_v51 = vmax.f32 %v5827_v26, %v5829_v57  ;;  %v5807_v8 = vadd.f32 %v13078_v38, %v5601_v36  ;;  %v5809_v2 = vadd.f32 %v13082_v16, %v5714_v34  ;;  %v5603_v50 = vpop.f32.mrb[57].mxu0  ;;  %v5716_v12 = vpop.f32.mrb[57].mxu1  ;;  %8546 = vmatprep.subr.bf16.mxu1 %v8545_v33  ;;  %v7489_v26 = vld [vmem:[%s13394_s5 + $0x2a8] sm:$0xff] }
 0x487   : > { %v5808_v53 = vadd.f32 %v13086_v14, %v5603_v50  ;;  %v5810_v44 = vadd.f32 %v13090_v47, %v5716_v12  ;;  %v5901_v49 = vmax.f32 %v5828_v1, %v5830_v24  ;;  %v7524_v1 = vld [vmem:[%s13394_s5 + $0x3c0] sm:$0xff]  ;;  %v8517_v33 = vpack.c.bf16 %v7489_v26, %v7488_v28  ;;  %v7509_v34 = vld [vmem:[%s13394_s5 + $0x348] sm:$0xff]  ;;  %v7494_v26 = vld [vmem:[%s13394_s5 + $0x2d0] sm:$0xff] }
 0x488   : > { %v5831_v13 = vmax.f32 %v5807_v8, %v5809_v2  ;;  %v5902_v0 = vmax.f32 %v5900_v51, 0.0  ;;  %v8557_v46 = vpack.c.bf16 %v7525_v9, %v7524_v1  ;;  %v7526_v8 = vld [vmem:[%s13394_s5 + $0x3d0] sm:$0xff]  ;;  %v7527_v2 = vld [vmem:[%s13394_s5 + $0x3d8] sm:$0xff]  ;;  %v8519_v12 = vpack.c.bf16 %v7473_v5, %v7472_v54  ;;  %v7496_v5 = vld [vmem:[%s13394_s5 + $0x2e0] sm:$0xff] }
 0x489   : > { %v5832_v22 = vmax.f32 %v5808_v53, %v5810_v44  ;;  %8548 = vmatpush3.bf16.msra.mxu1 %v8547_v58  ;;  %v5607_v23 = vpop.f32.mrb[58].mxu0  ;;  %v5720_v21 = vpop.f32.mrb[58].mxu1  ;;  %v5903_v4 = vmax.f32 %v5901_v49, 0.0  ;;  %v7490_v58 = vld [vmem:[%s13394_s5 + $0x2b0] sm:$0xff]  ;;  %v8559_v53 = vpack.c.bf16 %v7509_v34, %v7508_v61  ;;  %v8561_v18 = vpack.c.bf16 %v7527_v2, %v7526_v8  ;;  %v7495_v9 = vld [vmem:[%s13394_s5 + $0x2d8] sm:$0xff]  ;;  %v7497_v61 = vld [vmem:[%s13394_s5 + $0x2e8] sm:$0xff] }
 0x48a   : > { %v5811_v62 = vadd.f32 %v13078_v38, %v5607_v23  ;;  %v5813_v19 = vadd.f32 %v13082_v16, %v5720_v21  ;;  %v5609_v6 = vpop.f32.mrb[59].mxu0  ;;  %v5722_v7 = vpop.f32.mrb[59].mxu1  ;;  %8550 = vmatprep.subr.bf16.mxu1 %v8549_v37  ;;  %v8521_v44 = vpack.c.bf16 %v7491_v40, %v7490_v58  ;;  %v7474_v49 = vld [vmem:[%s13394_s5 + $0x230] sm:$0xff]  ;;  %v7511_v23 = vld [vmem:[%s13394_s5 + $0x358] sm:$0xff]  ;;  %v7492_v21 = vld [vmem:[%s13394_s5 + $0x2c0] sm:$0xff] }
 0x48b   : > { %v5812_v10 = vadd.f32 %v13086_v14, %v5609_v6  ;;  %v5814_v55 = vadd.f32 %v13090_v47, %v5722_v7  ;;  %6001 = vmatprep.mubr.f32.mxu0 %v5903_v4  ;;  %v7493_v4 = vld [vmem:[%s13394_s5 + $0x2c8] sm:$0xff]  ;;  %v7512_v7 = vld [vmem:[%s13394_s5 + $0x360] sm:$0xff]  ;;  %v7515_v54 = vld [vmem:[%s13394_s5 + $0x378] sm:$0xff] }
 0x48c   : > { %v5833_v25 = vmax.f32 %v5811_v62, %v5813_v19  ;;  %6002 = vmatmul.mubr.f32.vlgmr.msra.gmra.mrb[64].mxu0 %v5902_v0  ;;  %v7477_v0 = vld [vmem:[%s13394_s5 + $0x248] sm:$0xff]  ;;  %v8525_v19 = vpack.c.bf16 %v7493_v4, %v7492_v21  ;;  %v7498_v58 = vld [vmem:[%s13394_s5 + $0x2f0] sm:$0xff]  ;;  %v7499_v40 = vld [vmem:[%s13394_s5 + $0x2f8] sm:$0xff] }
 0x48d   : > { %v5834_v43 = vmax.f32 %v5812_v10, %v5814_v55  ;;  %8512 = vmatpush3.bf16.msra.mxu0 %v8511_v39  ;;  %8552 = vmatpush3.bf16.msra.mxu1 %v8551_v48  ;;  %v5613_v29 = vpop.f32.mrb[60].mxu0  ;;  %v5726_v27 = vpop.f32.mrb[60].mxu1  ;;  %v7528_v48 = vld [vmem:[%s13394_s5 + $0x3e0] sm:$0xff]  ;;  %v7530_v10 = vld [vmem:[%s13394_s5 + $0x3f0] sm:$0xff]  ;;  %v7531_v55 = vld [vmem:[%s13394_s5 + $0x3f8] sm:$0xff] }
 0x48e   : > { %v13197_v56 = vmax.f32 %v5831_v13, %v5833_v25  ;;  %v5815_v32 = vadd.f32 %v13078_v38, %v5613_v29  ;;  %v5817_v57 = vadd.f32 %v13082_v16, %v5726_v27  ;;  %v5615_v24 = vpop.f32.mrb[61].mxu0  ;;  %v5728_v36 = vpop.f32.mrb[61].mxu1  ;;  %8514 = vmatprep.subr.bf16.mxu0 %v8513_v60  ;;  %8554 = vmatprep.subr.bf16.mxu1 %v8553_v59  ;;  %v7529_v60 = vld [vmem:[%s13394_s5 + $0x3e8] sm:$0xff]  ;;  %v7482_v8 = vld [vmem:[%s13394_s5 + $0x270] sm:$0xff]  ;;  %v7483_v2 = vld [vmem:[%s13394_s5 + $0x278] sm:$0xff] }
 0x48f   : > { %v5816_v17 = vadd.f32 %v13086_v14, %v5615_v24  ;;  %v5818_v41 = vadd.f32 %v13090_v47, %v5728_v36  ;;  %v6083_v51 = vmax.f32 %v5832_v22, %v5834_v43  ;;  %v7510_v22 = vld [vmem:[%s13394_s5 + $0x350] sm:$0xff]  ;;  %v8565_v6 = vpack.c.bf16 %v7529_v60, %v7528_v48  ;;  %v7513_v59 = vld [vmem:[%s13394_s5 + $0x368] sm:$0xff]  ;;  %v7480_v36 = vld [vmem:[%s13394_s5 + $0x260] sm:$0xff] }
 0x490   : > { %v5835_v50 = vmax.f32 %v5815_v32, %v5817_v57  ;;  %v8563_v28 = vpack.c.bf16 %v7511_v23, %v7510_v22  ;;  %v7478_v43 = vld [vmem:[%s13394_s5 + $0x250] sm:$0xff]  ;;  %v8529_v29 = vpack.c.bf16 %v7495_v9, %v7494_v26  ;;  %v8569_v27 = vpack.c.bf16 %v7531_v55, %v7530_v10  ;;  %v7481_v34 = vld [vmem:[%s13394_s5 + $0x268] sm:$0xff] }
 0x491   : > { %v5836_v37 = vmax.f32 %v5816_v17, %v5818_v41  ;;  %8516 = vmatpush3.bf16.msra.mxu0 %v8515_v30  ;;  %8556 = vmatpush3.bf16.msra.mxu1 %v8555_v31  ;;  %v5619_v52 = vpop.f32.mrb[62].mxu0  ;;  %v5732_v42 = vpop.f32.mrb[62].mxu1  ;;  %v6085_v45 = vmax.f32 %v6083_v51, 0.0  ;;  %v8567_v31 = vpack.c.bf16 %v7513_v59, %v7512_v7  ;;  %v8533_v24 = vpack.c.bf16 %v7497_v61, %v7496_v5 }
 0x492   : > { %v5819_v11 = vadd.f32 %v13078_v38, %v5619_v52  ;;  %v5821_v13 = vadd.f32 %v13082_v16, %v5732_v42  ;;  %v5621_v39 = vpop.f32.mrb[63].mxu0  ;;  %v5734_v15 = vpop.f32.mrb[63].mxu1  ;;  %8518 = vmatprep.subr.bf16.mxu0 %v8517_v33  ;;  %8558 = vmatprep.subr.bf16.mxu1 %v8557_v46  ;;  %v7479_v33 = vld [vmem:[%s13394_s5 + $0x258] sm:$0xff]  ;;  %v7514_v46 = vld [vmem:[%s13394_s5 + $0x370] sm:$0xff]  ;;  %v8535_v17 = vpack.c.bf16 %v7481_v34, %v7480_v36  ;;  %v6313_v52 = vld [vmem:[%s13396_s7 + $0x8] sm:$0xff]  ;;  %v9209_v42 = vmov 0.0|0.0  }
 0x493   : > { %v5820_v38 = vadd.f32 %v13086_v14, %v5621_v39  ;;  %v5822_v16 = vadd.f32 %v13090_v47, %v5734_v15  ;;  %6183 = vmatprep.mubr.f32.mxu0 %v6085_v45  ;;  %v8523_v14 = vpack.c.bf16 %v7475_v3, %v7474_v49  ;;  %v7476_v47 = vld [vmem:[%s13394_s5 + $0x240] sm:$0xff]  ;;  %v8531_v32 = vpack.c.bf16 %v7479_v33, %v7478_v43  ;;  %v6317_v3 = vld [vmem:[%s13396_s7 + $0x28] sm:$0xff] }
 0x494   : > { %v5837_v63 = vmax.f32 %v5819_v11, %v5821_v13  ;;  %v8527_v30 = vpack.c.bf16 %v7477_v0, %v7476_v47  ;;  %v8571_v57 = vpack.c.bf16 %v7515_v54, %v7514_v46  ;;  %v8537_v51 = vpack.c.bf16 %v7499_v40, %v7498_v58  ;;  %v6316_v49 = vld [vmem:[%s13396_s7 + $0x20] sm:$0xff]  ;;  %v6318_v13 = vld [vmem:[%s13396_s7 + $0x30] sm:$0x3] }
 0x495   : > { %v5838_v20 = vmax.f32 %v5820_v38, %v5822_v16  ;;  %8520 = vmatpush3.bf16.msra.mxu0 %v8519_v12  ;;  %8560 = vmatpush3.bf16.msra.mxu1 %v8559_v53  ;;  %v6084_v12 = vmax.f32 %v13197_v56, 0.0  ;;  %v6314_v53 = vld [vmem:[%s13396_s7 + $0x10] sm:$0xff]  ;;  %v6315_v56 = vld [vmem:[%s13396_s7 + $0x18] sm:$0xff]  ;;  %v8580_v11 = vpack.c.bf16 %v6317_v3, %v6316_v49 }
 0x496   : > { %v6195_v62 = vmax.f32 %v5835_v50, %v5837_v63  ;;  %8522 = vmatprep.subr.bf16.mxu0 %v8521_v44  ;;  %8562 = vmatprep.subr.bf16.mxu1 %v8561_v18  ;;  %v8539_v50 = vpack.c.bf16 %v7483_v2, %v7482_v8  ;;  %v8577_v44 = vpack.c.bf16 %v6315_v56, %v6314_v53 }
 0x497   : > { %v6196_v1 = vmax.f32 %v5836_v37, %v5838_v20  ;;  %v6312_v37 = vld [vmem:[%s13396_s7] sm:$0xff] }
 0x498   : > { %v6197_v41 = vmax.f32 %v6195_v62, 0.0  ;;  %v8574_v45 = vpack.c.bf16 %v6313_v52, %v6312_v37  ;;  %v7533_v62 = vld [vmem:[%s13397_s8] ss:$0 sm:$0xff] }
 0x499   : > { %8524 = vmatpush3.bf16.msra.mxu0 %v8523_v14  ;;  %8564 = vmatpush3.bf16.msra.mxu1 %v8563_v28  ;;  %v6198_v25 = vmax.f32 %v6196_v1, 0.0  ;;  %v7532_v28 = vld [vmem:[%s13395_s6] ss:$0 sm:$0xff] }
 0x49a   : > { %8526 = vmatprep.subr.bf16.mxu0 %v8525_v19  ;;  %8566 = vmatprep.subr.bf16.mxu1 %v8565_v6 }
 0x49b   : > { %6296 = vmatprep.mubr.f32.mxu1 %v6198_v25 }
 0x49d   : > { %8528 = vmatpush3.bf16.msra.mxu0 %v8527_v30  ;;  %8568 = vmatpush3.bf16.msra.mxu1 %v8567_v31 }
 0x49e   : > { %8530 = vmatprep.subr.bf16.mxu0 %v8529_v29  ;;  %8570 = vmatprep.subr.bf16.mxu1 %v8569_v27 }
 0x4a1   : > { %8532 = vmatpush3.bf16.msra.mxu0 %v8531_v32  ;;  %8572 = vmatpush3.bf16.msra.mxu1 %v8571_v57 }
 0x4a2   : > { %8534 = vmatprep.subr.bf16.mxu0 %v8533_v24 }
 0x4a4   : > { %6297 = vmatmul.mubr.f32.vlgmr.msra.gmra.mrb[66].mxu1 %v6197_v41 }
 0x4a5   : > { %8536 = vmatpush3.bf16.msra.mxu0 %v8535_v17 }
 0x4a6   : > { %8538 = vmatprep.subr.bf16.mxu0 %v8537_v51 }
 0x4a9   : > { %8540 = vmatpush3.bf16.msra.mxu0 %v8539_v50 }
 0x4aa   : > { %8573 = vmatprep.subr.bf16.mxu0 %v9209_v42 }
 0x4ac   : > { %6184 = vmatmul.mubr.f32.vlgmr.msra.gmra.mrb[66].mxu0 %v6084_v12 }
 0x4ad   : > { %8575 = vmatpush3.bf16.msra.mxu0 %v8574_v45  ;;  %7702 = vmatprep.mubr.msk.f32.mxu0 %vm9210_vm5, %v9207_v35 }
 0x4ae   : > { %8576 = vmatprep.subr.bf16.mxu0 %v9209_v42 }
 0x4b1   : > { %8578 = vmatpush3.bf16.msra.mxu0 %v8577_v44 }
 0x4b2   : > { %8579 = vmatprep.subr.bf16.mxu0 %v9209_v42 }
 0x4b5   : > { %8581 = vmatpush3.bf16.msra.mxu0 %v8580_v11 }
 0x4b6   : > { %7700 = vmatprep.subr.mxu0 %v9207_v35 }
 0x4b9   : > { %7701 = vmatpush3.msk.msra.mxu0 %vm6330_vm4, %v6318_v13 }
 0x557   : > { %v7607_v39 = vpop.f32.mrb[64].mxu1 }
 0x558   : > { %v7608_v15 = vpop.f32.mrb[65].mxu1 }
 0x559   : > { %v7609_v18 = vadd.f32 %v7608_v15, %v7607_v39 }
 0x55f   : > { %v7572_v22 = vpop.f32.mrb[64].mxu0 }
 0x560   : > { %v7573_v23 = vpop.f32.mrb[65].mxu0 }
 0x561   : > { %v7574_v21 = vadd.f32 %v7573_v23, %v7572_v22 }
 0x563   : > { %v6074_v38 = vadd.f32 %v7609_v18, %v7574_v21 }
 0x577   : > { %v7677_v16 = vpop.f32.mrb[66].mxu1 }
 0x578   : > { %v7678_v4 = vpop.f32.mrb[67].mxu1 }
 0x579   : > { %v7679_v48 = vadd.f32 %v7678_v4, %v7677_v16 }
 0x57f   : > { %v7642_v60 = vpop.f32.mrb[66].mxu0 }
 0x580   : > { %v7643_v63 = vpop.f32.mrb[67].mxu0 }
 0x581   : > { %v7644_v20 = vadd.f32 %v7643_v63, %v7642_v60 }
 0x583   : > { %v6189_v14 = vadd.f32 %v7644_v20, %v6074_v38 }
 0x585   : > { %v6302_v47 = vadd.f32 %v7679_v48, %v6189_v14 }
 0x587   : > { %v6310_v35 = vadd.f32 %v7532_v28, %v6302_v47 }
 0x589   : > { %v6311_v0 = vmax.f32 %v6310_v35, 0.0 }
 0x58b   : > { %7703 = vmatmul.mubr.msk.f32.vlgmr.msra.gmra.mrb[68].mxu0 %vm6326_vm6, %v6311_v0 }
 0x65e   : > { %v6400_v19 = vpop.f32.mrb[68].mxu0 }
 0x65f   : > { %v6401_v6 = vadd.f32 %v7533_v62, %v6400_v19  ;;  %v7704_v7 = vpop.f32.mrb[69].mxu0 }
 0x661   : > { %v6405_v59 = vsel %vm6404_vm7, %v6401_v6, -inf }
 0x662   : > { %6406 = vmax.xlane.f32.xlu0 %v6405_v59 }
 0x6ef   : > { %v6407_v26 = vpop.xlane.xlu0 %6406 }
 0x6f0   : > { %v6408_v1 = vsub.f32 %v6401_v6, %v6407_v26 }
 0x6f2   : > { %v6409_v9 = vmul.f32 1.442695, %v6408_v1 }
 0x6f4   : > { %9139 = vpow2.f32 %v6409_v9 }
 0x6fe   : > { %v9140_v10 = vpop.eup %9139 }
 0x6ff   : > { %v6411_v55 = vsel %vm6404_vm7, %v9140_v10, 0.0 }
 0x700   : > { %6412 = vadd.xlane.f32.xlu0 %v6411_v55 }
 0x78d   : > { %v6413_v25 = vpop.xlane.xlu0 %6412 }
 0x78e   : > { %9141 = vlog2.f32 %v6413_v25 }
 0x798   : > { %v9142_v30 = vpop.eup %9141 }
 0x799   : > { %v6415_v31 = vmul.f32 0.6931472, %v9142_v30 }
 0x79b   : > { %v6416_v43 = vadd.f32 %v6415_v31, %v6407_v26 }
 0x79d   : > { %v6417_v29 = vsub.f32 %v6401_v6, %v6416_v43 }
 0x79f   : > { %6418 = vst.msk [vmem:[%s472_s27] sm:$0xff] %vm6404_vm7, %v6417_v29 }
 0x7a0   : > { %9156 = shalt.err (!%p9153_p5)
}
 0x7a1   : > { %s9157_s28 = scalar_lea.hbm %s13344_s16, 128  ;;  %s9161_s27 = scalar_lea.hbm %s13398_s9, 256 }
 0x7a2   : > { %p9158_p7 = scmp.ne.s32.totalorder %s13344_s16, %s9157_s28  ;;  %p9162_p12 = scmp.lt.u32.totalorder %s13344_s16, %s13398_s9 }
 0x7a3   : > { %p9163_p13 = scmp.lt.u32.totalorder %s9161_s27, %s9157_s28  ;;  %p9165_p1 = scmp.lt.u32.totalorder %s9157_s28, %s13344_s16 }
 0x7a4   : > { %p9159_p10 = pnand %p9158_p7, %p9300_p6 }
 0x7a5   : > { %p9164_p0 = por %p9163_p13, %p9162_p12 }
 0x7a6   : > { %p9160_p11 = pneg %p9159_p10 }
 0x7a7   : > { %p9166_p2 = por %p9165_p1, %p9164_p0 }
 0x7a9   : > { %p9167_p3 = pnand %p9166_p2, %p9160_p11 }
 0x7ab   : > { %9170 = shalt.err (!%p9167_p3)
}
 0x7ac   : > { %9096 = dma.vmem_to_hbm [thread:$0]  (%p9300_p6), %s13346_s29, 128, %s13344_s16, %s6420_s17  }
 0x7ad PF: > { %s6445_s21 = sand.u32 1, %s9193_s30   ;;  %p9099_p4 = pnand %p6500_p9, %p9304_p8 }
 0x7ae   : > { %s6446_s22 = scalar_lea.sflag [#allocation7], %s6445_s21 }
 0x7af   : > { %9188 = dma.done.wait (!%p9099_p4), %s6446_s22, 128  }
 0x7b0   : > { %9190 = vsyncadd (!%p9099_p4), %s6446_s22, 4294967168  ;;  %p19_p5 = scmp.ge.s32.totalorder %s9285_s15, 4   ;;  %s13405_s30 = smov %s9197_s10 }
 0x7b1   : > { %s13406_s10 = smov %s9201_s11  ;;  %s13407_s11 = smov %s9298_s18 }
 0x7b2   : > { %s13408_s12 = smov %s9285_s15  ;;  %21 = sbr.rel (!%p19_p5) target bundleno = 3 (0x3), region = 156 }
 0x7b9   :  { %6451 = vsyncpa [#allocation7], 1 }
 0x7ba   :  { %6453 = vsyncpa [#allocation7 + $0x1], 1 }

</bundles_post_ra>
